<compile_context>
chip_gen: v7x
topology: tpu7x:2x2x1
jax: 0.10.0
libtpu: 0.0.40
codegen_flags: <defaults>
</compile_context>

<pallas_src>
import jax
import jax.numpy as jnp
from jax.experimental import pallas as pl
from jax.experimental.pallas import tpu as pltpu


# ----------------------------------------------------------------------------
# Pallas kernels: fused (conv-matmul + 1x1 + 1x1 + ReLUs + 2x2 maxpool [+ fc])
# ----------------------------------------------------------------------------
def _matmul_bias_relu(x, w_ref, b_ref):
    y = jnp.dot(x, w_ref[...], preferred_element_type=jnp.float32)
    return jnp.maximum(y + b_ref[...], 0.0)


def _block_body(a_ref, w0, b0, w1, b1, w2, b2, m_pool):
    """kxk conv (im2col matmul) + two 1x1 convs, ReLU after each, then 2x2 pool.

    Rows of `a` are ordered (pool_corner, b, ho, wo): the 4 pool corners are
    4 contiguous chunks of m_pool rows, so max-pooling is 3 elementwise maxima
    on VMEM-resident data (no HBM round trip, no extra launch).
    """
    y = _matmul_bias_relu(a_ref[...], w0, b0).astype(jnp.bfloat16)
    y = _matmul_bias_relu(y, w1, b1).astype(jnp.bfloat16)
    y = _matmul_bias_relu(y, w2, b2)                       # keep f32 for the pool
    m = m_pool
    return jnp.maximum(jnp.maximum(y[0 * m:1 * m], y[1 * m:2 * m]),
                       jnp.maximum(y[2 * m:3 * m], y[3 * m:4 * m]))


def _block_pool_kernel(a_ref, w0, b0, w1, b1, w2, b2, o_ref):
    p = _block_body(a_ref, w0, b0, w1, b1, w2, b2, o_ref.shape[0])
    o_ref[...] = p.astype(o_ref.dtype)


def _block_pool_fc_kernel(a_ref, w0, b0, w1, b1, w2, b2, wf, bf, o_ref):
    p = _block_body(a_ref, w0, b0, w1, b1, w2, b2, o_ref.shape[0])
    logits = jnp.dot(p.astype(jnp.bfloat16), wf[...],
                     preferred_element_type=jnp.float32) + bf[...]
    o_ref[...] = logits.astype(o_ref.dtype)


def _fused_block(a, wb, *, n_out, m_pool):
    return pl.pallas_call(
        _block_pool_kernel,
        out_shape=jax.ShapeDtypeStruct((m_pool, n_out), jnp.bfloat16),
        in_specs=[pl.BlockSpec(memory_space=pltpu.MemorySpace.VMEM)] * 7,
        out_specs=pl.BlockSpec(memory_space=pltpu.MemorySpace.VMEM),
    )(a, *wb)


def _fused_block_fc(a, wb, fc, *, m_pool):
    return pl.pallas_call(
        _block_pool_fc_kernel,
        out_shape=jax.ShapeDtypeStruct((m_pool, 128), jnp.float32),
        in_specs=[pl.BlockSpec(memory_space=pltpu.MemorySpace.VMEM)] * 9,
        out_specs=pl.BlockSpec(memory_space=pltpu.MemorySpace.VMEM),
    )(a, *wb, *fc)


# ----------------------------------------------------------------------------
# XLA glue: im2col with pool-corner row ordering (2 gathers + transposes)
# ----------------------------------------------------------------------------
def _im2col_pool_reorder(x, kh, kw, stride, pad, k_pad=None):
    """x: (B, H, W, C) -> (4*B*Hp*Wp, kh*kw*C) patch matrix.

    Row index = corner*(B*Hp*Wp) + b*(Hp*Wp) + hp*Wp + wp, where
    corner = 2*ph + pw indexes the 2x2 pooling window of the conv output.
    Feature ordering is (ki, kj, c), matching the (2, 3, 1, 0) weight reshape.
    """
    B, H, W, C = x.shape
    Ho = (H + 2 * pad - kh) // stride + 1
    Wo = (W + 2 * pad - kw) // stride + 1
    Hp, Wp = Ho // 2, Wo // 2
    xp = jnp.pad(x, ((0, 0), (pad, pad), (pad, pad), (0, 0)))
    h_idx = jnp.arange(Ho)[:, None] * stride + jnp.arange(kh)[None, :]   # (Ho, kh)
    w_idx = jnp.arange(Wo)[:, None] * stride + jnp.arange(kw)[None, :]   # (Wo, kw)
    p = jnp.take(xp, h_idx, axis=1)                  # (B, Ho, kh, Wpad, C)
    p = jnp.take(p, w_idx, axis=3)                   # (B, Ho, kh, Wo, kw, C)
    p = jnp.transpose(p, (0, 1, 3, 2, 4, 5))         # (B, Ho, Wo, kh, kw, C)
    k = kh * kw * C
    p = p.reshape(B, Hp, 2, Wp, 2, k)                # Ho=(Hp,ph), Wo=(Wp,pw)
    p = jnp.transpose(p, (2, 4, 0, 1, 3, 5))         # (ph, pw, B, Hp, Wp, K)
    a = p.reshape(4 * B * Hp * Wp, k)
    if k_pad is not None and k_pad > k:
        a = jnp.pad(a, ((0, 0), (0, k_pad - k)))
    return a, Hp, Wp


# ----------------------------------------------------------------------------
# Parameter preparation (one-time, outside jit): matmul-ready bf16 weights
# ----------------------------------------------------------------------------
def _conv_matrix(w, b, *, cin_pad=None, cout_pad=None, k_pad=None):
    """(O, I, kh, kw) conv weight -> (kh*kw*I', O') bf16 matrix + (1, O') f32 bias."""
    O, I, kh, kw = w.shape
    wm = jnp.transpose(w, (2, 3, 1, 0))                        # (kh, kw, I, O)
    if cin_pad is not None and cin_pad > I:
        wm = jnp.pad(wm, ((0, 0), (0, 0), (0, cin_pad - I), (0, 0)))
    wm = wm.reshape(-1, O)
    if k_pad is not None and k_pad > wm.shape[0]:
        wm = jnp.pad(wm, ((0, k_pad - wm.shape[0]), (0, 0)))
    if cout_pad is not None and cout_pad > O:
        wm = jnp.pad(wm, ((0, 0), (0, cout_pad - O)))
        b = jnp.pad(b, (0, cout_pad - O))
    return wm.astype(jnp.bfloat16), b.reshape(1, -1).astype(jnp.float32)


def prepare_params(params):
    cm = lambda n, **kw: _conv_matrix(params[n + "_w"], params[n + "_b"], **kw)
    prep = {
        "b1": (*cm("b1c0", k_pad=384, cout_pad=128),
               *cm("b1c1", cin_pad=128, cout_pad=128),
               *cm("b1c2", cin_pad=128, cout_pad=128)),
        "b2": (*cm("b2c0", cin_pad=128), *cm("b2c1"), *cm("b2c2")),
        "b3": (*cm("b3c0"), *cm("b3c1"), *cm("b3c2")),
    }
    wf = jnp.pad(params["fc_w"].T, ((0, 0), (0, 128 - params["fc_w"].shape[0])))
    bf = jnp.pad(params["fc_b"], (0, 128 - params["fc_b"].shape[0]))
    prep["fc"] = (wf.astype(jnp.bfloat16), bf.reshape(1, -1).astype(jnp.float32))
    return prep


# ----------------------------------------------------------------------------
# Conv3 forward (3 pallas_calls total)
# ----------------------------------------------------------------------------
def conv3_forward(prep, x_nchw):
    x = jnp.transpose(x_nchw, (0, 2, 3, 1)).astype(jnp.bfloat16)   # NCHW -> NHWC
    B = x.shape[0]

    # Block 1: 11x11/s4/p5 conv -> 1x1 -> 1x1 (+ReLUs) -> 2x2 maxpool.
    a, Hp, Wp = _im2col_pool_reorder(x, 11, 11, 4, 5, k_pad=384)
    x = _fused_block(a, prep["b1"], n_out=128, m_pool=B * Hp * Wp)
    x = x.reshape(B, Hp, Wp, 128)          # channels 96..127 are exact zeros

    # Block 2: 5x5/s1/p2 conv -> 1x1 -> 1x1 -> 2x2 maxpool.
    a, Hp, Wp = _im2col_pool_reorder(x, 5, 5, 1, 2)
    x = _fused_block(a, prep["b2"], n_out=256, m_pool=B * Hp * Wp)
    x = x.reshape(B, Hp, Wp, 256)

    # Block 3 + classifier: 3x3/s1/p1 conv -> 1x1 -> 1x1 -> 2x2 maxpool -> fc.
    a, Hp, Wp = _im2col_pool_reorder(x, 3, 3, 1, 1)
    logits = _fused_block_fc(a, prep["b3"], prep["fc"], m_pool=B * Hp * Wp)
    return logits[:, :4]


# ----------------------------------------------------------------------------
# Synthetic params + pure-JAX reference (same bf16 dataflow) for validation
# ----------------------------------------------------------------------------
_CONV_SPECS = [
    # name, in_ch, out_ch, kernel, stride, pad
    ("b1c0", 3, 96, 11, 4, 5), ("b1c1", 96, 96, 1, 1, 0), ("b1c2", 96, 96, 1, 1, 0),
    ("b2c0", 96, 256, 5, 1, 2), ("b2c1", 256, 256, 1, 1, 0), ("b2c2", 256, 256, 1, 1, 0),
    ("b3c0", 256, 384, 3, 1, 1), ("b3c1", 384, 384, 1, 1, 0), ("b3c2", 384, 384, 1, 1, 0),
]


def init_params(key):
    """Deterministic synthetic init (PyTorch-like uniform(+-1/sqrt(fan_in)))."""
    params = {}
    for name, cin, cout, k, _, _ in _CONV_SPECS:
        key, kw_, kb_ = jax.random.split(key, 3)
        bound = 1.0 / jnp.sqrt(cin * k * k * 1.0)
        params[name + "_w"] = jax.random.uniform(
            kw_, (cout, cin, k, k), jnp.float32, -bound, bound)
        params[name + "_b"] = jax.random.uniform(
            kb_, (cout,), jnp.float32, -bound, bound)
    key, kw_, kb_ = jax.random.split(key, 3)
    bound = 1.0 / jnp.sqrt(384.0)
    params["fc_w"] = jax.random.uniform(kw_, (4, 384), jnp.float32, -bound, bound)
    params["fc_b"] = jax.random.uniform(kb_, (4,), jnp.float32, -bound, bound)
    return params


def _ref_block(x, params, prefix, stride, pad):
    def conv(x, name, s, p):
        w = jnp.transpose(params[name + "_w"].astype(jnp.bfloat16), (2, 3, 1, 0))
        y = jax.lax.conv_general_dilated(
            x, w, window_strides=(s, s), padding=[(p, p), (p, p)],
            dimension_numbers=("NHWC", "HWIO", "NHWC"),
            preferred_element_type=jnp.float32)
        return jnp.maximum(y + params[name + "_b"], 0.0)

    x = conv(x, prefix + "c0", stride, pad).astype(jnp.bfloat16)
    x = conv(x, prefix + "c1", 1, 0).astype(jnp.bfloat16)
    x = conv(x, prefix + "c2", 1, 0)
    B, H, W, C = x.shape
    x = jnp.max(x.reshape(B, H // 2, 2, W // 2, 2, C), axis=(2, 4))
    return x.astype(jnp.bfloat16)


def conv3_reference(params, x_nchw):
    x = jnp.transpose(x_nchw, (0, 2, 3, 1)).astype(jnp.bfloat16)
    x = _ref_block(x, params, "b1", 4, 5)
    x = _ref_block(x, params, "b2", 1, 2)
    x = _ref_block(x, params, "b3", 1, 1)
    feat = x.reshape(x.shape[0], -1)                           # (B, 384)
    return (jnp.dot(feat, params["fc_w"].T.astype(jnp.bfloat16),
                    preferred_element_type=jnp.float32) + params["fc_b"])


if __name__ == "__main__":
    key = jax.random.PRNGKey(0)
    pkey, xkey = jax.random.split(key)
    params = init_params(pkey)
    prep = prepare_params(params)

    # Input spatial 32x32 so block3+pool yields 1x1x384, matching Linear(384, 4).
    x = jax.random.normal(xkey, (2, 3, 32, 32), jnp.float32)   # NCHW, PyTorch-style

    fwd = jax.jit(conv3_forward)
    out = jax.block_until_ready(fwd(prep, x))

    assert out.shape == (2, 4), out.shape
    assert bool(jnp.all(jnp.isfinite(out)))

    # Cross-check against a pure-JAX/XLA reference using the same bf16 dataflow.
    ref = jax.block_until_ready(jax.jit(conv3_reference)(params, x))
    err = float(jnp.max(jnp.abs(out - ref)) / (jnp.max(jnp.abs(ref)) + 1e-12))
    assert err < 2e-2, f"mismatch vs reference: rel_err={err}"

    print("KERNEL_OK")
</pallas_src>

<mosaic_0001>
module attributes {stable_mosaic.version = 11 : i64} {
  func.func @_block_pool_kernel(%arg0: memref<128x384xbf16, #tpu.memory_space<vmem>>, %arg1: memref<384x128xbf16, #tpu.memory_space<vmem>>, %arg2: memref<1x128xf32, #tpu.memory_space<vmem>>, %arg3: memref<128x128xbf16, #tpu.memory_space<vmem>>, %arg4: memref<1x128xf32, #tpu.memory_space<vmem>>, %arg5: memref<128x128xbf16, #tpu.memory_space<vmem>>, %arg6: memref<1x128xf32, #tpu.memory_space<vmem>>, %arg7: memref<32x128xbf16, #tpu.memory_space<vmem>>) attributes {dimension_semantics = [], scalar_prefetch = 0 : i64, scratch_operands = 0 : i64, tpu.core_type = #tpu.core_type<tc>} {
    %c0 = arith.constant 0 : index
    %c0_0 = arith.constant 0 : index
    %0 = vector.load %arg0[%c0, %c0_0] : memref<128x384xbf16, #tpu.memory_space<vmem>>, vector<128x384xbf16>
    %c0_1 = arith.constant 0 : index
    %c0_2 = arith.constant 0 : index
    %1 = vector.load %arg1[%c0_1, %c0_2] : memref<384x128xbf16, #tpu.memory_space<vmem>>, vector<384x128xbf16>
    %cst = arith.constant dense<0.000000e+00> : vector<128x128xf32>
    %2 = tpu.matmul %0, %1, %cst {dimension_numbers = #tpu.dot_dimension_numbers<[1], [0], [0], [1], [0, 0, 1, 1], [], []>} : vector<128x384xbf16>, vector<384x128xbf16>, vector<128x128xf32> -> vector<128x128xf32>
    %c0_3 = arith.constant 0 : index
    %c0_4 = arith.constant 0 : index
    %3 = vector.load %arg2[%c0_3, %c0_4] : memref<1x128xf32, #tpu.memory_space<vmem>>, vector<1x128xf32>
    %4 = vector.broadcast %3 : vector<1x128xf32> to vector<128x128xf32>
    %5 = arith.addf %2, %4 : vector<128x128xf32>
    %cst_5 = arith.constant 0.000000e+00 : f32
    %6 = vector.broadcast %cst_5 : f32 to vector<128x128xf32>
    %7 = arith.maximumf %5, %6 : vector<128x128xf32>
    %8 = arith.truncf %7 : vector<128x128xf32> to vector<128x128xbf16>
    %c0_6 = arith.constant 0 : index
    %c0_7 = arith.constant 0 : index
    %9 = vector.load %arg3[%c0_6, %c0_7] : memref<128x128xbf16, #tpu.memory_space<vmem>>, vector<128x128xbf16>
    %cst_8 = arith.constant dense<0.000000e+00> : vector<128x128xf32>
    %10 = tpu.matmul %8, %9, %cst_8 {dimension_numbers = #tpu.dot_dimension_numbers<[1], [0], [0], [1], [0, 0, 1, 1], [], []>} : vector<128x128xbf16>, vector<128x128xbf16>, vector<128x128xf32> -> vector<128x128xf32>
    %c0_9 = arith.constant 0 : index
    %c0_10 = arith.constant 0 : index
    %11 = vector.load %arg4[%c0_9, %c0_10] : memref<1x128xf32, #tpu.memory_space<vmem>>, vector<1x128xf32>
    %12 = vector.broadcast %11 : vector<1x128xf32> to vector<128x128xf32>
    %13 = arith.addf %10, %12 : vector<128x128xf32>
    %cst_11 = arith.constant 0.000000e+00 : f32
    %14 = vector.broadcast %cst_11 : f32 to vector<128x128xf32>
    %15 = arith.maximumf %13, %14 : vector<128x128xf32>
    %16 = arith.truncf %15 : vector<128x128xf32> to vector<128x128xbf16>
    %c0_12 = arith.constant 0 : index
    %c0_13 = arith.constant 0 : index
    %17 = vector.load %arg5[%c0_12, %c0_13] : memref<128x128xbf16, #tpu.memory_space<vmem>>, vector<128x128xbf16>
    %cst_14 = arith.constant dense<0.000000e+00> : vector<128x128xf32>
    %18 = tpu.matmul %16, %17, %cst_14 {dimension_numbers = #tpu.dot_dimension_numbers<[1], [0], [0], [1], [0, 0, 1, 1], [], []>} : vector<128x128xbf16>, vector<128x128xbf16>, vector<128x128xf32> -> vector<128x128xf32>
    %c0_15 = arith.constant 0 : index
    %c0_16 = arith.constant 0 : index
    %19 = vector.load %arg6[%c0_15, %c0_16] : memref<1x128xf32, #tpu.memory_space<vmem>>, vector<1x128xf32>
    %20 = vector.broadcast %19 : vector<1x128xf32> to vector<128x128xf32>
    %21 = arith.addf %18, %20 : vector<128x128xf32>
    %cst_17 = arith.constant 0.000000e+00 : f32
    %22 = vector.broadcast %cst_17 : f32 to vector<128x128xf32>
    %23 = arith.maximumf %21, %22 : vector<128x128xf32>
    %24 = vector.extract_strided_slice %23 {offsets = [0, 0], sizes = [32, 128], strides = [1, 1]} : vector<128x128xf32> to vector<32x128xf32>
    %25 = vector.extract_strided_slice %23 {offsets = [32, 0], sizes = [32, 128], strides = [1, 1]} : vector<128x128xf32> to vector<32x128xf32>
    %26 = arith.maximumf %24, %25 : vector<32x128xf32>
    %27 = vector.extract_strided_slice %23 {offsets = [64, 0], sizes = [32, 128], strides = [1, 1]} : vector<128x128xf32> to vector<32x128xf32>
    %28 = vector.extract_strided_slice %23 {offsets = [96, 0], sizes = [32, 128], strides = [1, 1]} : vector<128x128xf32> to vector<32x128xf32>
    %29 = arith.maximumf %27, %28 : vector<32x128xf32>
    %30 = arith.maximumf %26, %29 : vector<32x128xf32>
    %31 = arith.truncf %30 : vector<32x128xf32> to vector<32x128xbf16>
    %c0_18 = arith.constant 0 : index
    %c0_19 = arith.constant 0 : index
    %32 = vector.load %arg7[%c0_18, %c0_19] : memref<32x128xbf16, #tpu.memory_space<vmem>>, vector<32x128xbf16>
    tpu.vector_store %arg7[%c0_18, %c0_19], %31 {strides = array<i32>} : memref<32x128xbf16, #tpu.memory_space<vmem>>, vector<32x128xbf16>,
    return
  }
}

module attributes {stable_mosaic.version = 11 : i64} {
  func.func @_block_pool_kernel(%arg0: memref<32x3200xbf16, #tpu.memory_space<vmem>>, %arg1: memref<3200x256xbf16, #tpu.memory_space<vmem>>, %arg2: memref<1x256xf32, #tpu.memory_space<vmem>>, %arg3: memref<256x256xbf16, #tpu.memory_space<vmem>>, %arg4: memref<1x256xf32, #tpu.memory_space<vmem>>, %arg5: memref<256x256xbf16, #tpu.memory_space<vmem>>, %arg6: memref<1x256xf32, #tpu.memory_space<vmem>>, %arg7: memref<8x256xbf16, #tpu.memory_space<vmem>>) attributes {dimension_semantics = [], scalar_prefetch = 0 : i64, scratch_operands = 0 : i64, tpu.core_type = #tpu.core_type<tc>} {
    %c0 = arith.constant 0 : index
    %c0_0 = arith.constant 0 : index
    %0 = vector.load %arg0[%c0, %c0_0] : memref<32x3200xbf16, #tpu.memory_space<vmem>>, vector<32x3200xbf16>
    %c0_1 = arith.constant 0 : index
    %c0_2 = arith.constant 0 : index
    %1 = vector.load %arg1[%c0_1, %c0_2] : memref<3200x256xbf16, #tpu.memory_space<vmem>>, vector<3200x256xbf16>
    %cst = arith.constant dense<0.000000e+00> : vector<32x256xf32>
    %2 = tpu.matmul %0, %1, %cst {dimension_numbers = #tpu.dot_dimension_numbers<[1], [0], [0], [1], [0, 0, 1, 1], [], []>} : vector<32x3200xbf16>, vector<3200x256xbf16>, vector<32x256xf32> -> vector<32x256xf32>
    %c0_3 = arith.constant 0 : index
    %c0_4 = arith.constant 0 : index
    %3 = vector.load %arg2[%c0_3, %c0_4] : memref<1x256xf32, #tpu.memory_space<vmem>>, vector<1x256xf32>
    %4 = vector.broadcast %3 : vector<1x256xf32> to vector<32x256xf32>
    %5 = arith.addf %2, %4 : vector<32x256xf32>
    %cst_5 = arith.constant 0.000000e+00 : f32
    %6 = vector.broadcast %cst_5 : f32 to vector<32x256xf32>
    %7 = arith.maximumf %5, %6 : vector<32x256xf32>
    %8 = arith.truncf %7 : vector<32x256xf32> to vector<32x256xbf16>
    %c0_6 = arith.constant 0 : index
    %c0_7 = arith.constant 0 : index
    %9 = vector.load %arg3[%c0_6, %c0_7] : memref<256x256xbf16, #tpu.memory_space<vmem>>, vector<256x256xbf16>
    %cst_8 = arith.constant dense<0.000000e+00> : vector<32x256xf32>
    %10 = tpu.matmul %8, %9, %cst_8 {dimension_numbers = #tpu.dot_dimension_numbers<[1], [0], [0], [1], [0, 0, 1, 1], [], []>} : vector<32x256xbf16>, vector<256x256xbf16>, vector<32x256xf32> -> vector<32x256xf32>
    %c0_9 = arith.constant 0 : index
    %c0_10 = arith.constant 0 : index
    %11 = vector.load %arg4[%c0_9, %c0_10] : memref<1x256xf32, #tpu.memory_space<vmem>>, vector<1x256xf32>
    %12 = vector.broadcast %11 : vector<1x256xf32> to vector<32x256xf32>
    %13 = arith.addf %10, %12 : vector<32x256xf32>
    %cst_11 = arith.constant 0.000000e+00 : f32
    %14 = vector.broadcast %cst_11 : f32 to vector<32x256xf32>
    %15 = arith.maximumf %13, %14 : vector<32x256xf32>
    %16 = arith.truncf %15 : vector<32x256xf32> to vector<32x256xbf16>
    %c0_12 = arith.constant 0 : index
    %c0_13 = arith.constant 0 : index
    %17 = vector.load %arg5[%c0_12, %c0_13] : memref<256x256xbf16, #tpu.memory_space<vmem>>, vector<256x256xbf16>
    %cst_14 = arith.constant dense<0.000000e+00> : vector<32x256xf32>
    %18 = tpu.matmul %16, %17, %cst_14 {dimension_numbers = #tpu.dot_dimension_numbers<[1], [0], [0], [1], [0, 0, 1, 1], [], []>} : vector<32x256xbf16>, vector<256x256xbf16>, vector<32x256xf32> -> vector<32x256xf32>
    %c0_15 = arith.constant 0 : index
    %c0_16 = arith.constant 0 : index
    %19 = vector.load %arg6[%c0_15, %c0_16] : memref<1x256xf32, #tpu.memory_space<vmem>>, vector<1x256xf32>
    %20 = vector.broadcast %19 : vector<1x256xf32> to vector<32x256xf32>
    %21 = arith.addf %18, %20 : vector<32x256xf32>
    %cst_17 = arith.constant 0.000000e+00 : f32
    %22 = vector.broadcast %cst_17 : f32 to vector<32x256xf32>
    %23 = arith.maximumf %21, %22 : vector<32x256xf32>
    %24 = vector.extract_strided_slice %23 {offsets = [0, 0], sizes = [8, 256], strides = [1, 1]} : vector<32x256xf32> to vector<8x256xf32>
    %25 = vector.extract_strided_slice %23 {offsets = [8, 0], sizes = [8, 256], strides = [1, 1]} : vector<32x256xf32> to vector<8x256xf32>
    %26 = arith.maximumf %24, %25 : vector<8x256xf32>
    %27 = vector.extract_strided_slice %23 {offsets = [16, 0], sizes = [8, 256], strides = [1, 1]} : vector<32x256xf32> to vector<8x256xf32>
    %28 = vector.extract_strided_slice %23 {offsets = [24, 0], sizes = [8, 256], strides = [1, 1]} : vector<32x256xf32> to vector<8x256xf32>
    %29 = arith.maximumf %27, %28 : vector<8x256xf32>
    %30 = arith.maximumf %26, %29 : vector<8x256xf32>
    %31 = arith.truncf %30 : vector<8x256xf32> to vector<8x256xbf16>
    %c0_18 = arith.constant 0 : index
    %c0_19 = arith.constant 0 : index
    %32 = vector.load %arg7[%c0_18, %c0_19] : memref<8x256xbf16, #tpu.memory_space<vmem>>, vector<8x256xbf16>
    tpu.vector_store %arg7[%c0_18, %c0_19], %31 {strides = array<i32>} : memref<8x256xbf16, #tpu.memory_space<vmem>>, vector<8x256xbf16>,
    return
  }
}

module attributes {stable_mosaic.version = 11 : i64} {
  func.func @_block_pool_fc_kernel(%arg0: memref<8x2304xbf16, #tpu.memory_space<vmem>>, %arg1: memref<2304x384xbf16, #tpu.memory_space<vmem>>, %arg2: memref<1x384xf32, #tpu.memory_space<vmem>>, %arg3: memref<384x384xbf16, #tpu.memory_space<vmem>>, %arg4: memref<1x384xf32, #tpu.memory_space<vmem>>, %arg5: memref<384x384xbf16, #tpu.memory_space<vmem>>, %arg6: memref<1x384xf32, #tpu.memory_space<vmem>>, %arg7: memref<384x128xbf16, #tpu.memory_space<vmem>>, %arg8: memref<1x128xf32, #tpu.memory_space<vmem>>, %arg9: memref<2x128xf32, #tpu.memory_space<vmem>>) attributes {dimension_semantics = [], scalar_prefetch = 0 : i64, scratch_operands = 0 : i64, tpu.core_type = #tpu.core_type<tc>} {
    %c0 = arith.constant 0 : index
    %c0_0 = arith.constant 0 : index
    %0 = vector.load %arg0[%c0, %c0_0] : memref<8x2304xbf16, #tpu.memory_space<vmem>>, vector<8x2304xbf16>
    %c0_1 = arith.constant 0 : index
    %c0_2 = arith.constant 0 : index
    %1 = vector.load %arg1[%c0_1, %c0_2] : memref<2304x384xbf16, #tpu.memory_space<vmem>>, vector<2304x384xbf16>
    %cst = arith.constant dense<0.000000e+00> : vector<8x384xf32>
    %2 = tpu.matmul %0, %1, %cst {dimension_numbers = #tpu.dot_dimension_numbers<[1], [0], [0], [1], [0, 0, 1, 1], [], []>} : vector<8x2304xbf16>, vector<2304x384xbf16>, vector<8x384xf32> -> vector<8x384xf32>
    %c0_3 = arith.constant 0 : index
    %c0_4 = arith.constant 0 : index
    %3 = vector.load %arg2[%c0_3, %c0_4] : memref<1x384xf32, #tpu.memory_space<vmem>>, vector<1x384xf32>
    %4 = vector.broadcast %3 : vector<1x384xf32> to vector<8x384xf32>
    %5 = arith.addf %2, %4 : vector<8x384xf32>
    %cst_5 = arith.constant 0.000000e+00 : f32
    %6 = vector.broadcast %cst_5 : f32 to vector<8x384xf32>
    %7 = arith.maximumf %5, %6 : vector<8x384xf32>
    %8 = arith.truncf %7 : vector<8x384xf32> to vector<8x384xbf16>
    %c0_6 = arith.constant 0 : index
    %c0_7 = arith.constant 0 : index
    %9 = vector.load %arg3[%c0_6, %c0_7] : memref<384x384xbf16, #tpu.memory_space<vmem>>, vector<384x384xbf16>
    %cst_8 = arith.constant dense<0.000000e+00> : vector<8x384xf32>
    %10 = tpu.matmul %8, %9, %cst_8 {dimension_numbers = #tpu.dot_dimension_numbers<[1], [0], [0], [1], [0, 0, 1, 1], [], []>} : vector<8x384xbf16>, vector<384x384xbf16>, vector<8x384xf32> -> vector<8x384xf32>
    %c0_9 = arith.constant 0 : index
    %c0_10 = arith.constant 0 : index
    %11 = vector.load %arg4[%c0_9, %c0_10] : memref<1x384xf32, #tpu.memory_space<vmem>>, vector<1x384xf32>
    %12 = vector.broadcast %11 : vector<1x384xf32> to vector<8x384xf32>
    %13 = arith.addf %10, %12 : vector<8x384xf32>
    %cst_11 = arith.constant 0.000000e+00 : f32
    %14 = vector.broadcast %cst_11 : f32 to vector<8x384xf32>
    %15 = arith.maximumf %13, %14 : vector<8x384xf32>
    %16 = arith.truncf %15 : vector<8x384xf32> to vector<8x384xbf16>
    %c0_12 = arith.constant 0 : index
    %c0_13 = arith.constant 0 : index
    %17 = vector.load %arg5[%c0_12, %c0_13] : memref<384x384xbf16, #tpu.memory_space<vmem>>, vector<384x384xbf16>
    %cst_14 = arith.constant dense<0.000000e+00> : vector<8x384xf32>
    %18 = tpu.matmul %16, %17, %cst_14 {dimension_numbers = #tpu.dot_dimension_numbers<[1], [0], [0], [1], [0, 0, 1, 1], [], []>} : vector<8x384xbf16>, vector<384x384xbf16>, vector<8x384xf32> -> vector<8x384xf32>
    %c0_15 = arith.constant 0 : index
    %c0_16 = arith.constant 0 : index
    %19 = vector.load %arg6[%c0_15, %c0_16] : memref<1x384xf32, #tpu.memory_space<vmem>>, vector<1x384xf32>
    %20 = vector.broadcast %19 : vector<1x384xf32> to vector<8x384xf32>
    %21 = arith.addf %18, %20 : vector<8x384xf32>
    %cst_17 = arith.constant 0.000000e+00 : f32
    %22 = vector.broadcast %cst_17 : f32 to vector<8x384xf32>
    %23 = arith.maximumf %21, %22 : vector<8x384xf32>
    %24 = vector.extract_strided_slice %23 {offsets = [0, 0], sizes = [2, 384], strides = [1, 1]} : vector<8x384xf32> to vector<2x384xf32>
    %25 = vector.extract_strided_slice %23 {offsets = [2, 0], sizes = [2, 384], strides = [1, 1]} : vector<8x384xf32> to vector<2x384xf32>
    %26 = arith.maximumf %24, %25 : vector<2x384xf32>
    %27 = vector.extract_strided_slice %23 {offsets = [4, 0], sizes = [2, 384], strides = [1, 1]} : vector<8x384xf32> to vector<2x384xf32>
    %28 = vector.extract_strided_slice %23 {offsets = [6, 0], sizes = [2, 384], strides = [1, 1]} : vector<8x384xf32> to vector<2x384xf32>
    %29 = arith.maximumf %27, %28 : vector<2x384xf32>
    %30 = arith.maximumf %26, %29 : vector<2x384xf32>
    %31 = arith.truncf %30 : vector<2x384xf32> to vector<2x384xbf16>
    %c0_18 = arith.constant 0 : index
    %c0_19 = arith.constant 0 : index
    %32 = vector.load %arg7[%c0_18, %c0_19] : memref<384x128xbf16, #tpu.memory_space<vmem>>, vector<384x128xbf16>
    %cst_20 = arith.constant dense<0.000000e+00> : vector<2x128xf32>
    %33 = tpu.matmul %31, %32, %cst_20 {dimension_numbers = #tpu.dot_dimension_numbers<[1], [0], [0], [1], [0, 0, 1, 1], [], []>} : vector<2x384xbf16>, vector<384x128xbf16>, vector<2x128xf32> -> vector<2x128xf32>
    %c0_21 = arith.constant 0 : index
    %c0_22 = arith.constant 0 : index
    %34 = vector.load %arg8[%c0_21, %c0_22] : memref<1x128xf32, #tpu.memory_space<vmem>>, vector<1x128xf32>
    %35 = vector.broadcast %34 : vector<1x128xf32> to vector<2x128xf32>
    %36 = arith.addf %33, %35 : vector<2x128xf32>
    %c0_23 = arith.constant 0 : index
    %c0_24 = arith.constant 0 : index
    %37 = vector.load %arg9[%c0_23, %c0_24] : memref<2x128xf32, #tpu.memory_space<vmem>>, vector<2x128xf32>
    tpu.vector_store %arg9[%c0_23, %c0_24], %36 {strides = array<i32>} : memref<2x128xf32, #tpu.memory_space<vmem>>, vector<2x128xf32>,
    return
  }
}

</mosaic_0001>

<bundles_post_ra>
// kernel: conv3_forward.3
= control target key start
LH: loop header
LB: loop body
LE: loop exit
PB: predicated region body
PF: predicated region fallthrough
CT: control target
= control target key end

     0   :  { %s1708_s1 = inlined_call_operand.vmem [shape: bf16[384,128], index: 1, kind: input, shape index: {}]   ;;  %s1709_s0 = inlined_call_operand.vmem [shape: bf16[128,384], index: 0, kind: input, shape index: {}]   ;;  %s1710_s3 = inlined_call_operand.vmem [shape: bf16[128,128], index: 3, kind: input, shape index: {}]   ;;  %s1711_s5 = inlined_call_operand.vmem [shape: bf16[128,128], index: 5, kind: input, shape index: {}]   ;;  %s1712_s2 = inlined_call_operand.vmem [shape: f32[1,128], index: 2, kind: input, shape index: {}]   ;;  %s1713_s4 = inlined_call_operand.vmem [shape: f32[1,128], index: 4, kind: input, shape index: {}]   ;;  %s1714_s6 = inlined_call_operand.vmem [shape: f32[1,128], index: 6, kind: input, shape index: {}]   ;;  %s1715_s7 = inlined_call_operand.vmem [shape: bf16[32,128], index: 7, kind: output, shape index: {}]  }
   0x1   :  { %v1326_v0 = vld [vmem:[%s1708_s1 + $0x40] sm:$0xff]   ;;  %v1328_v2 = vld [vmem:[%s1708_s1 + $0x48] sm:$0xff]   ;;  %v1331_v5 = vld [vmem:[%s1708_s1 + $0x50] sm:$0xff]  }
   0x2   :  { %v1327_v1 = vld [vmem:[%s1708_s1] sm:$0xff]   ;;  %1102 = vmatprep.subr.bf16.mxu0 %v1326_v0  ;;  %v1330_v4 = vld [vmem:[%s1708_s1 + $0x8] sm:$0xff]   ;;  %v1333_v7 = vld [vmem:[%s1708_s1 + $0x10] sm:$0xff]  }
   0x3   :  { %1103 = vmatpush3.bf16.msra.mxu0 %v1327_v1  ;;  %v1329_v3 = vld [vmem:[%s1708_s1 + $0x80] sm:$0xff]   ;;  %v1332_v6 = vld [vmem:[%s1708_s1 + $0x88] sm:$0xff]   ;;  %v1334_v8 = vld [vmem:[%s1708_s1 + $0x58] sm:$0xff]  }
   0x4   :  { %1104 = vmatprep.subr.bf16.mxu0 %v1328_v2  ;;  %1214 = vmatprep.subr.bf16.mxu1 %v1329_v3  ;;  %v1335_v9 = vld [vmem:[%s1708_s1 + $0x90] sm:$0xff]   ;;  %v1336_v10 = vld [vmem:[%s1708_s1 + $0x18] sm:$0xff]   ;;  %v1337_v11 = vld [vmem:[%s1708_s1 + $0x60] sm:$0xff]  }
   0x5   :  { %1215 = vmatpush3.bf16.msra.mxu1 %v1329_v3  ;;  %v1338_v12 = vld [vmem:[%s1708_s1 + $0x98] sm:$0xff]   ;;  %v1339_v13 = vld [vmem:[%s1708_s1 + $0x20] sm:$0xff]   ;;  %v1340_v15 = vld [vmem:[%s1708_s1 + $0x68] sm:$0xff]  }
   0x6   :  { %1216 = vmatprep.subr.bf16.mxu1 %v1332_v6  ;;  %v1341_v14 = vld [vmem:[%s1708_s1 + $0xa0] sm:$0xff]   ;;  %v1342_v16 = vld [vmem:[%s1708_s1 + $0x28] sm:$0xff]   ;;  %v1343_v18 = vld [vmem:[%s1708_s1 + $0x70] sm:$0xff]  }
   0x7   :  { %1105 = vmatpush3.bf16.msra.mxu0 %v1330_v4  ;;  %v1344_v17 = vld [vmem:[%s1708_s1 + $0xa8] sm:$0xff]   ;;  %v1345_v19 = vld [vmem:[%s1708_s1 + $0x30] sm:$0xff]   ;;  %v1346_v20 = vld [vmem:[%s1708_s1 + $0x78] sm:$0xff]  }
   0x8   :  { %1106 = vmatprep.subr.bf16.mxu0 %v1331_v5  ;;  %v1347_v21 = vld [vmem:[%s1708_s1 + $0xb0] sm:$0xff]   ;;  %v1348_v23 = vld [vmem:[%s1708_s1 + $0x38] sm:$0xff]   ;;  %v1349_v26 = vld [vmem:[%s1709_s0] ss:$12 sps:$4 sm:$0xff]  }
   0x9   :  { %1217 = vmatpush3.bf16.msra.mxu1 %v1332_v6  ;;  %v1351_v22 = vld [vmem:[%s1709_s0 + $0x4] ss:$12 sps:$4 sm:$0xff]   ;;  %v1353_v24 = vld [vmem:[%s1709_s0 + $0x8] ss:$12 sps:$4 sm:$0xff]   ;;  %v1352_v25 = vld [vmem:[%s1708_s1 + $0xb8] sm:$0xff]  }
   0xa   :  { %1218 = vmatprep.subr.bf16.mxu1 %v1335_v9  ;;  %418 = vmatprep.mubr.bf16.mxu0 %v1351_v22  ;;  %v1355_v27 = vld [vmem:[%s1709_s0 + $0x1c] ss:$12 sps:$4 sm:$0xff]   ;;  %v1354_v28 = vld [vmem:[%s1709_s0 + $0x20] ss:$12 sps:$4 sm:$0xff]   ;;  %v1361_v29 = vld [vmem:[%s1709_s0 + $0x38] ss:$12 sps:$4 sm:$0xff]  }
   0xb   :  { %1107 = vmatpush3.bf16.msra.mxu0 %v1333_v7  ;;  %1230 = vmatprep.mubr.bf16.mxu1 %v1353_v24  ;;  %v1357_v30 = vld [vmem:[%s1709_s0 + $0x18] ss:$12 sps:$4 sm:$0xff]   ;;  %v1358_v31 = vld [vmem:[%s1709_s0 + $0x34] ss:$12 sps:$4 sm:$0xff]   ;;  %v1362_v32 = vld [vmem:[%s1709_s0 + $0x50] ss:$12 sps:$4 sm:$0xff]  }
   0xc   :  { %1108 = vmatprep.subr.bf16.mxu0 %v1334_v8  ;;  %v1369_v33 = vld [vmem:[%s1709_s0 + $0x68] ss:$12 sps:$4 sm:$0xff]   ;;  %v1382_v34 = vld [vmem:[%s1710_s3] sm:$0xff]   ;;  %v1360_v35 = vld [vmem:[%s1709_s0 + $0x30] ss:$12 sps:$4 sm:$0xff]  }
   0xd   :  { %1219 = vmatpush3.bf16.msra.mxu1 %v1335_v9  ;;  %v1383_v36 = vld [vmem:[%s1710_s3 + $0x8] sm:$0xff]   ;;  %v1384_v38 = vld [vmem:[%s1710_s3 + $0x10] sm:$0xff]   ;;  %v1377_v40 = vld [vmem:[%s1709_s0 + $0x98] ss:$12 sps:$4 sm:$0xff]  }
   0xe   :  { %1220 = vmatprep.subr.bf16.mxu1 %v1338_v12  ;;  %v1363_v37 = vld [vmem:[%s1709_s0 + $0x4c] ss:$12 sps:$4 sm:$0xff]   ;;  %v1365_v41 = vld [vmem:[%s1709_s0 + $0x48] ss:$12 sps:$4 sm:$0xff]   ;;  %v1366_v42 = vld [vmem:[%s1709_s0 + $0x64] ss:$12 sps:$4 sm:$0xff]  }
   0xf   :  { %1109 = vmatpush3.bf16.msra.mxu0 %v1336_v10  ;;  %v1370_v39 = vld [vmem:[%s1709_s0 + $0x80] ss:$12 sps:$4 sm:$0xff]   ;;  %v1378_v43 = vld [vmem:[%s1709_s0 + $0xb0] ss:$12 sps:$4 sm:$0xff]   ;;  %v1373_v46 = vld [vmem:[%s1709_s0 + $0x78] ss:$12 sps:$4 sm:$0xff]  }
  0x10   :  { %1110 = vmatprep.subr.bf16.mxu0 %v1337_v11  ;;  %v1368_v44 = vld [vmem:[%s1709_s0 + $0x60] ss:$12 sps:$4 sm:$0xff]   ;;  %v1371_v45 = vld [vmem:[%s1709_s0 + $0x7c] ss:$12 sps:$4 sm:$0xff]   ;;  %v1388_v54 = vld [vmem:[%s1710_s3 + $0x30] sm:$0xff]  }
  0x11   :  { %1221 = vmatpush3.bf16.msra.mxu1 %v1338_v12  ;;  %v1374_v47 = vld [vmem:[%s1709_s0 + $0x94] ss:$12 sps:$4 sm:$0xff]   ;;  %v1376_v48 = vld [vmem:[%s1709_s0 + $0x90] ss:$12 sps:$4 sm:$0xff]   ;;  %v1379_v49 = vld [vmem:[%s1709_s0 + $0xac] ss:$12 sps:$4 sm:$0xff]  }
  0x12   :  { %1222 = vmatprep.subr.bf16.mxu1 %v1341_v14  ;;  %v1381_v50 = vld [vmem:[%s1709_s0 + $0xa8] ss:$12 sps:$4 sm:$0xff]   ;;  %v1385_v51 = vld [vmem:[%s1710_s3 + $0x18] sm:$0xff]   ;;  %v1386_v52 = vld [vmem:[%s1710_s3 + $0x20] sm:$0xff]  }
  0x13   :  { %1111 = vmatpush3.bf16.msra.mxu0 %v1339_v13  ;;  %v1387_v53 = vld [vmem:[%s1710_s3 + $0x28] sm:$0xff]   ;;  %v1389_v55 = vld [vmem:[%s1710_s3 + $0x38] sm:$0xff]   ;;  %v1609_v56 = vld [vmem:[%s1711_s5] sm:$0xff]  }
  0x14   :  { %1112 = vmatprep.subr.bf16.mxu0 %v1340_v15  ;;  %v1614_v57 = vld [vmem:[%s1711_s5 + $0x8] sm:$0xff]   ;;  %v1623_v58 = vld [vmem:[%s1711_s5 + $0x10] sm:$0xff]   ;;  %v1630_v59 = vld [vmem:[%s1711_s5 + $0x18] sm:$0xff]  }
  0x15   :  { %1223 = vmatpush3.bf16.msra.mxu1 %v1341_v14  ;;  %v1637_v60 = vld [vmem:[%s1711_s5 + $0x20] sm:$0xff]   ;;  %v1644_v61 = vld [vmem:[%s1711_s5 + $0x28] sm:$0xff]  }
  0x16   :  { %1224 = vmatprep.subr.bf16.mxu1 %v1344_v17  ;;  %v1652_v0 = vld [vmem:[%s1712_s2] ss:$0 sm:$0xff] }
  0x17   :  { %1113 = vmatpush3.bf16.msra.mxu0 %v1342_v16 }
  0x18   :  { %1114 = vmatprep.subr.bf16.mxu0 %v1343_v18 }
  0x19   :  { %1225 = vmatpush3.bf16.msra.mxu1 %v1344_v17 }
  0x1a   :  { %1226 = vmatprep.subr.bf16.mxu1 %v1347_v21 }
  0x1b   :  { %1115 = vmatpush3.bf16.msra.mxu0 %v1345_v19 }
  0x1c   :  { %1116 = vmatprep.subr.bf16.mxu0 %v1346_v20 }
  0x1d   :  { %1227 = vmatpush3.bf16.msra.mxu1 %v1347_v21 }
  0x1e   :  { %1228 = vmatprep.subr.bf16.mxu1 %v1352_v25 }
  0x1f   :  { %1117 = vmatpush3.bf16.msra.mxu0 %v1348_v23 }
  0x20   :  { %1278 = vmatprep.subr.bf16.mxu0 %v1609_v56 }
  0x21   :  { %1229 = vmatpush3.bf16.msra.mxu1 %v1352_v25 }
  0x22   :  { %419 = vmatmul.mubr.bf16.vlgmr.msra.gmra.mrb[0].mxu0 %v1349_v26  ;;  %1246 = vmatprep.subr.bf16.mxu1 %v1382_v34 }
  0x23   :  { %426 = vmatprep.mubr.bf16.mxu0 %v1355_v27  ;;  %1279 = vmatpush3.bf16.msra.mxu0 %v1609_v56 }
  0x24   :  { %1231 = vmatmul.mubr.bf16.vlgmr.msra.gmra.mrb[0].mxu1 %v1354_v28  ;;  %1280 = vmatprep.subr.bf16.mxu0 %v1614_v57 }
  0x25   :  { %1234 = vmatprep.mubr.bf16.mxu1 %v1361_v29  ;;  %1247 = vmatpush3.bf16.msra.mxu1 %v1382_v34 }
  0x26   :  { %1248 = vmatprep.subr.bf16.mxu1 %v1383_v36 }
  0x27   :  { %1281 = vmatpush3.bf16.msra.mxu0 %v1614_v57 }
  0x28   :  { %1282 = vmatprep.subr.bf16.mxu0 %v1623_v58 }
  0x29   :  { %1249 = vmatpush3.bf16.msra.mxu1 %v1383_v36 }
  0x2a   :  { %427 = vmatmul.mubr.bf16.gmra.mrb[4].mxu0 %v1357_v30  ;;  %1250 = vmatprep.subr.bf16.mxu1 %v1384_v38 }
  0x2b   :  { %434 = vmatprep.mubr.bf16.mxu0 %v1358_v31  ;;  %1283 = vmatpush3.bf16.msra.mxu0 %v1623_v58 }
  0x2c   :  { %1235 = vmatmul.mubr.bf16.gmra.mrb[4].mxu1 %v1362_v32  ;;  %1284 = vmatprep.subr.bf16.mxu0 %v1630_v59 }
  0x2d   :  { %1238 = vmatprep.mubr.bf16.mxu1 %v1369_v33  ;;  %1251 = vmatpush3.bf16.msra.mxu1 %v1384_v38 }
  0x2e   :  { %1252 = vmatprep.subr.bf16.mxu1 %v1385_v51 }
  0x2f   :  { %1285 = vmatpush3.bf16.msra.mxu0 %v1630_v59 }
  0x30   :  { %1286 = vmatprep.subr.bf16.mxu0 %v1637_v60 }
  0x31   :  { %1253 = vmatpush3.bf16.msra.mxu1 %v1385_v51 }
  0x32   :  { %435 = vmatmul.mubr.bf16.gmra.mrb[8].mxu0 %v1360_v35  ;;  %1254 = vmatprep.subr.bf16.mxu1 %v1386_v52 }
  0x33   :  { %442 = vmatprep.mubr.bf16.mxu0 %v1363_v37  ;;  %1287 = vmatpush3.bf16.msra.mxu0 %v1637_v60 }
  0x34   :  { %1239 = vmatmul.mubr.bf16.gmra.mrb[8].mxu1 %v1370_v39  ;;  %1288 = vmatprep.subr.bf16.mxu0 %v1644_v61 }
  0x35   :  { %1242 = vmatprep.mubr.bf16.mxu1 %v1377_v40  ;;  %1255 = vmatpush3.bf16.msra.mxu1 %v1386_v52 }
  0x36   :  { %1256 = vmatprep.subr.bf16.mxu1 %v1387_v53 }
  0x37   :  { %1289 = vmatpush3.bf16.msra.mxu0 %v1644_v61 }
  0x39   :  { %1257 = vmatpush3.bf16.msra.mxu1 %v1387_v53 }
  0x3a   :  { %443 = vmatmul.mubr.bf16.gmra.mrb[12].mxu0 %v1365_v41  ;;  %1258 = vmatprep.subr.bf16.mxu1 %v1388_v54 }
  0x3b   :  { %450 = vmatprep.mubr.bf16.mxu0 %v1366_v42 }
  0x3c   :  { %1243 = vmatmul.mubr.bf16.gmra.mrb[12].mxu1 %v1378_v43 }
  0x3d   :  { %1259 = vmatpush3.bf16.msra.mxu1 %v1388_v54 }
  0x3e   :  { %1260 = vmatprep.subr.bf16.mxu1 %v1389_v55 }
  0x41   :  { %1261 = vmatpush3.bf16.msra.mxu1 %v1389_v55 }
  0x42   :  { %451 = vmatmul.mubr.bf16.gmra.mrb[16].mxu0 %v1368_v44  ;;  %1310 = vmatprep.subr.bf16.mxu1 %v1609_v56 }
  0x43   :  { %458 = vmatprep.mubr.bf16.mxu0 %v1371_v45 }
  0x4a   :  { %459 = vmatmul.mubr.bf16.gmra.mrb[20].mxu0 %v1373_v46 }
  0x4b   :  { %466 = vmatprep.mubr.bf16.mxu0 %v1374_v47 }
  0x52   :  { %467 = vmatmul.mubr.bf16.gmra.mrb[24].mxu0 %v1376_v48 }
  0x53   :  { %474 = vmatprep.mubr.bf16.mxu0 %v1379_v49 }
  0x5a   :  { %475 = vmatmul.mubr.bf16.gmra.mrb[28].mxu0 %v1381_v50 }
  0xf5   :  { %v1118_v62 = vpop.f32.mrb[0].mxu0 }
  0xf6   :  { %v1119_v63 = vpop.f32.mrb[1].mxu0 }
  0xf7   :  { %v1120_v1 = vadd.f32 %v1119_v63, %v1118_v62  ;;  %v1121_v2 = vpop.f32.mrb[2].mxu0  ;;  %v1232_v4 = vpop.f32.mrb[0].mxu1 }
  0xf8   :  { %v1122_v3 = vpop.f32.mrb[3].mxu0  ;;  %v517_v7 = vpop.f32.mrb[1].mxu1 }
  0xf9   :  { %v1123_v5 = vadd.f32 %v1122_v3, %v1121_v2  ;;  %v421_v6 = vadd.f32 %v1120_v1, %v1652_v0  ;;  %v1233_v8 = vpop.f32.mrb[2].mxu1 }
  0xfa   :  { %v520_v11 = vpop.f32.mrb[3].mxu1 }
  0xfb   :  { %v518_v9 = vadd.f32 %v517_v7, %v421_v6  ;;  %v424_v10 = vadd.f32 %v1123_v5, %v1652_v0 }
  0xfd   :  { %v521_v12 = vadd.f32 %v520_v11, %v424_v10  ;;  %v1124_v13 = vpop.f32.mrb[4].mxu0  ;;  %v580_v15 = vmax.f32 %v518_v9, 0.0 }
  0xfe   :  { %v1125_v14 = vpop.f32.mrb[5].mxu0 }
  0xff   :  { %v581_v16 = vmax.f32 %v521_v12, 0.0  ;;  %v1126_v17 = vadd.f32 %v1125_v14, %v1124_v13  ;;  %v1127_v18 = vpop.f32.mrb[6].mxu0  ;;  %v1236_v20 = vpop.f32.mrb[4].mxu1 }
 0x100   :  { %v1128_v19 = vpop.f32.mrb[7].mxu0  ;;  %v533_v24 = vpop.f32.mrb[5].mxu1 }
 0x101   :  { %v596_v21 = vpack.c.bf16 %v581_v16, %v580_v15  ;;  %v429_v22 = vadd.f32 %v1126_v17, %v1652_v0  ;;  %v1129_v23 = vadd.f32 %v1128_v19, %v1127_v18  ;;  %v1237_v25 = vpop.f32.mrb[6].mxu1 }
 0x102   :  { %v536_v28 = vpop.f32.mrb[7].mxu1 }
 0x103   :  { %v526_v26 = vadd.f32 %v1232_v4, %v429_v22  ;;  %v432_v27 = vadd.f32 %v1129_v23, %v1652_v0  ;;  %1262 = vmatprep.mubr.bf16.mxu1 %v596_v21 }
 0x105   :  { %v529_v29 = vadd.f32 %v1233_v8, %v432_v27  ;;  %v1130_v30 = vpop.f32.mrb[8].mxu0  ;;  %v582_v32 = vmax.f32 %v526_v26, 0.0 }
 0x106   :  { %v1131_v31 = vpop.f32.mrb[9].mxu0 }
 0x107   :  { %v583_v33 = vmax.f32 %v529_v29, 0.0  ;;  %v1132_v34 = vadd.f32 %v1131_v31, %v1130_v30  ;;  %v1133_v35 = vpop.f32.mrb[10].mxu0  ;;  %v1658_v37 = vpop.f32.mrb[8].mxu1 }
 0x108   :  { %v1134_v36 = vpop.f32.mrb[11].mxu0  ;;  %v549_v41 = vpop.f32.mrb[9].mxu1 }
 0x109   :  { %v597_v38 = vpack.c.bf16 %v583_v33, %v582_v32  ;;  %v1135_v39 = vadd.f32 %v1134_v36, %v1133_v35  ;;  %v437_v40 = vadd.f32 %v1132_v34, %v1652_v0  ;;  %v1241_v42 = vpop.f32.mrb[10].mxu1 }
 0x10a   :  { %v552_v45 = vpop.f32.mrb[11].mxu1 }
 0x10b   :  { %v534_v43 = vadd.f32 %v533_v24, %v437_v40  ;;  %1263 = vmatmul.mubr.bf16.vlgmr.msra.gmra.mrb[16].mxu1 %v597_v38  ;;  %v440_v44 = vadd.f32 %v1135_v39, %v1652_v0 }
 0x10c   :  { %1318 = vmatpush3.bf16.msra.mxu1 %v1609_v56 }
 0x10d   :  { %v537_v46 = vadd.f32 %v536_v28, %v440_v44  ;;  %v1136_v47 = vpop.f32.mrb[12].mxu0  ;;  %1311 = vmatprep.subr.bf16.mxu1 %v1614_v57  ;;  %v584_v49 = vmax.f32 %v534_v43, 0.0 }
 0x10e   :  { %v1137_v48 = vpop.f32.mrb[13].mxu0 }
 0x10f   :  { %v585_v50 = vmax.f32 %v537_v46, 0.0  ;;  %v1138_v51 = vadd.f32 %v1137_v48, %v1136_v47  ;;  %v1139_v52 = vpop.f32.mrb[14].mxu0  ;;  %v1664_v54 = vpop.f32.mrb[12].mxu1 }
 0x110   :  { %v1140_v53 = vpop.f32.mrb[15].mxu0  ;;  %1319 = vmatpush3.bf16.msra.mxu1 %v1614_v57  ;;  %v565_v1 = vpop.f32.mrb[13].mxu1 }
 0x111   :  { %v598_v55 = vpack.c.bf16 %v585_v50, %v584_v49  ;;  %v445_v62 = vadd.f32 %v1138_v51, %v1652_v0  ;;  %v1141_v63 = vadd.f32 %v1140_v53, %v1139_v52  ;;  %1312 = vmatprep.subr.bf16.mxu1 %v1623_v58  ;;  %v1669_v56 = vpop.f32.mrb[14].mxu1 }
 0x112   :  { %v568_v4 = vpop.f32.mrb[15].mxu1 }
 0x113   :  { %v542_v2 = vadd.f32 %v1236_v20, %v445_v62  ;;  %v448_v3 = vadd.f32 %v1141_v63, %v1652_v0  ;;  %1266 = vmatprep.mubr.bf16.mxu1 %v598_v55  ;;  %v1396_v63 = vld [vmem:[%s1711_s5 + $0x30] sm:$0xff]  }
 0x114   :  { %1320 = vmatpush3.bf16.msra.mxu1 %v1623_v58  ;;  %1290 = vmatprep.subr.bf16.mxu0 %v1396_v63 }
 0x115   :  { %v545_v5 = vadd.f32 %v1237_v25, %v448_v3  ;;  %v1142_v6 = vpop.f32.mrb[16].mxu0  ;;  %1313 = vmatprep.subr.bf16.mxu1 %v1630_v59  ;;  %v586_v7 = vmax.f32 %v542_v2, 0.0  ;;  %1291 = vmatpush3.bf16.msra.mxu0 %v1396_v63 }
 0x116   :  { %v1143_v57 = vpop.f32.mrb[17].mxu0 }
 0x117   :  { %v587_v8 = vmax.f32 %v545_v5, 0.0  ;;  %v1144_v9 = vadd.f32 %v1143_v57, %v1142_v6  ;;  %v1145_v10 = vpop.f32.mrb[18].mxu0 }
 0x118   :  { %v1146_v11 = vpop.f32.mrb[19].mxu0  ;;  %1321 = vmatpush3.bf16.msra.mxu1 %v1630_v59 }
 0x119   :  { %v1147_v12 = vadd.f32 %v1146_v11, %v1145_v10  ;;  %v453_v13 = vadd.f32 %v1144_v9, %v1652_v0  ;;  %v599_v14 = vpack.c.bf16 %v587_v8, %v586_v7  ;;  %1314 = vmatprep.subr.bf16.mxu1 %v1637_v60 }
 0x11b   :  { %v550_v15 = vadd.f32 %v549_v41, %v453_v13  ;;  %1267 = vmatmul.mubr.bf16.gmra.mrb[20].mxu1 %v599_v14  ;;  %v456_v58 = vadd.f32 %v1147_v12, %v1652_v0 }
 0x11c   :  { %1322 = vmatpush3.bf16.msra.mxu1 %v1637_v60 }
 0x11d   :  { %v553_v16 = vadd.f32 %v552_v45, %v456_v58  ;;  %v1148_v17 = vpop.f32.mrb[20].mxu0  ;;  %1315 = vmatprep.subr.bf16.mxu1 %v1644_v61  ;;  %v588_v19 = vmax.f32 %v550_v15, 0.0 }
 0x11e   :  { %v1149_v18 = vpop.f32.mrb[21].mxu0 }
 0x11f   :  { %v589_v20 = vmax.f32 %v553_v16, 0.0  ;;  %v1150_v59 = vadd.f32 %v1149_v18, %v1148_v17  ;;  %v1151_v21 = vpop.f32.mrb[22].mxu0 }
 0x120   :  { %v1152_v22 = vpop.f32.mrb[23].mxu0  ;;  %1323 = vmatpush3.bf16.msra.mxu1 %v1644_v61 }
 0x121   :  { %v600_v23 = vpack.c.bf16 %v589_v20, %v588_v19  ;;  %v461_v24 = vadd.f32 %v1150_v59, %v1652_v0  ;;  %v1153_v25 = vadd.f32 %v1152_v22, %v1151_v21  ;;  %1316 = vmatprep.subr.bf16.mxu1 %v1396_v63 }
 0x123   :  { %v558_v26 = vadd.f32 %v1658_v37, %v461_v24  ;;  %v464_v60 = vadd.f32 %v1153_v25, %v1652_v0  ;;  %1270 = vmatprep.mubr.bf16.mxu1 %v600_v23 }
 0x124   :  { %1324 = vmatpush3.bf16.msra.mxu1 %v1396_v63 }
 0x125   :  { %v561_v27 = vadd.f32 %v1241_v42, %v464_v60  ;;  %v1154_v28 = vpop.f32.mrb[24].mxu0  ;;  %v590_v30 = vmax.f32 %v558_v26, 0.0 }
 0x126   :  { %v1155_v29 = vpop.f32.mrb[25].mxu0 }
 0x127   :  { %v591_v31 = vmax.f32 %v561_v27, 0.0  ;;  %v1156_v32 = vadd.f32 %v1155_v29, %v1154_v28  ;;  %v1157_v33 = vpop.f32.mrb[26].mxu0 }
 0x128   :  { %v1158_v34 = vpop.f32.mrb[27].mxu0 }
 0x129   :  { %v1159_v35 = vadd.f32 %v1158_v34, %v1157_v33  ;;  %v469_v61 = vadd.f32 %v1156_v32, %v1652_v0  ;;  %v601_v36 = vpack.c.bf16 %v591_v31, %v590_v30 }
 0x12b   :  { %v566_v38 = vadd.f32 %v565_v1, %v469_v61  ;;  %1271 = vmatmul.mubr.bf16.gmra.mrb[24].mxu1 %v601_v36  ;;  %v472_v39 = vadd.f32 %v1159_v35, %v1652_v0 }
 0x12d   :  { %v569_v37 = vadd.f32 %v568_v4, %v472_v39  ;;  %v1160_v40 = vpop.f32.mrb[28].mxu0  ;;  %v592_v43 = vmax.f32 %v566_v38, 0.0 }
 0x12e   :  { %v1161_v41 = vpop.f32.mrb[29].mxu0 }
 0x12f   :  { %v593_v42 = vmax.f32 %v569_v37, 0.0  ;;  %v1162_v44 = vadd.f32 %v1161_v41, %v1160_v40  ;;  %v1163_v45 = vpop.f32.mrb[30].mxu0 }
 0x130   :  { %v1164_v46 = vpop.f32.mrb[31].mxu0 }
 0x131   :  { %v602_v47 = vpack.c.bf16 %v593_v42, %v592_v43  ;;  %v477_v48 = vadd.f32 %v1162_v44, %v1652_v0  ;;  %v1165_v49 = vadd.f32 %v1164_v46, %v1163_v45 }
 0x133   :  { %v574_v50 = vadd.f32 %v1664_v54, %v477_v48  ;;  %v480_v51 = vadd.f32 %v1165_v49, %v1652_v0  ;;  %1274 = vmatprep.mubr.bf16.mxu1 %v602_v47  ;;  %v1397_v54 = vld [vmem:[%s1711_s5 + $0x38] sm:$0xff]   ;;  %v1065_v0 = vld [vmem:[%s1713_s4] ss:$0 sm:$0xff] }
 0x134   :  { %1292 = vmatprep.subr.bf16.mxu0 %v1397_v54  ;;  %1317 = vmatprep.subr.bf16.mxu1 %v1397_v54 }
 0x135   :  { %v577_v52 = vadd.f32 %v1669_v56, %v480_v51  ;;  %v594_v53 = vmax.f32 %v574_v50, 0.0  ;;  %1293 = vmatpush3.bf16.msra.mxu0 %v1397_v54  ;;  %1325 = vmatpush3.bf16.msra.mxu1 %v1397_v54 }
 0x137   :  { %v595_v55 = vmax.f32 %v577_v52, 0.0 }
 0x139   :  { %v603_v62 = vpack.c.bf16 %v595_v55, %v594_v53 }
 0x13b   :  { %1275 = vmatmul.mubr.bf16.gmra.mrb[28].mxu1 %v603_v62  ;;  %v1074_v62 = vld [vmem:[%s1714_s6] ss:$0 sm:$0xff] }
 0x1de   :  { %v1264_v1 = vpop.f32.mrb[16].mxu1 }
 0x1df   :  { %v718_v56 = vadd.f32 %v1264_v1, %v1065_v0  ;;  %v709_v2 = vpop.f32.mrb[17].mxu1 }
 0x1e0   :  { %v710_v3 = vadd.f32 %v1065_v0, %v709_v2  ;;  %v1265_v4 = vpop.f32.mrb[18].mxu1 }
 0x1e1   :  { %v721_v5 = vadd.f32 %v1265_v4, %v1065_v0  ;;  %v712_v6 = vpop.f32.mrb[19].mxu1  ;;  %v774_v7 = vmax.f32 %v718_v56, 0.0 }
 0x1e2   :  { %v713_v57 = vadd.f32 %v1065_v0, %v712_v6  ;;  %v772_v9 = vmax.f32 %v710_v3, 0.0 }
 0x1e3   :  { %v775_v8 = vmax.f32 %v721_v5, 0.0 }
 0x1e4   :  { %v773_v10 = vmax.f32 %v713_v57, 0.0 }
 0x1e5   :  { %v789_v11 = vpack.c.bf16 %v775_v8, %v774_v7 }
 0x1e6   :  { %v788_v12 = vpack.c.bf16 %v773_v10, %v772_v9 }
 0x1e8   :  { %1294 = vmatprep.mubr.bf16.mxu0 %v788_v12 }
 0x1e9   :  { %1295 = vmatmul.mubr.bf16.vlgmr.msra.gmra.mrb[32].mxu0 %v789_v11 }
 0x1ee   :  { %v1268_v13 = vpop.f32.mrb[20].mxu1 }
 0x1ef   :  { %v734_v14 = vadd.f32 %v1268_v13, %v1065_v0  ;;  %v725_v15 = vpop.f32.mrb[21].mxu1 }
 0x1f0   :  { %v726_v58 = vadd.f32 %v1065_v0, %v725_v15  ;;  %v1269_v16 = vpop.f32.mrb[22].mxu1 }
 0x1f1   :  { %v737_v17 = vadd.f32 %v1269_v16, %v1065_v0  ;;  %v728_v18 = vpop.f32.mrb[23].mxu1  ;;  %v778_v20 = vmax.f32 %v734_v14, 0.0 }
 0x1f2   :  { %v729_v19 = vadd.f32 %v1065_v0, %v728_v18  ;;  %v776_v21 = vmax.f32 %v726_v58, 0.0 }
 0x1f3   :  { %v779_v59 = vmax.f32 %v737_v17, 0.0 }
 0x1f4   :  { %v777_v22 = vmax.f32 %v729_v19, 0.0 }
 0x1f5   :  { %v791_v23 = vpack.c.bf16 %v779_v59, %v778_v20 }
 0x1f6   :  { %v790_v24 = vpack.c.bf16 %v777_v22, %v776_v21 }
 0x1f8   :  { %1298 = vmatprep.mubr.bf16.mxu0 %v790_v24 }
 0x1f9   :  { %1299 = vmatmul.mubr.bf16.gmra.mrb[36].mxu0 %v791_v23 }
 0x1fe   :  { %v1272_v25 = vpop.f32.mrb[24].mxu1 }
 0x1ff   :  { %v750_v26 = vadd.f32 %v1272_v25, %v1065_v0  ;;  %v741_v60 = vpop.f32.mrb[25].mxu1 }
 0x200   :  { %v742_v27 = vadd.f32 %v1065_v0, %v741_v60  ;;  %v1273_v28 = vpop.f32.mrb[26].mxu1 }
 0x201   :  { %v753_v29 = vadd.f32 %v1273_v28, %v1065_v0  ;;  %v744_v30 = vpop.f32.mrb[27].mxu1  ;;  %v782_v32 = vmax.f32 %v750_v26, 0.0 }
 0x202   :  { %v745_v31 = vadd.f32 %v1065_v0, %v744_v30  ;;  %v780_v34 = vmax.f32 %v742_v27, 0.0 }
 0x203   :  { %v783_v33 = vmax.f32 %v753_v29, 0.0 }
 0x204   :  { %v781_v35 = vmax.f32 %v745_v31, 0.0 }
 0x205   :  { %v793_v61 = vpack.c.bf16 %v783_v33, %v782_v32 }
 0x206   :  { %v792_v36 = vpack.c.bf16 %v781_v35, %v780_v34 }
 0x208   :  { %1302 = vmatprep.mubr.bf16.mxu1 %v792_v36 }
 0x209   :  { %1303 = vmatmul.mubr.bf16.vlgmr.msra.gmra.mrb[32].mxu1 %v793_v61 }
 0x20e   :  { %v1276_v38 = vpop.f32.mrb[28].mxu1 }
 0x20f   :  { %v766_v39 = vadd.f32 %v1276_v38, %v1065_v0  ;;  %v757_v37 = vpop.f32.mrb[29].mxu1 }
 0x210   :  { %v758_v40 = vadd.f32 %v1065_v0, %v757_v37  ;;  %v1277_v41 = vpop.f32.mrb[30].mxu1 }
 0x211   :  { %v769_v43 = vadd.f32 %v1277_v41, %v1065_v0  ;;  %v760_v42 = vpop.f32.mrb[31].mxu1  ;;  %v786_v45 = vmax.f32 %v766_v39, 0.0 }
 0x212   :  { %v761_v44 = vadd.f32 %v1065_v0, %v760_v42  ;;  %v784_v47 = vmax.f32 %v758_v40, 0.0 }
 0x213   :  { %v787_v46 = vmax.f32 %v769_v43, 0.0 }
 0x214   :  { %v785_v48 = vmax.f32 %v761_v44, 0.0 }
 0x215   :  { %v795_v49 = vpack.c.bf16 %v787_v46, %v786_v45 }
 0x216   :  { %v794_v50 = vpack.c.bf16 %v785_v48, %v784_v47 }
 0x218   :  { %1306 = vmatprep.mubr.bf16.mxu1 %v794_v50 }
 0x219   :  { %1307 = vmatmul.mubr.bf16.gmra.mrb[36].mxu1 %v795_v49 }
 0x2bc   :  { %v1296_v51 = vpop.f32.mrb[32].mxu0 }
 0x2bd   :  { %v901_v52 = vpop.f32.mrb[33].mxu0  ;;  %v910_v63 = vadd.f32 %v1296_v51, %v1074_v62 }
 0x2be   :  { %v1297_v53 = vpop.f32.mrb[34].mxu0  ;;  %v902_v54 = vadd.f32 %v1074_v62, %v901_v52 }
 0x2bf   :  { %v904_v55 = vpop.f32.mrb[35].mxu0  ;;  %v913_v0 = vadd.f32 %v1297_v53, %v1074_v62  ;;  %v966_v6 = vmax.f32 %v910_v63, 0.0 }
 0x2c0   :  { %v905_v3 = vadd.f32 %v1074_v62, %v904_v55  ;;  %v964_v9 = vmax.f32 %v902_v54, 0.0 }
 0x2c1   :  { %v967_v12 = vmax.f32 %v913_v0, 0.0 }
 0x2c2   :  { %v965_v15 = vmax.f32 %v905_v3, 0.0 }
 0x2cc   :  { %v1300_v1 = vpop.f32.mrb[36].mxu0 }
 0x2cd   :  { %v926_v56 = vadd.f32 %v1300_v1, %v1074_v62  ;;  %v917_v2 = vpop.f32.mrb[37].mxu0 }
 0x2ce   :  { %v918_v4 = vadd.f32 %v1074_v62, %v917_v2  ;;  %v1301_v5 = vpop.f32.mrb[38].mxu0 }
 0x2cf   :  { %v970_v57 = vmax.f32 %v926_v56, 0.0  ;;  %v929_v7 = vadd.f32 %v1301_v5, %v1074_v62  ;;  %v920_v8 = vpop.f32.mrb[39].mxu0 }
 0x2d0   :  { %v968_v10 = vmax.f32 %v918_v4, 0.0  ;;  %v921_v11 = vadd.f32 %v1074_v62, %v920_v8 }
 0x2d1   :  { %v982_v13 = vmax.f32 %v966_v6, %v970_v57  ;;  %v971_v14 = vmax.f32 %v929_v7, 0.0 }
 0x2d2   :  { %v980_v58 = vmax.f32 %v964_v9, %v968_v10  ;;  %v969_v16 = vmax.f32 %v921_v11, 0.0 }
 0x2d3   :  { %v983_v17 = vmax.f32 %v967_v12, %v971_v14 }
 0x2d4   :  { %v981_v18 = vmax.f32 %v965_v15, %v969_v16 }
 0x2dc   :  { %v1304_v19 = vpop.f32.mrb[32].mxu1 }
 0x2dd   :  { %v933_v20 = vpop.f32.mrb[33].mxu1  ;;  %v942_v22 = vadd.f32 %v1304_v19, %v1074_v62 }
 0x2de   :  { %v1305_v59 = vpop.f32.mrb[34].mxu1  ;;  %v934_v23 = vadd.f32 %v1074_v62, %v933_v20 }
 0x2df   :  { %v936_v21 = vpop.f32.mrb[35].mxu1  ;;  %v945_v25 = vadd.f32 %v1305_v59, %v1074_v62  ;;  %v974_v30 = vmax.f32 %v942_v22, 0.0 }
 0x2e0   :  { %v937_v27 = vadd.f32 %v1074_v62, %v936_v21  ;;  %v972_v34 = vmax.f32 %v934_v23, 0.0 }
 0x2e1   :  { %v975_v36 = vmax.f32 %v945_v25, 0.0 }
 0x2e2   :  { %v973_v37 = vmax.f32 %v937_v27, 0.0 }
 0x2ec   :  { %v1308_v24 = vpop.f32.mrb[36].mxu1 }
 0x2ed   :  { %v958_v26 = vadd.f32 %v1308_v24, %v1074_v62  ;;  %v949_v60 = vpop.f32.mrb[37].mxu1 }
 0x2ee   :  { %v950_v28 = vadd.f32 %v1074_v62, %v949_v60  ;;  %v1309_v29 = vpop.f32.mrb[38].mxu1 }
 0x2ef   :  { %v978_v31 = vmax.f32 %v958_v26, 0.0  ;;  %v961_v32 = vadd.f32 %v1309_v29, %v1074_v62  ;;  %v952_v33 = vpop.f32.mrb[39].mxu1 }
 0x2f0   :  { %v976_v35 = vmax.f32 %v950_v28, 0.0  ;;  %v953_v61 = vadd.f32 %v1074_v62, %v952_v33 }
 0x2f1   :  { %v986_v38 = vmax.f32 %v974_v30, %v978_v31  ;;  %v979_v39 = vmax.f32 %v961_v32, 0.0 }
 0x2f2   :  { %v984_v40 = vmax.f32 %v972_v34, %v976_v35  ;;  %v977_v41 = vmax.f32 %v953_v61, 0.0 }
 0x2f3   :  { %v990_v43 = vmax.f32 %v982_v13, %v986_v38  ;;  %v987_v42 = vmax.f32 %v975_v36, %v979_v39 }
 0x2f4   :  { %v988_v44 = vmax.f32 %v980_v58, %v984_v40  ;;  %v985_v45 = vmax.f32 %v973_v37, %v977_v41 }
 0x2f5   :  { %v991_v46 = vmax.f32 %v983_v17, %v987_v42 }
 0x2f6   :  { %v989_v47 = vmax.f32 %v981_v18, %v985_v45 }
 0x2f7   :  { %v1099_v48 = vpack.c.bf16 %v991_v46, %v990_v43 }
 0x2f8   :  { %v1094_v49 = vpack.c.bf16 %v989_v47, %v988_v44 }
 0x2f9   :  { %1101 = vst [vmem:[%s1715_s7 + $0x8] sm:$0xff] %v1099_v48  }
 0x2fa   :  { %1095 = vst [vmem:[%s1715_s7] sm:$0xff] %v1094_v49  }

// kernel: conv3_forward.4
= control target key start
LH: loop header
LB: loop body
LE: loop exit
PB: predicated region body
PF: predicated region fallthrough
CT: control target
= control target key end

     0   :  { %s6993_s1 = inlined_call_operand.vmem [shape: bf16[3200,256], index: 1, kind: input, shape index: {}]   ;;  %s6994_s0 = inlined_call_operand.vmem [shape: bf16[32,3200], index: 0, kind: input, shape index: {}]   ;;  %s6995_s3 = inlined_call_operand.vmem [shape: bf16[256,256], index: 3, kind: input, shape index: {}]   ;;  %s6996_s5 = inlined_call_operand.vmem [shape: bf16[256,256], index: 5, kind: input, shape index: {}]   ;;  %s6997_s2 = inlined_call_operand.vmem [shape: f32[1,256], index: 2, kind: input, shape index: {}]   ;;  %s6998_s4 = inlined_call_operand.vmem [shape: f32[1,256], index: 4, kind: input, shape index: {}]   ;;  %s6999_s6 = inlined_call_operand.vmem [shape: f32[1,256], index: 6, kind: input, shape index: {}]   ;;  %s7000_s7 = inlined_call_operand.vmem [shape: bf16[8,256], index: 7, kind: output, shape index: {}]  }
   0x1   :  { %v4618_v0 = vld [vmem:[%s6993_s1 + $0x4] ss:$8 sps:$4 sm:$0xff]   ;;  %v4622_v2 = vld [vmem:[%s6993_s1] ss:$8 sps:$4 sm:$0xff]   ;;  %v4624_v4 = vld [vmem:[%s6993_s1 + $0x14] ss:$8 sps:$4 sm:$0xff]  }
   0x2   :  { %v4620_v1 = vld [vmem:[%s6993_s1 + $0x504] ss:$8 sps:$4 sm:$0xff]   ;;  %2743 = vmatprep.subr.bf16.mxu1 %v4618_v0  ;;  %v4623_v3 = vld [vmem:[%s6993_s1 + $0x500] ss:$8 sps:$4 sm:$0xff]   ;;  %v4626_v5 = vld [vmem:[%s6993_s1 + $0x514] ss:$8 sps:$4 sm:$0xff]  }
   0x3   :  { %3008 = vmatprep.subr.bf16.mxu0 %v4620_v1  ;;  %2744 = vmatpush1.bf16.msra.mxu1 %v4622_v2  ;;  %v4628_v6 = vld [vmem:[%s6993_s1 + $0x10] ss:$8 sps:$4 sm:$0xff]   ;;  %v4630_v8 = vld [vmem:[%s6993_s1 + $0x24] ss:$8 sps:$4 sm:$0xff]   ;;  %v4634_v10 = vld [vmem:[%s6993_s1 + $0x20] ss:$8 sps:$4 sm:$0xff]  }
   0x4   :  { %3009 = vmatpush1.bf16.msra.mxu0 %v4623_v3  ;;  %2745 = vmatprep.subr.bf16.mxu1 %v4624_v4  ;;  %v4629_v7 = vld [vmem:[%s6993_s1 + $0x510] ss:$8 sps:$4 sm:$0xff]   ;;  %v4632_v9 = vld [vmem:[%s6993_s1 + $0x524] ss:$8 sps:$4 sm:$0xff]   ;;  %v4635_v11 = vld [vmem:[%s6993_s1 + $0x520] ss:$8 sps:$4 sm:$0xff]  }
   0x5   :  { %3010 = vmatprep.subr.bf16.mxu0 %v4626_v5  ;;  %v4636_v12 = vld [vmem:[%s6993_s1 + $0x34] ss:$8 sps:$4 sm:$0xff]   ;;  %v4640_v14 = vld [vmem:[%s6993_s1 + $0x30] ss:$8 sps:$4 sm:$0xff]   ;;  %v4642_v16 = vld [vmem:[%s6993_s1 + $0x44] ss:$8 sps:$4 sm:$0xff]  }
   0x6   :  { %v4638_v13 = vld [vmem:[%s6993_s1 + $0x534] ss:$8 sps:$4 sm:$0xff]   ;;  %v4641_v15 = vld [vmem:[%s6993_s1 + $0x530] ss:$8 sps:$4 sm:$0xff]   ;;  %v4644_v17 = vld [vmem:[%s6993_s1 + $0x544] ss:$8 sps:$4 sm:$0xff]  }
   0x7   :  { %2746 = vmatpush1.bf16.msra.mxu1 %v4628_v6  ;;  %v4646_v18 = vld [vmem:[%s6993_s1 + $0x40] ss:$8 sps:$4 sm:$0xff]   ;;  %v4648_v20 = vld [vmem:[%s6993_s1 + $0x54] ss:$8 sps:$4 sm:$0xff]   ;;  %v4652_v22 = vld [vmem:[%s6993_s1 + $0x50] ss:$8 sps:$4 sm:$0xff]  }
   0x8   :  { %3011 = vmatpush1.bf16.msra.mxu0 %v4629_v7  ;;  %2747 = vmatprep.subr.bf16.mxu1 %v4630_v8  ;;  %v4647_v19 = vld [vmem:[%s6993_s1 + $0x540] ss:$8 sps:$4 sm:$0xff]   ;;  %v4650_v21 = vld [vmem:[%s6993_s1 + $0x554] ss:$8 sps:$4 sm:$0xff]   ;;  %v4653_v23 = vld [vmem:[%s6993_s1 + $0x550] ss:$8 sps:$4 sm:$0xff]  }
   0x9   :  { %3012 = vmatprep.subr.bf16.mxu0 %v4632_v9  ;;  %v4654_v24 = vld [vmem:[%s6993_s1 + $0x64] ss:$8 sps:$4 sm:$0xff]   ;;  %v4658_v26 = vld [vmem:[%s6993_s1 + $0x60] ss:$8 sps:$4 sm:$0xff]   ;;  %v4660_v28 = vld [vmem:[%s6993_s1 + $0x74] ss:$8 sps:$4 sm:$0xff]  }
   0xa   :  { %v4656_v25 = vld [vmem:[%s6993_s1 + $0x564] ss:$8 sps:$4 sm:$0xff]   ;;  %v4659_v27 = vld [vmem:[%s6993_s1 + $0x560] ss:$8 sps:$4 sm:$0xff]   ;;  %v4662_v29 = vld [vmem:[%s6993_s1 + $0x574] ss:$8 sps:$4 sm:$0xff]  }
   0xb   :  { %2748 = vmatpush1.bf16.msra.mxu1 %v4634_v10  ;;  %v4664_v30 = vld [vmem:[%s6993_s1 + $0x70] ss:$8 sps:$4 sm:$0xff]   ;;  %v4666_v32 = vld [vmem:[%s6993_s1 + $0x84] ss:$8 sps:$4 sm:$0xff]   ;;  %v4670_v34 = vld [vmem:[%s6993_s1 + $0x80] ss:$8 sps:$4 sm:$0xff]  }
   0xc   :  { %3013 = vmatpush1.bf16.msra.mxu0 %v4635_v11  ;;  %2749 = vmatprep.subr.bf16.mxu1 %v4636_v12  ;;  %v4665_v31 = vld [vmem:[%s6993_s1 + $0x570] ss:$8 sps:$4 sm:$0xff]   ;;  %v4668_v33 = vld [vmem:[%s6993_s1 + $0x584] ss:$8 sps:$4 sm:$0xff]   ;;  %v4671_v35 = vld [vmem:[%s6993_s1 + $0x580] ss:$8 sps:$4 sm:$0xff]  }
   0xd   :  { %3014 = vmatprep.subr.bf16.mxu0 %v4638_v13  ;;  %v4672_v36 = vld [vmem:[%s6993_s1 + $0x94] ss:$8 sps:$4 sm:$0xff]   ;;  %v4676_v38 = vld [vmem:[%s6993_s1 + $0x90] ss:$8 sps:$4 sm:$0xff]   ;;  %v4678_v40 = vld [vmem:[%s6993_s1 + $0xa4] ss:$8 sps:$4 sm:$0xff]  }
   0xe   :  { %v4674_v37 = vld [vmem:[%s6993_s1 + $0x594] ss:$8 sps:$4 sm:$0xff]   ;;  %v4677_v39 = vld [vmem:[%s6993_s1 + $0x590] ss:$8 sps:$4 sm:$0xff]   ;;  %v4680_v41 = vld [vmem:[%s6993_s1 + $0x5a4] ss:$8 sps:$4 sm:$0xff]  }
   0xf   :  { %2750 = vmatpush1.bf16.msra.mxu1 %v4640_v14  ;;  %v4682_v42 = vld [vmem:[%s6993_s1 + $0xa0] ss:$8 sps:$4 sm:$0xff]   ;;  %v4684_v44 = vld [vmem:[%s6993_s1 + $0xb4] ss:$8 sps:$4 sm:$0xff]   ;;  %v4688_v46 = vld [vmem:[%s6993_s1 + $0xb0] ss:$8 sps:$4 sm:$0xff]  }
  0x10   :  { %3015 = vmatpush1.bf16.msra.mxu0 %v4641_v15  ;;  %2751 = vmatprep.subr.bf16.mxu1 %v4642_v16  ;;  %v4683_v43 = vld [vmem:[%s6993_s1 + $0x5a0] ss:$8 sps:$4 sm:$0xff]   ;;  %v4686_v45 = vld [vmem:[%s6993_s1 + $0x5b4] ss:$8 sps:$4 sm:$0xff]   ;;  %v4689_v47 = vld [vmem:[%s6993_s1 + $0x5b0] ss:$8 sps:$4 sm:$0xff]  }
  0x11   :  { %3016 = vmatprep.subr.bf16.mxu0 %v4644_v17  ;;  %v4716_v48 = vld [vmem:[%s6994_s0 + $0x4] ss:$100 sps:$4 sm:$0xff]   ;;  %v4722_v51 = vld [vmem:[%s6994_s0 + $0x2c] ss:$100 sps:$4 sm:$0xff]   ;;  %v4696_v54 = vld [vmem:[%s6993_s1 + $0xd4] ss:$8 sps:$4 sm:$0xff]  }
  0x12   :  { %v4690_v49 = vld [vmem:[%s6993_s1 + $0xc4] ss:$8 sps:$4 sm:$0xff]   ;;  %2775 = vmatprep.mubr.bf16.mxu1 %v4716_v48  ;;  %v4694_v52 = vld [vmem:[%s6993_s1 + $0xc0] ss:$8 sps:$4 sm:$0xff]   ;;  %v4698_v55 = vld [vmem:[%s6993_s1 + $0x5d4] ss:$8 sps:$4 sm:$0xff]   ;;  %3040 = vmatprep.mubr.bf16.mxu0 %v4722_v51 }
  0x13   :  { %2752 = vmatpush1.bf16.msra.mxu1 %v4646_v18  ;;  %v4692_v50 = vld [vmem:[%s6993_s1 + $0x5c4] ss:$8 sps:$4 sm:$0xff]   ;;  %v4695_v53 = vld [vmem:[%s6993_s1 + $0x5c0] ss:$8 sps:$4 sm:$0xff]   ;;  %v4700_v56 = vld [vmem:[%s6993_s1 + $0xd0] ss:$8 sps:$4 sm:$0xff]  }
  0x14   :  { %3017 = vmatpush1.bf16.msra.mxu0 %v4647_v19  ;;  %2753 = vmatprep.subr.bf16.mxu1 %v4648_v20  ;;  %v4701_v57 = vld [vmem:[%s6993_s1 + $0x5d0] ss:$8 sps:$4 sm:$0xff]   ;;  %v4702_v58 = vld [vmem:[%s6993_s1 + $0xe4] ss:$8 sps:$4 sm:$0xff]   ;;  %v4706_v60 = vld [vmem:[%s6993_s1 + $0xe0] ss:$8 sps:$4 sm:$0xff]  }
  0x15   :  { %3018 = vmatprep.subr.bf16.mxu0 %v4650_v21  ;;  %v4704_v59 = vld [vmem:[%s6993_s1 + $0x5e4] ss:$8 sps:$4 sm:$0xff]   ;;  %v4707_v61 = vld [vmem:[%s6993_s1 + $0x5e0] ss:$8 sps:$4 sm:$0xff]   ;;  %v4708_v62 = vld [vmem:[%s6993_s1 + $0xf4] ss:$8 sps:$4 sm:$0xff]  }
  0x16   :  { %v4710_v63 = vld [vmem:[%s6993_s1 + $0x5f4] ss:$8 sps:$4 sm:$0xff]   ;;  %v4712_v0 = vld [vmem:[%s6993_s1 + $0xf0] ss:$8 sps:$4 sm:$0xff]   ;;  %v4719_v2 = vld [vmem:[%s6993_s1 + $0x104] ss:$8 sps:$4 sm:$0xff]  }
  0x17   :  { %2754 = vmatpush1.bf16.msra.mxu1 %v4652_v22  ;;  %v4713_v1 = vld [vmem:[%s6993_s1 + $0x5f0] ss:$8 sps:$4 sm:$0xff]   ;;  %v4725_v3 = vld [vmem:[%s6993_s1 + $0x604] ss:$8 sps:$4 sm:$0xff]   ;;  %v4717_v5 = vld [vmem:[%s6993_s1 + $0x100] ss:$8 sps:$4 sm:$0xff]  }
  0x18   :  { %3019 = vmatpush1.bf16.msra.mxu0 %v4653_v23  ;;  %2755 = vmatprep.subr.bf16.mxu1 %v4654_v24  ;;  %v4714_v4 = vld [vmem:[%s6994_s0] ss:$100 sps:$4 sm:$0xff]   ;;  %v4720_v6 = vld [vmem:[%s6994_s0 + $0x28] ss:$100 sps:$4 sm:$0xff]   ;;  %v4728_v8 = vld [vmem:[%s6993_s1 + $0x114] ss:$8 sps:$4 sm:$0xff]  }
  0x19   :  { %3020 = vmatprep.subr.bf16.mxu0 %v4656_v25  ;;  %v4723_v7 = vld [vmem:[%s6993_s1 + $0x600] ss:$8 sps:$4 sm:$0xff]   ;;  %v4731_v9 = vld [vmem:[%s6993_s1 + $0x614] ss:$8 sps:$4 sm:$0xff]   ;;  %v4726_v10 = vld [vmem:[%s6993_s1 + $0x110] ss:$8 sps:$4 sm:$0xff]  }
  0x1a   :  { %v4729_v11 = vld [vmem:[%s6993_s1 + $0x610] ss:$8 sps:$4 sm:$0xff]   ;;  %v4734_v12 = vld [vmem:[%s6993_s1 + $0x124] ss:$8 sps:$4 sm:$0xff]   ;;  %v4732_v14 = vld [vmem:[%s6993_s1 + $0x120] ss:$8 sps:$4 sm:$0xff]  }
  0x1b   :  { %2756 = vmatpush1.bf16.msra.mxu1 %v4658_v26  ;;  %v4737_v13 = vld [vmem:[%s6993_s1 + $0x624] ss:$8 sps:$4 sm:$0xff]   ;;  %v4735_v15 = vld [vmem:[%s6993_s1 + $0x620] ss:$8 sps:$4 sm:$0xff]   ;;  %v4740_v16 = vld [vmem:[%s6993_s1 + $0x134] ss:$8 sps:$4 sm:$0xff]  }
  0x1c   :  { %3021 = vmatpush1.bf16.msra.mxu0 %v4659_v27  ;;  %2757 = vmatprep.subr.bf16.mxu1 %v4660_v28  ;;  %v4743_v17 = vld [vmem:[%s6993_s1 + $0x634] ss:$8 sps:$4 sm:$0xff]   ;;  %v4738_v18 = vld [vmem:[%s6993_s1 + $0x130] ss:$8 sps:$4 sm:$0xff]   ;;  %v4746_v20 = vld [vmem:[%s6993_s1 + $0x144] ss:$8 sps:$4 sm:$0xff]  }
  0x1d   :  { %3022 = vmatprep.subr.bf16.mxu0 %v4662_v29  ;;  %v4741_v19 = vld [vmem:[%s6993_s1 + $0x630] ss:$8 sps:$4 sm:$0xff]   ;;  %v4749_v21 = vld [vmem:[%s6993_s1 + $0x644] ss:$8 sps:$4 sm:$0xff]   ;;  %v4744_v22 = vld [vmem:[%s6993_s1 + $0x140] ss:$8 sps:$4 sm:$0xff]  }
  0x1e   :  { %v4747_v23 = vld [vmem:[%s6993_s1 + $0x640] ss:$8 sps:$4 sm:$0xff]   ;;  %v4752_v24 = vld [vmem:[%s6993_s1 + $0x154] ss:$8 sps:$4 sm:$0xff]   ;;  %v4750_v26 = vld [vmem:[%s6993_s1 + $0x150] ss:$8 sps:$4 sm:$0xff]  }
  0x1f   :  { %2758 = vmatpush1.bf16.msra.mxu1 %v4664_v30  ;;  %v4755_v25 = vld [vmem:[%s6993_s1 + $0x654] ss:$8 sps:$4 sm:$0xff]   ;;  %v4753_v27 = vld [vmem:[%s6993_s1 + $0x650] ss:$8 sps:$4 sm:$0xff]   ;;  %v4758_v29 = vld [vmem:[%s6993_s1 + $0x164] ss:$8 sps:$4 sm:$0xff]  }
  0x20   :  { %3023 = vmatpush1.bf16.msra.mxu0 %v4665_v31  ;;  %2759 = vmatprep.subr.bf16.mxu1 %v4666_v32  ;;  %v4804_v28 = vld [vmem:[%s6994_s0 + $0xcc] ss:$100 sps:$4 sm:$0xff]   ;;  %v4809_v31 = vld [vmem:[%s6994_s0 + $0xf4] ss:$100 sps:$4 sm:$0xff]   ;;  %v4756_v32 = vld [vmem:[%s6993_s1 + $0x160] ss:$8 sps:$4 sm:$0xff]  }
  0x21   :  { %3024 = vmatprep.subr.bf16.mxu0 %v4668_v33  ;;  %v4761_v30 = vld [vmem:[%s6993_s1 + $0x664] ss:$8 sps:$4 sm:$0xff]   ;;  %v4759_v33 = vld [vmem:[%s6993_s1 + $0x660] ss:$8 sps:$4 sm:$0xff]   ;;  %v4774_v48 = vld [vmem:[%s6993_s1 + $0x190] ss:$8 sps:$4 sm:$0xff]  }
  0x22   :  { %v4785_v51 = vld [vmem:[%s6993_s1 + $0x6a4] ss:$8 sps:$4 sm:$0xff]  }
  0x23   :  { %2760 = vmatpush1.bf16.msra.mxu1 %v4670_v34  ;;  %v4814_v34 = vld [vmem:[%s6994_s0 + $0xc8] ss:$100 sps:$4 sm:$0xff]  }
  0x24   :  { %3025 = vmatpush1.bf16.msra.mxu0 %v4671_v35  ;;  %2761 = vmatprep.subr.bf16.mxu1 %v4672_v36  ;;  %v4815_v35 = vld [vmem:[%s6994_s0 + $0xf0] ss:$100 sps:$4 sm:$0xff]  }
  0x25   :  { %3026 = vmatprep.subr.bf16.mxu0 %v4674_v37  ;;  %v4764_v36 = vld [vmem:[%s6993_s1 + $0x174] ss:$8 sps:$4 sm:$0xff]  }
  0x26   :  { %v4767_v37 = vld [vmem:[%s6993_s1 + $0x674] ss:$8 sps:$4 sm:$0xff]  }
  0x27   :  { %2762 = vmatpush1.bf16.msra.mxu1 %v4676_v38  ;;  %v4762_v38 = vld [vmem:[%s6993_s1 + $0x170] ss:$8 sps:$4 sm:$0xff]  }
  0x28   :  { %3027 = vmatpush1.bf16.msra.mxu0 %v4677_v39  ;;  %2763 = vmatprep.subr.bf16.mxu1 %v4678_v40  ;;  %v4765_v39 = vld [vmem:[%s6993_s1 + $0x670] ss:$8 sps:$4 sm:$0xff]  }
  0x29   :  { %3028 = vmatprep.subr.bf16.mxu0 %v4680_v41  ;;  %v4824_v40 = vld [vmem:[%s6994_s0 + $0xc] ss:$100 sps:$4 sm:$0xff]  }
  0x2a   :  { %v4770_v41 = vld [vmem:[%s6993_s1 + $0x184] ss:$8 sps:$4 sm:$0xff]  }
  0x2b   :  { %2764 = vmatpush1.bf16.msra.mxu1 %v4682_v42  ;;  %v4773_v42 = vld [vmem:[%s6993_s1 + $0x684] ss:$8 sps:$4 sm:$0xff]  }
  0x2c   :  { %3029 = vmatpush1.bf16.msra.mxu0 %v4683_v43  ;;  %2765 = vmatprep.subr.bf16.mxu1 %v4684_v44  ;;  %v4830_v43 = vld [vmem:[%s6994_s0 + $0x34] ss:$100 sps:$4 sm:$0xff]   ;;  %v4768_v44 = vld [vmem:[%s6993_s1 + $0x180] ss:$8 sps:$4 sm:$0xff]  }
  0x2d   :  { %3030 = vmatprep.subr.bf16.mxu0 %v4686_v45  ;;  %v4771_v45 = vld [vmem:[%s6993_s1 + $0x680] ss:$8 sps:$4 sm:$0xff]  }
  0x2f   :  { %2766 = vmatpush1.bf16.msra.mxu1 %v4688_v46  ;;  %v4776_v46 = vld [vmem:[%s6993_s1 + $0x194] ss:$8 sps:$4 sm:$0xff]  }
  0x30   :  { %3031 = vmatpush1.bf16.msra.mxu0 %v4689_v47  ;;  %2767 = vmatprep.subr.bf16.mxu1 %v4690_v49  ;;  %v4779_v47 = vld [vmem:[%s6993_s1 + $0x694] ss:$8 sps:$4 sm:$0xff]   ;;  %v4777_v49 = vld [vmem:[%s6993_s1 + $0x690] ss:$8 sps:$4 sm:$0xff]  }
  0x31   :  { %3032 = vmatprep.subr.bf16.mxu0 %v4692_v50  ;;  %v4782_v50 = vld [vmem:[%s6993_s1 + $0x1a4] ss:$8 sps:$4 sm:$0xff]  }
  0x33   :  { %2768 = vmatpush1.bf16.msra.mxu1 %v4694_v52  ;;  %v4780_v52 = vld [vmem:[%s6993_s1 + $0x1a0] ss:$8 sps:$4 sm:$0xff]  }
  0x34   :  { %3033 = vmatpush1.bf16.msra.mxu0 %v4695_v53  ;;  %2769 = vmatprep.subr.bf16.mxu1 %v4696_v54  ;;  %v4783_v53 = vld [vmem:[%s6993_s1 + $0x6a0] ss:$8 sps:$4 sm:$0xff]   ;;  %v4788_v54 = vld [vmem:[%s6993_s1 + $0x1b4] ss:$8 sps:$4 sm:$0xff]  }
  0x35   :  { %3034 = vmatprep.subr.bf16.mxu0 %v4698_v55  ;;  %v4791_v55 = vld [vmem:[%s6993_s1 + $0x6b4] ss:$8 sps:$4 sm:$0xff]  }
  0x37   :  { %2770 = vmatpush1.bf16.msra.mxu1 %v4700_v56  ;;  %v4786_v56 = vld [vmem:[%s6993_s1 + $0x1b0] ss:$8 sps:$4 sm:$0xff]  }
  0x38   :  { %3035 = vmatpush1.bf16.msra.mxu0 %v4701_v57  ;;  %2771 = vmatprep.subr.bf16.mxu1 %v4702_v58  ;;  %v4789_v57 = vld [vmem:[%s6993_s1 + $0x6b0] ss:$8 sps:$4 sm:$0xff]   ;;  %v4794_v58 = vld [vmem:[%s6993_s1 + $0x1c4] ss:$8 sps:$4 sm:$0xff]  }
  0x39   :  { %3036 = vmatprep.subr.bf16.mxu0 %v4704_v59  ;;  %v4797_v59 = vld [vmem:[%s6993_s1 + $0x6c4] ss:$8 sps:$4 sm:$0xff]  }
  0x3b   :  { %2772 = vmatpush1.bf16.msra.mxu1 %v4706_v60  ;;  %v4792_v60 = vld [vmem:[%s6993_s1 + $0x1c0] ss:$8 sps:$4 sm:$0xff]  }
  0x3c   :  { %3037 = vmatpush1.bf16.msra.mxu0 %v4707_v61  ;;  %2773 = vmatprep.subr.bf16.mxu1 %v4708_v62  ;;  %v4795_v61 = vld [vmem:[%s6993_s1 + $0x6c0] ss:$8 sps:$4 sm:$0xff]   ;;  %v4800_v62 = vld [vmem:[%s6993_s1 + $0x1d4] ss:$8 sps:$4 sm:$0xff]  }
  0x3d   :  { %3038 = vmatprep.subr.bf16.mxu0 %v4710_v63  ;;  %v4803_v63 = vld [vmem:[%s6993_s1 + $0x6d4] ss:$8 sps:$4 sm:$0xff]  }
  0x3f   :  { %2774 = vmatpush1.bf16.msra.mxu1 %v4712_v0  ;;  %v4798_v0 = vld [vmem:[%s6993_s1 + $0x1d0] ss:$8 sps:$4 sm:$0xff]  }
  0x40   :  { %3039 = vmatpush1.bf16.msra.mxu0 %v4713_v1  ;;  %2796 = vmatprep.subr.bf16.mxu1 %v4719_v2  ;;  %v4801_v1 = vld [vmem:[%s6993_s1 + $0x6d0] ss:$8 sps:$4 sm:$0xff]   ;;  %v4808_v2 = vld [vmem:[%s6993_s1 + $0x1e4] ss:$8 sps:$4 sm:$0xff]  }
  0x41   :  { %3061 = vmatprep.subr.bf16.mxu0 %v4725_v3  ;;  %v4813_v3 = vld [vmem:[%s6993_s1 + $0x6e4] ss:$8 sps:$4 sm:$0xff]  }
  0x42   :  { %2776 = vmatmul.mubr.bf16.vlgmr.msra.gmra.mrb[0].mxu1 %v4714_v4  ;;  %v4806_v4 = vld [vmem:[%s6993_s1 + $0x1e0] ss:$8 sps:$4 sm:$0xff]  }
  0x43   :  { %3041 = vmatmul.mubr.bf16.vlgmr.msra.gmra.mrb[0].mxu0 %v4720_v6  ;;  %2797 = vmatpush1.bf16.msra.mxu1 %v4717_v5  ;;  %v4811_v5 = vld [vmem:[%s6993_s1 + $0x6e0] ss:$8 sps:$4 sm:$0xff]   ;;  %v4818_v6 = vld [vmem:[%s6993_s1 + $0x1f4] ss:$8 sps:$4 sm:$0xff]  }
  0x44   :  { %3062 = vmatpush1.bf16.msra.mxu0 %v4723_v7  ;;  %2798 = vmatprep.subr.bf16.mxu1 %v4728_v8  ;;  %v4821_v7 = vld [vmem:[%s6993_s1 + $0x6f4] ss:$8 sps:$4 sm:$0xff]   ;;  %v4816_v8 = vld [vmem:[%s6993_s1 + $0x1f0] ss:$8 sps:$4 sm:$0xff]  }
  0x45   :  { %3063 = vmatprep.subr.bf16.mxu0 %v4731_v9  ;;  %2785 = vmatprep.mubr.bf16.mxu1 %v4804_v28  ;;  %v4819_v9 = vld [vmem:[%s6993_s1 + $0x6f0] ss:$8 sps:$4 sm:$0xff]   ;;  %v4848_v28 = vld [vmem:[%s6993_s1 + $0x234] ss:$8 sps:$4 sm:$0xff]  }
  0x46   :  { %3050 = vmatprep.mubr.bf16.mxu0 %v4809_v31  ;;  %v4849_v31 = vld [vmem:[%s6993_s1 + $0x730] ss:$8 sps:$4 sm:$0xff]  }
  0x47   :  { %2799 = vmatpush1.bf16.msra.mxu1 %v4726_v10  ;;  %v4827_v10 = vld [vmem:[%s6993_s1 + $0x204] ss:$8 sps:$4 sm:$0xff]  }
  0x48   :  { %3064 = vmatpush1.bf16.msra.mxu0 %v4729_v11  ;;  %2800 = vmatprep.subr.bf16.mxu1 %v4734_v12  ;;  %v4833_v11 = vld [vmem:[%s6993_s1 + $0x704] ss:$8 sps:$4 sm:$0xff]  }
  0x49   :  { %3065 = vmatprep.subr.bf16.mxu0 %v4737_v13  ;;  %v4822_v12 = vld [vmem:[%s6994_s0 + $0x8] ss:$100 sps:$4 sm:$0xff]  }
  0x4a   :  { %2786 = vmatmul.mubr.bf16.gmra.mrb[4].mxu1 %v4814_v34  ;;  %v4825_v13 = vld [vmem:[%s6993_s1 + $0x200] ss:$8 sps:$4 sm:$0xff]   ;;  %v4857_v34 = vld [vmem:[%s6993_s1 + $0x744] ss:$8 sps:$4 sm:$0xff]  }
  0x4b   :  { %2801 = vmatpush1.bf16.msra.mxu1 %v4732_v14  ;;  %3051 = vmatmul.mubr.bf16.gmra.mrb[4].mxu0 %v4815_v35  ;;  %v4828_v14 = vld [vmem:[%s6994_s0 + $0x30] ss:$100 sps:$4 sm:$0xff]   ;;  %v4938_v35 = vld [vmem:[%s6994_s0 + $0x3c] ss:$100 sps:$4 sm:$0xff]  }
  0x4c   :  { %3066 = vmatpush1.bf16.msra.mxu0 %v4735_v15  ;;  %2802 = vmatprep.subr.bf16.mxu1 %v4740_v16  ;;  %v4831_v15 = vld [vmem:[%s6993_s1 + $0x700] ss:$8 sps:$4 sm:$0xff]   ;;  %v4836_v16 = vld [vmem:[%s6993_s1 + $0x214] ss:$8 sps:$4 sm:$0xff]  }
  0x4d   :  { %3067 = vmatprep.subr.bf16.mxu0 %v4743_v17  ;;  %2828 = vmatprep.mubr.bf16.mxu1 %v4824_v40  ;;  %v4839_v17 = vld [vmem:[%s6993_s1 + $0x714] ss:$8 sps:$4 sm:$0xff]   ;;  %v4858_v40 = vld [vmem:[%s6993_s1 + $0x250] ss:$8 sps:$4 sm:$0xff]  }
  0x4e   :  { %3093 = vmatprep.mubr.bf16.mxu0 %v4830_v43  ;;  %v4869_v43 = vld [vmem:[%s6993_s1 + $0x764] ss:$8 sps:$4 sm:$0xff]  }
  0x4f   :  { %2803 = vmatpush1.bf16.msra.mxu1 %v4738_v18  ;;  %v4834_v18 = vld [vmem:[%s6993_s1 + $0x210] ss:$8 sps:$4 sm:$0xff]  }
  0x50   :  { %3068 = vmatpush1.bf16.msra.mxu0 %v4741_v19  ;;  %2804 = vmatprep.subr.bf16.mxu1 %v4746_v20  ;;  %v4837_v19 = vld [vmem:[%s6993_s1 + $0x710] ss:$8 sps:$4 sm:$0xff]  }
  0x51   :  { %3069 = vmatprep.subr.bf16.mxu0 %v4749_v21  ;;  %v4912_v20 = vld [vmem:[%s6994_s0 + $0xd4] ss:$100 sps:$4 sm:$0xff]   ;;  %v4842_v21 = vld [vmem:[%s6993_s1 + $0x224] ss:$8 sps:$4 sm:$0xff]  }
  0x53   :  { %2805 = vmatpush1.bf16.msra.mxu1 %v4744_v22  ;;  %v4845_v22 = vld [vmem:[%s6993_s1 + $0x724] ss:$8 sps:$4 sm:$0xff]  }
  0x54   :  { %3070 = vmatpush1.bf16.msra.mxu0 %v4747_v23  ;;  %2806 = vmatprep.subr.bf16.mxu1 %v4752_v24  ;;  %v4917_v23 = vld [vmem:[%s6994_s0 + $0xfc] ss:$100 sps:$4 sm:$0xff]  }
  0x55   :  { %3071 = vmatprep.subr.bf16.mxu0 %v4755_v25  ;;  %v4840_v24 = vld [vmem:[%s6993_s1 + $0x220] ss:$8 sps:$4 sm:$0xff]  }
  0x56   :  { %v4843_v25 = vld [vmem:[%s6993_s1 + $0x720] ss:$8 sps:$4 sm:$0xff]  }
  0x57   :  { %2807 = vmatpush1.bf16.msra.mxu1 %v4750_v26  ;;  %v4922_v26 = vld [vmem:[%s6994_s0 + $0xd0] ss:$100 sps:$4 sm:$0xff]  }
  0x58   :  { %3072 = vmatpush1.bf16.msra.mxu0 %v4753_v27  ;;  %2808 = vmatprep.subr.bf16.mxu1 %v4758_v29  ;;  %v4923_v27 = vld [vmem:[%s6994_s0 + $0xf8] ss:$100 sps:$4 sm:$0xff]  }
  0x59   :  { %3073 = vmatprep.subr.bf16.mxu0 %v4761_v30  ;;  %v4851_v29 = vld [vmem:[%s6993_s1 + $0x734] ss:$8 sps:$4 sm:$0xff]   ;;  %v4846_v30 = vld [vmem:[%s6993_s1 + $0x230] ss:$8 sps:$4 sm:$0xff]  }
  0x5b   :  { %2809 = vmatpush1.bf16.msra.mxu1 %v4756_v32  ;;  %v4932_v32 = vld [vmem:[%s6994_s0 + $0x14] ss:$100 sps:$4 sm:$0xff]  }
  0x5c   :  { %3074 = vmatpush1.bf16.msra.mxu0 %v4759_v33  ;;  %2810 = vmatprep.subr.bf16.mxu1 %v4764_v36  ;;  %v4854_v33 = vld [vmem:[%s6993_s1 + $0x244] ss:$8 sps:$4 sm:$0xff]   ;;  %v4852_v36 = vld [vmem:[%s6993_s1 + $0x240] ss:$8 sps:$4 sm:$0xff]  }
  0x5d   :  { %3075 = vmatprep.subr.bf16.mxu0 %v4767_v37  ;;  %v4855_v37 = vld [vmem:[%s6993_s1 + $0x740] ss:$8 sps:$4 sm:$0xff]  }
  0x5f   :  { %2811 = vmatpush1.bf16.msra.mxu1 %v4762_v38  ;;  %v4860_v38 = vld [vmem:[%s6993_s1 + $0x254] ss:$8 sps:$4 sm:$0xff]  }
  0x60   :  { %3076 = vmatpush1.bf16.msra.mxu0 %v4765_v39  ;;  %2812 = vmatprep.subr.bf16.mxu1 %v4770_v41  ;;  %v4863_v39 = vld [vmem:[%s6993_s1 + $0x754] ss:$8 sps:$4 sm:$0xff]   ;;  %v4861_v41 = vld [vmem:[%s6993_s1 + $0x750] ss:$8 sps:$4 sm:$0xff]  }
  0x61   :  { %3077 = vmatprep.subr.bf16.mxu0 %v4773_v42  ;;  %v4866_v42 = vld [vmem:[%s6993_s1 + $0x264] ss:$8 sps:$4 sm:$0xff]  }
  0x63   :  { %2813 = vmatpush1.bf16.msra.mxu1 %v4768_v44  ;;  %v4864_v44 = vld [vmem:[%s6993_s1 + $0x260] ss:$8 sps:$4 sm:$0xff]  }
  0x64   :  { %3078 = vmatpush1.bf16.msra.mxu0 %v4771_v45  ;;  %2814 = vmatprep.subr.bf16.mxu1 %v4776_v46  ;;  %v4867_v45 = vld [vmem:[%s6993_s1 + $0x760] ss:$8 sps:$4 sm:$0xff]   ;;  %v4872_v46 = vld [vmem:[%s6993_s1 + $0x274] ss:$8 sps:$4 sm:$0xff]  }
  0x65   :  { %3079 = vmatprep.subr.bf16.mxu0 %v4779_v47  ;;  %v4875_v47 = vld [vmem:[%s6993_s1 + $0x774] ss:$8 sps:$4 sm:$0xff]  }
  0x67   :  { %2815 = vmatpush1.bf16.msra.mxu1 %v4774_v48  ;;  %v4870_v48 = vld [vmem:[%s6993_s1 + $0x270] ss:$8 sps:$4 sm:$0xff]  }
  0x68   :  { %3080 = vmatpush1.bf16.msra.mxu0 %v4777_v49  ;;  %2816 = vmatprep.subr.bf16.mxu1 %v4782_v50  ;;  %v4873_v49 = vld [vmem:[%s6993_s1 + $0x770] ss:$8 sps:$4 sm:$0xff]   ;;  %v4878_v50 = vld [vmem:[%s6993_s1 + $0x284] ss:$8 sps:$4 sm:$0xff]  }
  0x69   :  { %3081 = vmatprep.subr.bf16.mxu0 %v4785_v51  ;;  %v4881_v51 = vld [vmem:[%s6993_s1 + $0x784] ss:$8 sps:$4 sm:$0xff]  }
  0x6b   :  { %2817 = vmatpush1.bf16.msra.mxu1 %v4780_v52  ;;  %v4876_v52 = vld [vmem:[%s6993_s1 + $0x280] ss:$8 sps:$4 sm:$0xff]  }
  0x6c   :  { %3082 = vmatpush1.bf16.msra.mxu0 %v4783_v53  ;;  %2818 = vmatprep.subr.bf16.mxu1 %v4788_v54  ;;  %v4879_v53 = vld [vmem:[%s6993_s1 + $0x780] ss:$8 sps:$4 sm:$0xff]   ;;  %v4884_v54 = vld [vmem:[%s6993_s1 + $0x294] ss:$8 sps:$4 sm:$0xff]  }
  0x6d   :  { %3083 = vmatprep.subr.bf16.mxu0 %v4791_v55  ;;  %v4887_v55 = vld [vmem:[%s6993_s1 + $0x794] ss:$8 sps:$4 sm:$0xff]  }
  0x6f   :  { %2819 = vmatpush1.bf16.msra.mxu1 %v4786_v56  ;;  %v4882_v56 = vld [vmem:[%s6993_s1 + $0x290] ss:$8 sps:$4 sm:$0xff]  }
  0x70   :  { %3084 = vmatpush1.bf16.msra.mxu0 %v4789_v57  ;;  %2820 = vmatprep.subr.bf16.mxu1 %v4794_v58  ;;  %v4885_v57 = vld [vmem:[%s6993_s1 + $0x790] ss:$8 sps:$4 sm:$0xff]   ;;  %v4890_v58 = vld [vmem:[%s6993_s1 + $0x2a4] ss:$8 sps:$4 sm:$0xff]  }
  0x71   :  { %3085 = vmatprep.subr.bf16.mxu0 %v4797_v59  ;;  %v4893_v59 = vld [vmem:[%s6993_s1 + $0x7a4] ss:$8 sps:$4 sm:$0xff]  }
  0x73   :  { %2821 = vmatpush1.bf16.msra.mxu1 %v4792_v60  ;;  %v4888_v60 = vld [vmem:[%s6993_s1 + $0x2a0] ss:$8 sps:$4 sm:$0xff]  }
  0x74   :  { %3086 = vmatpush1.bf16.msra.mxu0 %v4795_v61  ;;  %2822 = vmatprep.subr.bf16.mxu1 %v4800_v62  ;;  %v4891_v61 = vld [vmem:[%s6993_s1 + $0x7a0] ss:$8 sps:$4 sm:$0xff]   ;;  %v4896_v62 = vld [vmem:[%s6993_s1 + $0x2b4] ss:$8 sps:$4 sm:$0xff]  }
  0x75   :  { %3087 = vmatprep.subr.bf16.mxu0 %v4803_v63  ;;  %v4899_v63 = vld [vmem:[%s6993_s1 + $0x7b4] ss:$8 sps:$4 sm:$0xff]  }
  0x77   :  { %2823 = vmatpush1.bf16.msra.mxu1 %v4798_v0  ;;  %v4894_v0 = vld [vmem:[%s6993_s1 + $0x2b0] ss:$8 sps:$4 sm:$0xff]  }
  0x78   :  { %3088 = vmatpush1.bf16.msra.mxu0 %v4801_v1  ;;  %2824 = vmatprep.subr.bf16.mxu1 %v4808_v2  ;;  %v4897_v1 = vld [vmem:[%s6993_s1 + $0x7b0] ss:$8 sps:$4 sm:$0xff]   ;;  %v4902_v2 = vld [vmem:[%s6993_s1 + $0x2c4] ss:$8 sps:$4 sm:$0xff]  }
  0x79   :  { %3089 = vmatprep.subr.bf16.mxu0 %v4813_v3  ;;  %v4905_v3 = vld [vmem:[%s6993_s1 + $0x7c4] ss:$8 sps:$4 sm:$0xff]  }
  0x7b   :  { %2825 = vmatpush1.bf16.msra.mxu1 %v4806_v4  ;;  %v4900_v4 = vld [vmem:[%s6993_s1 + $0x2c0] ss:$8 sps:$4 sm:$0xff]  }
  0x7c   :  { %3090 = vmatpush1.bf16.msra.mxu0 %v4811_v5  ;;  %2826 = vmatprep.subr.bf16.mxu1 %v4818_v6  ;;  %v4903_v5 = vld [vmem:[%s6993_s1 + $0x7c0] ss:$8 sps:$4 sm:$0xff]   ;;  %v4908_v6 = vld [vmem:[%s6993_s1 + $0x2d4] ss:$8 sps:$4 sm:$0xff]  }
  0x7d   :  { %3091 = vmatprep.subr.bf16.mxu0 %v4821_v7  ;;  %v4911_v7 = vld [vmem:[%s6993_s1 + $0x7d4] ss:$8 sps:$4 sm:$0xff]  }
  0x7f   :  { %2827 = vmatpush1.bf16.msra.mxu1 %v4816_v8  ;;  %v4906_v8 = vld [vmem:[%s6993_s1 + $0x2d0] ss:$8 sps:$4 sm:$0xff]  }
  0x80   :  { %3092 = vmatpush1.bf16.msra.mxu0 %v4819_v9  ;;  %2849 = vmatprep.subr.bf16.mxu1 %v4827_v10  ;;  %v4909_v9 = vld [vmem:[%s6993_s1 + $0x7d0] ss:$8 sps:$4 sm:$0xff]   ;;  %v4916_v10 = vld [vmem:[%s6993_s1 + $0x2e4] ss:$8 sps:$4 sm:$0xff]  }
  0x81   :  { %3114 = vmatprep.subr.bf16.mxu0 %v4833_v11  ;;  %v4921_v11 = vld [vmem:[%s6993_s1 + $0x7e4] ss:$8 sps:$4 sm:$0xff]  }
  0x82   :  { %2829 = vmatmul.mubr.bf16.vlgmr.msra.gmra.mrb[0].mxu1 %v4822_v12  ;;  %v4914_v12 = vld [vmem:[%s6993_s1 + $0x2e0] ss:$8 sps:$4 sm:$0xff]  }
  0x83   :  { %3094 = vmatmul.mubr.bf16.vlgmr.msra.gmra.mrb[0].mxu0 %v4828_v14  ;;  %2850 = vmatpush1.bf16.msra.mxu1 %v4825_v13  ;;  %v4919_v13 = vld [vmem:[%s6993_s1 + $0x7e0] ss:$8 sps:$4 sm:$0xff]   ;;  %v4926_v14 = vld [vmem:[%s6993_s1 + $0x2f4] ss:$8 sps:$4 sm:$0xff]  }
  0x84   :  { %3115 = vmatpush1.bf16.msra.mxu0 %v4831_v15  ;;  %2851 = vmatprep.subr.bf16.mxu1 %v4836_v16  ;;  %v4929_v15 = vld [vmem:[%s6993_s1 + $0x7f4] ss:$8 sps:$4 sm:$0xff]   ;;  %v4924_v16 = vld [vmem:[%s6993_s1 + $0x2f0] ss:$8 sps:$4 sm:$0xff]  }
  0x85   :  { %3116 = vmatprep.subr.bf16.mxu0 %v4839_v17  ;;  %2838 = vmatprep.mubr.bf16.mxu1 %v4912_v20  ;;  %v4927_v17 = vld [vmem:[%s6993_s1 + $0x7f0] ss:$8 sps:$4 sm:$0xff]  }
  0x86   :  { %3103 = vmatprep.mubr.bf16.mxu0 %v4917_v23  ;;  %v4930_v20 = vld [vmem:[%s6994_s0 + $0x10] ss:$100 sps:$4 sm:$0xff]   ;;  %v4939_v23 = vld [vmem:[%s6993_s1 + $0x800] ss:$8 sps:$4 sm:$0xff]  }
  0x87   :  { %2852 = vmatpush1.bf16.msra.mxu1 %v4834_v18  ;;  %v4935_v18 = vld [vmem:[%s6993_s1 + $0x304] ss:$8 sps:$4 sm:$0xff]  }
  0x88   :  { %3117 = vmatpush1.bf16.msra.mxu0 %v4837_v19  ;;  %2853 = vmatprep.subr.bf16.mxu1 %v4842_v21  ;;  %v4941_v19 = vld [vmem:[%s6993_s1 + $0x804] ss:$8 sps:$4 sm:$0xff]   ;;  %v4933_v21 = vld [vmem:[%s6993_s1 + $0x300] ss:$8 sps:$4 sm:$0xff]  }
  0x89   :  { %3118 = vmatprep.subr.bf16.mxu0 %v4845_v22  ;;  %v4936_v22 = vld [vmem:[%s6994_s0 + $0x38] ss:$100 sps:$4 sm:$0xff]  }
  0x8a   :  { %2839 = vmatmul.mubr.bf16.gmra.mrb[4].mxu1 %v4922_v26  ;;  %v5020_v26 = vld [vmem:[%s6994_s0 + $0xdc] ss:$100 sps:$4 sm:$0xff]  }
  0x8b   :  { %3104 = vmatmul.mubr.bf16.gmra.mrb[4].mxu0 %v4923_v27  ;;  %2854 = vmatpush1.bf16.msra.mxu1 %v4840_v24  ;;  %v4944_v24 = vld [vmem:[%s6993_s1 + $0x314] ss:$8 sps:$4 sm:$0xff]   ;;  %v5025_v27 = vld [vmem:[%s6994_s0 + $0x104] ss:$100 sps:$4 sm:$0xff]  }
  0x8c   :  { %3119 = vmatpush1.bf16.msra.mxu0 %v4843_v25  ;;  %2855 = vmatprep.subr.bf16.mxu1 %v4848_v28  ;;  %v4947_v25 = vld [vmem:[%s6993_s1 + $0x814] ss:$8 sps:$4 sm:$0xff]   ;;  %v4942_v28 = vld [vmem:[%s6993_s1 + $0x310] ss:$8 sps:$4 sm:$0xff]  }
  0x8d   :  { %3120 = vmatprep.subr.bf16.mxu0 %v4851_v29  ;;  %2881 = vmatprep.mubr.bf16.mxu1 %v4932_v32  ;;  %v4945_v29 = vld [vmem:[%s6993_s1 + $0x810] ss:$8 sps:$4 sm:$0xff]   ;;  %v4948_v32 = vld [vmem:[%s6993_s1 + $0x320] ss:$8 sps:$4 sm:$0xff]  }
  0x8e   :  { %3146 = vmatprep.mubr.bf16.mxu0 %v4938_v35  ;;  %v5031_v35 = vld [vmem:[%s6994_s0 + $0x100] ss:$100 sps:$4 sm:$0xff]  }
  0x8f   :  { %2856 = vmatpush1.bf16.msra.mxu1 %v4846_v30  ;;  %v4950_v30 = vld [vmem:[%s6993_s1 + $0x324] ss:$8 sps:$4 sm:$0xff]  }
  0x90   :  { %3121 = vmatpush1.bf16.msra.mxu0 %v4849_v31  ;;  %2857 = vmatprep.subr.bf16.mxu1 %v4854_v33  ;;  %v4953_v31 = vld [vmem:[%s6993_s1 + $0x824] ss:$8 sps:$4 sm:$0xff]   ;;  %v4951_v33 = vld [vmem:[%s6993_s1 + $0x820] ss:$8 sps:$4 sm:$0xff]  }
  0x91   :  { %3122 = vmatprep.subr.bf16.mxu0 %v4857_v34  ;;  %v5030_v34 = vld [vmem:[%s6994_s0 + $0xd8] ss:$100 sps:$4 sm:$0xff]  }
  0x93   :  { %2858 = vmatpush1.bf16.msra.mxu1 %v4852_v36  ;;  %v4956_v36 = vld [vmem:[%s6993_s1 + $0x334] ss:$8 sps:$4 sm:$0xff]  }
  0x94   :  { %3123 = vmatpush1.bf16.msra.mxu0 %v4855_v37  ;;  %2859 = vmatprep.subr.bf16.mxu1 %v4860_v38  ;;  %v4959_v37 = vld [vmem:[%s6993_s1 + $0x834] ss:$8 sps:$4 sm:$0xff]  }
  0x95   :  { %3124 = vmatprep.subr.bf16.mxu0 %v4863_v39  ;;  %v5040_v38 = vld [vmem:[%s6994_s0 + $0x1c] ss:$100 sps:$4 sm:$0xff]   ;;  %v5046_v39 = vld [vmem:[%s6994_s0 + $0x44] ss:$100 sps:$4 sm:$0xff]  }
  0x97   :  { %2860 = vmatpush1.bf16.msra.mxu1 %v4858_v40  ;;  %v4954_v40 = vld [vmem:[%s6993_s1 + $0x330] ss:$8 sps:$4 sm:$0xff]  }
  0x98   :  { %3125 = vmatpush1.bf16.msra.mxu0 %v4861_v41  ;;  %2861 = vmatprep.subr.bf16.mxu1 %v4866_v42  ;;  %v4957_v41 = vld [vmem:[%s6993_s1 + $0x830] ss:$8 sps:$4 sm:$0xff]   ;;  %v4962_v42 = vld [vmem:[%s6993_s1 + $0x344] ss:$8 sps:$4 sm:$0xff]  }
  0x99   :  { %3126 = vmatprep.subr.bf16.mxu0 %v4869_v43  ;;  %v4965_v43 = vld [vmem:[%s6993_s1 + $0x844] ss:$8 sps:$4 sm:$0xff]  }
  0x9b   :  { %2862 = vmatpush1.bf16.msra.mxu1 %v4864_v44  ;;  %v4960_v44 = vld [vmem:[%s6993_s1 + $0x340] ss:$8 sps:$4 sm:$0xff]  }
  0x9c   :  { %3127 = vmatpush1.bf16.msra.mxu0 %v4867_v45  ;;  %2863 = vmatprep.subr.bf16.mxu1 %v4872_v46  ;;  %v4963_v45 = vld [vmem:[%s6993_s1 + $0x840] ss:$8 sps:$4 sm:$0xff]   ;;  %v4968_v46 = vld [vmem:[%s6993_s1 + $0x354] ss:$8 sps:$4 sm:$0xff]  }
  0x9d   :  { %3128 = vmatprep.subr.bf16.mxu0 %v4875_v47  ;;  %v4971_v47 = vld [vmem:[%s6993_s1 + $0x854] ss:$8 sps:$4 sm:$0xff]  }
  0x9f   :  { %2864 = vmatpush1.bf16.msra.mxu1 %v4870_v48  ;;  %v4966_v48 = vld [vmem:[%s6993_s1 + $0x350] ss:$8 sps:$4 sm:$0xff]  }
  0xa0   :  { %3129 = vmatpush1.bf16.msra.mxu0 %v4873_v49  ;;  %2865 = vmatprep.subr.bf16.mxu1 %v4878_v50  ;;  %v4969_v49 = vld [vmem:[%s6993_s1 + $0x850] ss:$8 sps:$4 sm:$0xff]   ;;  %v4974_v50 = vld [vmem:[%s6993_s1 + $0x364] ss:$8 sps:$4 sm:$0xff]  }
  0xa1   :  { %3130 = vmatprep.subr.bf16.mxu0 %v4881_v51  ;;  %v4977_v51 = vld [vmem:[%s6993_s1 + $0x864] ss:$8 sps:$4 sm:$0xff]  }
  0xa3   :  { %2866 = vmatpush1.bf16.msra.mxu1 %v4876_v52  ;;  %v4972_v52 = vld [vmem:[%s6993_s1 + $0x360] ss:$8 sps:$4 sm:$0xff]  }
  0xa4   :  { %3131 = vmatpush1.bf16.msra.mxu0 %v4879_v53  ;;  %2867 = vmatprep.subr.bf16.mxu1 %v4884_v54  ;;  %v4975_v53 = vld [vmem:[%s6993_s1 + $0x860] ss:$8 sps:$4 sm:$0xff]   ;;  %v4980_v54 = vld [vmem:[%s6993_s1 + $0x374] ss:$8 sps:$4 sm:$0xff]  }
  0xa5   :  { %3132 = vmatprep.subr.bf16.mxu0 %v4887_v55  ;;  %v4983_v55 = vld [vmem:[%s6993_s1 + $0x874] ss:$8 sps:$4 sm:$0xff]  }
  0xa7   :  { %2868 = vmatpush1.bf16.msra.mxu1 %v4882_v56  ;;  %v4978_v56 = vld [vmem:[%s6993_s1 + $0x370] ss:$8 sps:$4 sm:$0xff]  }
  0xa8   :  { %3133 = vmatpush1.bf16.msra.mxu0 %v4885_v57  ;;  %2869 = vmatprep.subr.bf16.mxu1 %v4890_v58  ;;  %v4981_v57 = vld [vmem:[%s6993_s1 + $0x870] ss:$8 sps:$4 sm:$0xff]   ;;  %v4986_v58 = vld [vmem:[%s6993_s1 + $0x384] ss:$8 sps:$4 sm:$0xff]  }
  0xa9   :  { %3134 = vmatprep.subr.bf16.mxu0 %v4893_v59  ;;  %v4989_v59 = vld [vmem:[%s6993_s1 + $0x884] ss:$8 sps:$4 sm:$0xff]  }
  0xab   :  { %2870 = vmatpush1.bf16.msra.mxu1 %v4888_v60  ;;  %v4984_v60 = vld [vmem:[%s6993_s1 + $0x380] ss:$8 sps:$4 sm:$0xff]  }
  0xac   :  { %3135 = vmatpush1.bf16.msra.mxu0 %v4891_v61  ;;  %2871 = vmatprep.subr.bf16.mxu1 %v4896_v62  ;;  %v4987_v61 = vld [vmem:[%s6993_s1 + $0x880] ss:$8 sps:$4 sm:$0xff]   ;;  %v4992_v62 = vld [vmem:[%s6993_s1 + $0x394] ss:$8 sps:$4 sm:$0xff]  }
  0xad   :  { %3136 = vmatprep.subr.bf16.mxu0 %v4899_v63  ;;  %v4995_v63 = vld [vmem:[%s6993_s1 + $0x894] ss:$8 sps:$4 sm:$0xff]  }
  0xaf   :  { %2872 = vmatpush1.bf16.msra.mxu1 %v4894_v0  ;;  %v4990_v0 = vld [vmem:[%s6993_s1 + $0x390] ss:$8 sps:$4 sm:$0xff]  }
  0xb0   :  { %3137 = vmatpush1.bf16.msra.mxu0 %v4897_v1  ;;  %2873 = vmatprep.subr.bf16.mxu1 %v4902_v2  ;;  %v4993_v1 = vld [vmem:[%s6993_s1 + $0x890] ss:$8 sps:$4 sm:$0xff]   ;;  %v4998_v2 = vld [vmem:[%s6993_s1 + $0x3a4] ss:$8 sps:$4 sm:$0xff]  }
  0xb1   :  { %3138 = vmatprep.subr.bf16.mxu0 %v4905_v3  ;;  %v5001_v3 = vld [vmem:[%s6993_s1 + $0x8a4] ss:$8 sps:$4 sm:$0xff]  }
  0xb3   :  { %2874 = vmatpush1.bf16.msra.mxu1 %v4900_v4  ;;  %v4996_v4 = vld [vmem:[%s6993_s1 + $0x3a0] ss:$8 sps:$4 sm:$0xff]  }
  0xb4   :  { %3139 = vmatpush1.bf16.msra.mxu0 %v4903_v5  ;;  %2875 = vmatprep.subr.bf16.mxu1 %v4908_v6  ;;  %v4999_v5 = vld [vmem:[%s6993_s1 + $0x8a0] ss:$8 sps:$4 sm:$0xff]   ;;  %v5004_v6 = vld [vmem:[%s6993_s1 + $0x3b4] ss:$8 sps:$4 sm:$0xff]  }
  0xb5   :  { %3140 = vmatprep.subr.bf16.mxu0 %v4911_v7  ;;  %v5007_v7 = vld [vmem:[%s6993_s1 + $0x8b4] ss:$8 sps:$4 sm:$0xff]  }
  0xb7   :  { %2876 = vmatpush1.bf16.msra.mxu1 %v4906_v8  ;;  %v5002_v8 = vld [vmem:[%s6993_s1 + $0x3b0] ss:$8 sps:$4 sm:$0xff]  }
  0xb8   :  { %3141 = vmatpush1.bf16.msra.mxu0 %v4909_v9  ;;  %2877 = vmatprep.subr.bf16.mxu1 %v4916_v10  ;;  %v5005_v9 = vld [vmem:[%s6993_s1 + $0x8b0] ss:$8 sps:$4 sm:$0xff]   ;;  %v5010_v10 = vld [vmem:[%s6993_s1 + $0x3c4] ss:$8 sps:$4 sm:$0xff]  }
  0xb9   :  { %3142 = vmatprep.subr.bf16.mxu0 %v4921_v11  ;;  %v5013_v11 = vld [vmem:[%s6993_s1 + $0x8c4] ss:$8 sps:$4 sm:$0xff]  }
  0xbb   :  { %2878 = vmatpush1.bf16.msra.mxu1 %v4914_v12  ;;  %v5008_v12 = vld [vmem:[%s6993_s1 + $0x3c0] ss:$8 sps:$4 sm:$0xff]  }
  0xbc   :  { %3143 = vmatpush1.bf16.msra.mxu0 %v4919_v13  ;;  %2879 = vmatprep.subr.bf16.mxu1 %v4926_v14  ;;  %v5011_v13 = vld [vmem:[%s6993_s1 + $0x8c0] ss:$8 sps:$4 sm:$0xff]   ;;  %v5016_v14 = vld [vmem:[%s6993_s1 + $0x3d4] ss:$8 sps:$4 sm:$0xff]  }
  0xbd   :  { %3144 = vmatprep.subr.bf16.mxu0 %v4929_v15  ;;  %v5019_v15 = vld [vmem:[%s6993_s1 + $0x8d4] ss:$8 sps:$4 sm:$0xff]  }
  0xbf   :  { %2880 = vmatpush1.bf16.msra.mxu1 %v4924_v16  ;;  %v5014_v16 = vld [vmem:[%s6993_s1 + $0x3d0] ss:$8 sps:$4 sm:$0xff]  }
  0xc0   :  { %3145 = vmatpush1.bf16.msra.mxu0 %v4927_v17  ;;  %2902 = vmatprep.subr.bf16.mxu1 %v4935_v18  ;;  %v5017_v17 = vld [vmem:[%s6993_s1 + $0x8d0] ss:$8 sps:$4 sm:$0xff]   ;;  %v5024_v18 = vld [vmem:[%s6993_s1 + $0x3e4] ss:$8 sps:$4 sm:$0xff]  }
  0xc1   :  { %3167 = vmatprep.subr.bf16.mxu0 %v4941_v19  ;;  %v5029_v19 = vld [vmem:[%s6993_s1 + $0x8e4] ss:$8 sps:$4 sm:$0xff]  }
  0xc2   :  { %2882 = vmatmul.mubr.bf16.vlgmr.msra.gmra.mrb[0].mxu1 %v4930_v20  ;;  %v5022_v20 = vld [vmem:[%s6993_s1 + $0x3e0] ss:$8 sps:$4 sm:$0xff]  }
  0xc3   :  { %3147 = vmatmul.mubr.bf16.vlgmr.msra.gmra.mrb[0].mxu0 %v4936_v22  ;;  %2903 = vmatpush1.bf16.msra.mxu1 %v4933_v21  ;;  %v5027_v21 = vld [vmem:[%s6993_s1 + $0x8e0] ss:$8 sps:$4 sm:$0xff]   ;;  %v5034_v22 = vld [vmem:[%s6993_s1 + $0x3f4] ss:$8 sps:$4 sm:$0xff]  }
  0xc4   :  { %3168 = vmatpush1.bf16.msra.mxu0 %v4939_v23  ;;  %2904 = vmatprep.subr.bf16.mxu1 %v4944_v24  ;;  %v5037_v23 = vld [vmem:[%s6993_s1 + $0x8f4] ss:$8 sps:$4 sm:$0xff]   ;;  %v5032_v24 = vld [vmem:[%s6993_s1 + $0x3f0] ss:$8 sps:$4 sm:$0xff]  }
  0xc5   :  { %3169 = vmatprep.subr.bf16.mxu0 %v4947_v25  ;;  %2891 = vmatprep.mubr.bf16.mxu1 %v5020_v26  ;;  %v5035_v25 = vld [vmem:[%s6993_s1 + $0x8f0] ss:$8 sps:$4 sm:$0xff]   ;;  %v5043_v26 = vld [vmem:[%s6993_s1 + $0x404] ss:$8 sps:$4 sm:$0xff]  }
  0xc6   :  { %3156 = vmatprep.mubr.bf16.mxu0 %v5025_v27  ;;  %v5038_v27 = vld [vmem:[%s6994_s0 + $0x18] ss:$100 sps:$4 sm:$0xff]  }
  0xc7   :  { %2905 = vmatpush1.bf16.msra.mxu1 %v4942_v28  ;;  %v5049_v28 = vld [vmem:[%s6993_s1 + $0x904] ss:$8 sps:$4 sm:$0xff]  }
  0xc8   :  { %3170 = vmatpush1.bf16.msra.mxu0 %v4945_v29  ;;  %2906 = vmatprep.subr.bf16.mxu1 %v4950_v30  ;;  %v5041_v29 = vld [vmem:[%s6993_s1 + $0x400] ss:$8 sps:$4 sm:$0xff]  }
  0xc9   :  { %3171 = vmatprep.subr.bf16.mxu0 %v4953_v31  ;;  %v5044_v30 = vld [vmem:[%s6994_s0 + $0x40] ss:$100 sps:$4 sm:$0xff]  }
  0xca   :  { %2892 = vmatmul.mubr.bf16.gmra.mrb[4].mxu1 %v5030_v34  ;;  %v5047_v31 = vld [vmem:[%s6993_s1 + $0x900] ss:$8 sps:$4 sm:$0xff]  }
  0xcb   :  { %3157 = vmatmul.mubr.bf16.gmra.mrb[4].mxu0 %v5031_v35  ;;  %2907 = vmatpush1.bf16.msra.mxu1 %v4948_v32  ;;  %v5052_v32 = vld [vmem:[%s6993_s1 + $0x414] ss:$8 sps:$4 sm:$0xff]   ;;  %v5128_v34 = vld [vmem:[%s6994_s0 + $0xe4] ss:$100 sps:$4 sm:$0xff]   ;;  %v5134_v35 = vld [vmem:[%s6994_s0 + $0x10c] ss:$100 sps:$4 sm:$0xff]  }
  0xcc   :  { %3172 = vmatpush1.bf16.msra.mxu0 %v4951_v33  ;;  %2908 = vmatprep.subr.bf16.mxu1 %v4956_v36  ;;  %v5055_v33 = vld [vmem:[%s6993_s1 + $0x914] ss:$8 sps:$4 sm:$0xff]   ;;  %v5050_v36 = vld [vmem:[%s6993_s1 + $0x410] ss:$8 sps:$4 sm:$0xff]  }
  0xcd   :  { %3173 = vmatprep.subr.bf16.mxu0 %v4959_v37  ;;  %2934 = vmatprep.mubr.bf16.mxu1 %v5040_v38  ;;  %v5053_v37 = vld [vmem:[%s6993_s1 + $0x910] ss:$8 sps:$4 sm:$0xff]   ;;  %v5058_v38 = vld [vmem:[%s6993_s1 + $0x424] ss:$8 sps:$4 sm:$0xff]  }
  0xce   :  { %3199 = vmatprep.mubr.bf16.mxu0 %v5046_v39  ;;  %v5061_v39 = vld [vmem:[%s6993_s1 + $0x924] ss:$8 sps:$4 sm:$0xff]  }
  0xcf   :  { %2909 = vmatpush1.bf16.msra.mxu1 %v4954_v40  ;;  %v5056_v40 = vld [vmem:[%s6993_s1 + $0x420] ss:$8 sps:$4 sm:$0xff]  }
  0xd0   :  { %3174 = vmatpush1.bf16.msra.mxu0 %v4957_v41  ;;  %2910 = vmatprep.subr.bf16.mxu1 %v4962_v42  ;;  %v5059_v41 = vld [vmem:[%s6993_s1 + $0x920] ss:$8 sps:$4 sm:$0xff]  }
  0xd1   :  { %3175 = vmatprep.subr.bf16.mxu0 %v4965_v43  ;;  %v5130_v42 = vld [vmem:[%s6994_s0 + $0xe0] ss:$100 sps:$4 sm:$0xff]   ;;  %v5139_v43 = vld [vmem:[%s6994_s0 + $0x108] ss:$100 sps:$4 sm:$0xff]  }
  0xd3   :  { %2911 = vmatpush1.bf16.msra.mxu1 %v4960_v44  ;;  %v5064_v44 = vld [vmem:[%s6993_s1 + $0x434] ss:$8 sps:$4 sm:$0xff]  }
  0xd4   :  { %3176 = vmatpush1.bf16.msra.mxu0 %v4963_v45  ;;  %2912 = vmatprep.subr.bf16.mxu1 %v4968_v46  ;;  %v5067_v45 = vld [vmem:[%s6993_s1 + $0x934] ss:$8 sps:$4 sm:$0xff]   ;;  %v5062_v46 = vld [vmem:[%s6993_s1 + $0x430] ss:$8 sps:$4 sm:$0xff]  }
  0xd5   :  { %3177 = vmatprep.subr.bf16.mxu0 %v4971_v47  ;;  %v5065_v47 = vld [vmem:[%s6993_s1 + $0x930] ss:$8 sps:$4 sm:$0xff]  }
  0xd7   :  { %2913 = vmatpush1.bf16.msra.mxu1 %v4966_v48  ;;  %v5148_v48 = vld [vmem:[%s6994_s0 + $0x24] ss:$100 sps:$4 sm:$0xff]  }
  0xd8   :  { %3178 = vmatpush1.bf16.msra.mxu0 %v4969_v49  ;;  %2914 = vmatprep.subr.bf16.mxu1 %v4974_v50  ;;  %v5151_v49 = vld [vmem:[%s6994_s0 + $0x4c] ss:$100 sps:$4 sm:$0xff]  }
  0xd9   :  { %3179 = vmatprep.subr.bf16.mxu0 %v4977_v51  ;;  %v5070_v50 = vld [vmem:[%s6993_s1 + $0x444] ss:$8 sps:$4 sm:$0xff]  }
  0xda   :  { %v5073_v51 = vld [vmem:[%s6993_s1 + $0x944] ss:$8 sps:$4 sm:$0xff]  }
  0xdb   :  { %2915 = vmatpush1.bf16.msra.mxu1 %v4972_v52  ;;  %v5068_v52 = vld [vmem:[%s6993_s1 + $0x440] ss:$8 sps:$4 sm:$0xff]  }
  0xdc   :  { %3180 = vmatpush1.bf16.msra.mxu0 %v4975_v53  ;;  %2916 = vmatprep.subr.bf16.mxu1 %v4980_v54  ;;  %v5071_v53 = vld [vmem:[%s6993_s1 + $0x940] ss:$8 sps:$4 sm:$0xff]   ;;  %v5076_v54 = vld [vmem:[%s6993_s1 + $0x454] ss:$8 sps:$4 sm:$0xff]  }
  0xdd   :  { %3181 = vmatprep.subr.bf16.mxu0 %v4983_v55  ;;  %v5079_v55 = vld [vmem:[%s6993_s1 + $0x954] ss:$8 sps:$4 sm:$0xff]  }
  0xdf   :  { %2917 = vmatpush1.bf16.msra.mxu1 %v4978_v56  ;;  %v5074_v56 = vld [vmem:[%s6993_s1 + $0x450] ss:$8 sps:$4 sm:$0xff]  }
  0xe0   :  { %3182 = vmatpush1.bf16.msra.mxu0 %v4981_v57  ;;  %2918 = vmatprep.subr.bf16.mxu1 %v4986_v58  ;;  %v5077_v57 = vld [vmem:[%s6993_s1 + $0x950] ss:$8 sps:$4 sm:$0xff]   ;;  %v5082_v58 = vld [vmem:[%s6993_s1 + $0x464] ss:$8 sps:$4 sm:$0xff]  }
  0xe1   :  { %3183 = vmatprep.subr.bf16.mxu0 %v4989_v59  ;;  %v5085_v59 = vld [vmem:[%s6993_s1 + $0x964] ss:$8 sps:$4 sm:$0xff]  }
  0xe3   :  { %2919 = vmatpush1.bf16.msra.mxu1 %v4984_v60  ;;  %v5080_v60 = vld [vmem:[%s6993_s1 + $0x460] ss:$8 sps:$4 sm:$0xff]  }
  0xe4   :  { %3184 = vmatpush1.bf16.msra.mxu0 %v4987_v61  ;;  %2920 = vmatprep.subr.bf16.mxu1 %v4992_v62  ;;  %v5083_v61 = vld [vmem:[%s6993_s1 + $0x960] ss:$8 sps:$4 sm:$0xff]   ;;  %v5088_v62 = vld [vmem:[%s6993_s1 + $0x474] ss:$8 sps:$4 sm:$0xff]  }
  0xe5   :  { %3185 = vmatprep.subr.bf16.mxu0 %v4995_v63  ;;  %v5091_v63 = vld [vmem:[%s6993_s1 + $0x974] ss:$8 sps:$4 sm:$0xff]  }
  0xe7   :  { %2921 = vmatpush1.bf16.msra.mxu1 %v4990_v0  ;;  %v5086_v0 = vld [vmem:[%s6993_s1 + $0x470] ss:$8 sps:$4 sm:$0xff]  }
  0xe8   :  { %3186 = vmatpush1.bf16.msra.mxu0 %v4993_v1  ;;  %2922 = vmatprep.subr.bf16.mxu1 %v4998_v2  ;;  %v5089_v1 = vld [vmem:[%s6993_s1 + $0x970] ss:$8 sps:$4 sm:$0xff]   ;;  %v5094_v2 = vld [vmem:[%s6993_s1 + $0x484] ss:$8 sps:$4 sm:$0xff]  }
  0xe9   :  { %3187 = vmatprep.subr.bf16.mxu0 %v5001_v3  ;;  %v5097_v3 = vld [vmem:[%s6993_s1 + $0x984] ss:$8 sps:$4 sm:$0xff]  }
  0xeb   :  { %2923 = vmatpush1.bf16.msra.mxu1 %v4996_v4  ;;  %v5092_v4 = vld [vmem:[%s6993_s1 + $0x480] ss:$8 sps:$4 sm:$0xff]  }
  0xec   :  { %3188 = vmatpush1.bf16.msra.mxu0 %v4999_v5  ;;  %2924 = vmatprep.subr.bf16.mxu1 %v5004_v6  ;;  %v5095_v5 = vld [vmem:[%s6993_s1 + $0x980] ss:$8 sps:$4 sm:$0xff]   ;;  %v5100_v6 = vld [vmem:[%s6993_s1 + $0x494] ss:$8 sps:$4 sm:$0xff]  }
  0xed   :  { %3189 = vmatprep.subr.bf16.mxu0 %v5007_v7  ;;  %v5103_v7 = vld [vmem:[%s6993_s1 + $0x994] ss:$8 sps:$4 sm:$0xff]  }
  0xef   :  { %2925 = vmatpush1.bf16.msra.mxu1 %v5002_v8  ;;  %v5098_v8 = vld [vmem:[%s6993_s1 + $0x490] ss:$8 sps:$4 sm:$0xff]  }
  0xf0   :  { %3190 = vmatpush1.bf16.msra.mxu0 %v5005_v9  ;;  %2926 = vmatprep.subr.bf16.mxu1 %v5010_v10  ;;  %v5101_v9 = vld [vmem:[%s6993_s1 + $0x990] ss:$8 sps:$4 sm:$0xff]   ;;  %v5106_v10 = vld [vmem:[%s6993_s1 + $0x4a4] ss:$8 sps:$4 sm:$0xff]  }
  0xf1   :  { %3191 = vmatprep.subr.bf16.mxu0 %v5013_v11  ;;  %v5109_v11 = vld [vmem:[%s6993_s1 + $0x9a4] ss:$8 sps:$4 sm:$0xff]  }
  0xf3   :  { %2927 = vmatpush1.bf16.msra.mxu1 %v5008_v12  ;;  %v5104_v12 = vld [vmem:[%s6993_s1 + $0x4a0] ss:$8 sps:$4 sm:$0xff]  }
  0xf4   :  { %3192 = vmatpush1.bf16.msra.mxu0 %v5011_v13  ;;  %2928 = vmatprep.subr.bf16.mxu1 %v5016_v14  ;;  %v5107_v13 = vld [vmem:[%s6993_s1 + $0x9a0] ss:$8 sps:$4 sm:$0xff]   ;;  %v5112_v14 = vld [vmem:[%s6993_s1 + $0x4b4] ss:$8 sps:$4 sm:$0xff]  }
  0xf5   :  { %3193 = vmatprep.subr.bf16.mxu0 %v5019_v15  ;;  %v5115_v15 = vld [vmem:[%s6993_s1 + $0x9b4] ss:$8 sps:$4 sm:$0xff]  }
  0xf7   :  { %2929 = vmatpush1.bf16.msra.mxu1 %v5014_v16  ;;  %v5110_v16 = vld [vmem:[%s6993_s1 + $0x4b0] ss:$8 sps:$4 sm:$0xff]  }
  0xf8   :  { %3194 = vmatpush1.bf16.msra.mxu0 %v5017_v17  ;;  %2930 = vmatprep.subr.bf16.mxu1 %v5024_v18  ;;  %v5113_v17 = vld [vmem:[%s6993_s1 + $0x9b0] ss:$8 sps:$4 sm:$0xff]   ;;  %v5118_v18 = vld [vmem:[%s6993_s1 + $0x4c4] ss:$8 sps:$4 sm:$0xff]  }
  0xf9   :  { %3195 = vmatprep.subr.bf16.mxu0 %v5029_v19  ;;  %v5121_v19 = vld [vmem:[%s6993_s1 + $0x9c4] ss:$8 sps:$4 sm:$0xff]  }
  0xfb   :  { %2931 = vmatpush1.bf16.msra.mxu1 %v5022_v20  ;;  %v5116_v20 = vld [vmem:[%s6993_s1 + $0x4c0] ss:$8 sps:$4 sm:$0xff]  }
  0xfc   :  { %3196 = vmatpush1.bf16.msra.mxu0 %v5027_v21  ;;  %2932 = vmatprep.subr.bf16.mxu1 %v5034_v22  ;;  %v5119_v21 = vld [vmem:[%s6993_s1 + $0x9c0] ss:$8 sps:$4 sm:$0xff]   ;;  %v5124_v22 = vld [vmem:[%s6993_s1 + $0x4d4] ss:$8 sps:$4 sm:$0xff]  }
  0xfd   :  { %3197 = vmatprep.subr.bf16.mxu0 %v5037_v23  ;;  %v5127_v23 = vld [vmem:[%s6993_s1 + $0x9d4] ss:$8 sps:$4 sm:$0xff]  }
  0xff   :  { %2933 = vmatpush1.bf16.msra.mxu1 %v5032_v24  ;;  %v5122_v24 = vld [vmem:[%s6993_s1 + $0x4d0] ss:$8 sps:$4 sm:$0xff]  }
 0x100   :  { %3198 = vmatpush1.bf16.msra.mxu0 %v5035_v25  ;;  %2955 = vmatprep.subr.bf16.mxu1 %v5043_v26  ;;  %v5125_v25 = vld [vmem:[%s6993_s1 + $0x9d0] ss:$8 sps:$4 sm:$0xff]   ;;  %v5133_v26 = vld [vmem:[%s6993_s1 + $0x4e4] ss:$8 sps:$4 sm:$0xff]  }
 0x101   :  { %3220 = vmatprep.subr.bf16.mxu0 %v5049_v28  ;;  %v5131_v28 = vld [vmem:[%s6993_s1 + $0x4e0] ss:$8 sps:$4 sm:$0xff]  }
 0x102   :  { %2935 = vmatmul.mubr.bf16.vlgmr.msra.gmra.mrb[0].mxu1 %v5038_v27  ;;  %v5138_v27 = vld [vmem:[%s6993_s1 + $0x9e4] ss:$8 sps:$4 sm:$0xff]  }
 0x103   :  { %3200 = vmatmul.mubr.bf16.vlgmr.msra.gmra.mrb[0].mxu0 %v5044_v30  ;;  %2956 = vmatpush1.bf16.msra.mxu1 %v5041_v29  ;;  %v5136_v29 = vld [vmem:[%s6993_s1 + $0x9e0] ss:$8 sps:$4 sm:$0xff]   ;;  %v5142_v30 = vld [vmem:[%s6993_s1 + $0x4f4] ss:$8 sps:$4 sm:$0xff]  }
 0x104   :  { %3221 = vmatpush1.bf16.msra.mxu0 %v5047_v31  ;;  %2957 = vmatprep.subr.bf16.mxu1 %v5052_v32  ;;  %v5145_v31 = vld [vmem:[%s6993_s1 + $0x9f4] ss:$8 sps:$4 sm:$0xff]   ;;  %v5140_v32 = vld [vmem:[%s6993_s1 + $0x4f0] ss:$8 sps:$4 sm:$0xff]  }
 0x105   :  { %3222 = vmatprep.subr.bf16.mxu0 %v5055_v33  ;;  %2944 = vmatprep.mubr.bf16.mxu1 %v5128_v34  ;;  %v5143_v33 = vld [vmem:[%s6993_s1 + $0x9f0] ss:$8 sps:$4 sm:$0xff]   ;;  %v5154_v34 = vld [vmem:[%s6993_s1 + $0xa04] ss:$8 sps:$4 sm:$0xff]  }
 0x106   :  { %3209 = vmatprep.mubr.bf16.mxu0 %v5134_v35  ;;  %v5146_v35 = vld [vmem:[%s6994_s0 + $0x20] ss:$100 sps:$4 sm:$0xff]  }
 0x107   :  { %2958 = vmatpush1.bf16.msra.mxu1 %v5050_v36  ;;  %v5149_v36 = vld [vmem:[%s6994_s0 + $0x48] ss:$100 sps:$4 sm:$0xff]  }
 0x108   :  { %3223 = vmatpush1.bf16.msra.mxu0 %v5053_v37  ;;  %2959 = vmatprep.subr.bf16.mxu1 %v5058_v38  ;;  %v5152_v37 = vld [vmem:[%s6993_s1 + $0xa00] ss:$8 sps:$4 sm:$0xff]   ;;  %v5158_v38 = vld [vmem:[%s6994_s0 + $0xec] ss:$100 sps:$4 sm:$0xff]  }
 0x109   :  { %3224 = vmatprep.subr.bf16.mxu0 %v5061_v39  ;;  %v5157_v39 = vld [vmem:[%s6993_s1 + $0xa14] ss:$8 sps:$4 sm:$0xff]  }
 0x10a   :  { %2945 = vmatmul.mubr.bf16.gmra.mrb[4].mxu1 %v5130_v42  ;;  %v5163_v42 = vld [vmem:[%s6993_s1 + $0xa24] ss:$8 sps:$4 sm:$0xff]  }
 0x10b   :  { %3210 = vmatmul.mubr.bf16.gmra.mrb[4].mxu0 %v5139_v43  ;;  %2960 = vmatpush1.bf16.msra.mxu1 %v5056_v40  ;;  %v5197_v40 = vld [vmem:[%s6994_s0 + $0x114] ss:$100 sps:$4 sm:$0xff]   ;;  %v5160_v43 = vld [vmem:[%s6994_s0 + $0xe8] ss:$100 sps:$4 sm:$0xff]  }
 0x10c   :  { %3225 = vmatpush1.bf16.msra.mxu0 %v5059_v41  ;;  %2961 = vmatprep.subr.bf16.mxu1 %v5064_v44  ;;  %v5155_v41 = vld [vmem:[%s6993_s1 + $0xa10] ss:$8 sps:$4 sm:$0xff]  }
 0x10d   :  { %3226 = vmatprep.subr.bf16.mxu0 %v5067_v45  ;;  %2987 = vmatprep.mubr.bf16.mxu1 %v5148_v48  ;;  %v5202_v44 = vld [vmem:[%s6994_s0 + $0x110] ss:$100 sps:$4 sm:$0xff]   ;;  %v5161_v45 = vld [vmem:[%s6993_s1 + $0xa20] ss:$8 sps:$4 sm:$0xff]  }
 0x10e   :  { %3252 = vmatprep.mubr.bf16.mxu0 %v5151_v49  ;;  %v5164_v48 = vld [vmem:[%s6993_s1 + $0xa30] ss:$8 sps:$4 sm:$0xff]   ;;  %v5169_v49 = vld [vmem:[%s6993_s1 + $0xa44] ss:$8 sps:$4 sm:$0xff]  }
 0x10f   :  { %2962 = vmatpush1.bf16.msra.mxu1 %v5062_v46  ;;  %v5208_v46 = vld [vmem:[%s6994_s0 + $0x54] ss:$100 sps:$4 sm:$0xff]  }
 0x110   :  { %3227 = vmatpush1.bf16.msra.mxu0 %v5065_v47  ;;  %2963 = vmatprep.subr.bf16.mxu1 %v5070_v50  ;;  %v5166_v47 = vld [vmem:[%s6993_s1 + $0xa34] ss:$8 sps:$4 sm:$0xff]   ;;  %v5167_v50 = vld [vmem:[%s6993_s1 + $0xa40] ss:$8 sps:$4 sm:$0xff]  }
 0x111   :  { %3228 = vmatprep.subr.bf16.mxu0 %v5073_v51  ;;  %v5172_v51 = vld [vmem:[%s6993_s1 + $0xa54] ss:$8 sps:$4 sm:$0xff]  }
 0x113   :  { %2964 = vmatpush1.bf16.msra.mxu1 %v5068_v52  ;;  %v5170_v52 = vld [vmem:[%s6993_s1 + $0xa50] ss:$8 sps:$4 sm:$0xff]  }
 0x114   :  { %3229 = vmatpush1.bf16.msra.mxu0 %v5071_v53  ;;  %2965 = vmatprep.subr.bf16.mxu1 %v5076_v54  ;;  %v5175_v53 = vld [vmem:[%s6993_s1 + $0xa64] ss:$8 sps:$4 sm:$0xff]   ;;  %v5173_v54 = vld [vmem:[%s6993_s1 + $0xa60] ss:$8 sps:$4 sm:$0xff]  }
 0x115   :  { %3230 = vmatprep.subr.bf16.mxu0 %v5079_v55  ;;  %v5178_v55 = vld [vmem:[%s6993_s1 + $0xa74] ss:$8 sps:$4 sm:$0xff]  }
 0x117   :  { %2966 = vmatpush1.bf16.msra.mxu1 %v5074_v56  ;;  %v5176_v56 = vld [vmem:[%s6993_s1 + $0xa70] ss:$8 sps:$4 sm:$0xff]  }
 0x118   :  { %3231 = vmatpush1.bf16.msra.mxu0 %v5077_v57  ;;  %2967 = vmatprep.subr.bf16.mxu1 %v5082_v58  ;;  %v5181_v57 = vld [vmem:[%s6993_s1 + $0xa84] ss:$8 sps:$4 sm:$0xff]   ;;  %v5179_v58 = vld [vmem:[%s6993_s1 + $0xa80] ss:$8 sps:$4 sm:$0xff]  }
 0x119   :  { %3232 = vmatprep.subr.bf16.mxu0 %v5085_v59  ;;  %v5184_v59 = vld [vmem:[%s6993_s1 + $0xa94] ss:$8 sps:$4 sm:$0xff]  }
 0x11b   :  { %2968 = vmatpush1.bf16.msra.mxu1 %v5080_v60  ;;  %v5182_v60 = vld [vmem:[%s6993_s1 + $0xa90] ss:$8 sps:$4 sm:$0xff]  }
 0x11c   :  { %3233 = vmatpush1.bf16.msra.mxu0 %v5083_v61  ;;  %2969 = vmatprep.subr.bf16.mxu1 %v5088_v62  ;;  %v5187_v61 = vld [vmem:[%s6993_s1 + $0xaa4] ss:$8 sps:$4 sm:$0xff]   ;;  %v5185_v62 = vld [vmem:[%s6993_s1 + $0xaa0] ss:$8 sps:$4 sm:$0xff]  }
 0x11d   :  { %3234 = vmatprep.subr.bf16.mxu0 %v5091_v63  ;;  %v5190_v63 = vld [vmem:[%s6993_s1 + $0xab4] ss:$8 sps:$4 sm:$0xff]  }
 0x11f   :  { %2970 = vmatpush1.bf16.msra.mxu1 %v5086_v0  ;;  %v5188_v0 = vld [vmem:[%s6993_s1 + $0xab0] ss:$8 sps:$4 sm:$0xff]  }
 0x120   :  { %3235 = vmatpush1.bf16.msra.mxu0 %v5089_v1  ;;  %2971 = vmatprep.subr.bf16.mxu1 %v5094_v2  ;;  %v5193_v1 = vld [vmem:[%s6993_s1 + $0xac4] ss:$8 sps:$4 sm:$0xff]   ;;  %v5191_v2 = vld [vmem:[%s6993_s1 + $0xac0] ss:$8 sps:$4 sm:$0xff]  }
 0x121   :  { %3236 = vmatprep.subr.bf16.mxu0 %v5097_v3  ;;  %v5196_v3 = vld [vmem:[%s6993_s1 + $0xad4] ss:$8 sps:$4 sm:$0xff]  }
 0x123   :  { %2972 = vmatpush1.bf16.msra.mxu1 %v5092_v4  ;;  %v5194_v4 = vld [vmem:[%s6993_s1 + $0xad0] ss:$8 sps:$4 sm:$0xff]  }
 0x124   :  { %3237 = vmatpush1.bf16.msra.mxu0 %v5095_v5  ;;  %2973 = vmatprep.subr.bf16.mxu1 %v5100_v6  ;;  %v5201_v5 = vld [vmem:[%s6993_s1 + $0xae4] ss:$8 sps:$4 sm:$0xff]   ;;  %v5199_v6 = vld [vmem:[%s6993_s1 + $0xae0] ss:$8 sps:$4 sm:$0xff]  }
 0x125   :  { %3238 = vmatprep.subr.bf16.mxu0 %v5103_v7  ;;  %v5205_v7 = vld [vmem:[%s6993_s1 + $0xaf4] ss:$8 sps:$4 sm:$0xff]  }
 0x127   :  { %2974 = vmatpush1.bf16.msra.mxu1 %v5098_v8  ;;  %v5203_v8 = vld [vmem:[%s6993_s1 + $0xaf0] ss:$8 sps:$4 sm:$0xff]  }
 0x128   :  { %3239 = vmatpush1.bf16.msra.mxu0 %v5101_v9  ;;  %2975 = vmatprep.subr.bf16.mxu1 %v5106_v10  ;;  %v5211_v9 = vld [vmem:[%s6993_s1 + $0xb04] ss:$8 sps:$4 sm:$0xff]   ;;  %v5206_v10 = vld [vmem:[%s6994_s0 + $0x50] ss:$100 sps:$4 sm:$0xff]  }
 0x129   :  { %3240 = vmatprep.subr.bf16.mxu0 %v5109_v11  ;;  %v5209_v11 = vld [vmem:[%s6993_s1 + $0xb00] ss:$8 sps:$4 sm:$0xff]  }
 0x12b   :  { %2976 = vmatpush1.bf16.msra.mxu1 %v5104_v12  ;;  %v5251_v12 = vld [vmem:[%s6994_s0 + $0x11c] ss:$100 sps:$4 sm:$0xff]  }
 0x12c   :  { %3241 = vmatpush1.bf16.msra.mxu0 %v5107_v13  ;;  %2977 = vmatprep.subr.bf16.mxu1 %v5112_v14  ;;  %v5214_v13 = vld [vmem:[%s6993_s1 + $0xb14] ss:$8 sps:$4 sm:$0xff]   ;;  %v5212_v14 = vld [vmem:[%s6993_s1 + $0xb10] ss:$8 sps:$4 sm:$0xff]  }
 0x12d   :  { %3242 = vmatprep.subr.bf16.mxu0 %v5115_v15  ;;  %v5217_v15 = vld [vmem:[%s6993_s1 + $0xb24] ss:$8 sps:$4 sm:$0xff]  }
 0x12f   :  { %2978 = vmatpush1.bf16.msra.mxu1 %v5110_v16  ;;  %v5256_v16 = vld [vmem:[%s6994_s0 + $0x118] ss:$100 sps:$4 sm:$0xff]  }
 0x130   :  { %3243 = vmatpush1.bf16.msra.mxu0 %v5113_v17  ;;  %2979 = vmatprep.subr.bf16.mxu1 %v5118_v18  ;;  %v5215_v17 = vld [vmem:[%s6993_s1 + $0xb20] ss:$8 sps:$4 sm:$0xff]  }
 0x131   :  { %3244 = vmatprep.subr.bf16.mxu0 %v5121_v19  ;;  %v5262_v18 = vld [vmem:[%s6994_s0 + $0x5c] ss:$100 sps:$4 sm:$0xff]  }
 0x132   :  { %v5220_v19 = vld [vmem:[%s6993_s1 + $0xb34] ss:$8 sps:$4 sm:$0xff]  }
 0x133   :  { %2980 = vmatpush1.bf16.msra.mxu1 %v5116_v20  ;;  %v5218_v20 = vld [vmem:[%s6993_s1 + $0xb30] ss:$8 sps:$4 sm:$0xff]  }
 0x134   :  { %3245 = vmatpush1.bf16.msra.mxu0 %v5119_v21  ;;  %2981 = vmatprep.subr.bf16.mxu1 %v5124_v22  ;;  %v5223_v21 = vld [vmem:[%s6993_s1 + $0xb44] ss:$8 sps:$4 sm:$0xff]   ;;  %v5221_v22 = vld [vmem:[%s6993_s1 + $0xb40] ss:$8 sps:$4 sm:$0xff]  }
 0x135   :  { %3246 = vmatprep.subr.bf16.mxu0 %v5127_v23  ;;  %v5226_v23 = vld [vmem:[%s6993_s1 + $0xb54] ss:$8 sps:$4 sm:$0xff]  }
 0x137   :  { %2982 = vmatpush1.bf16.msra.mxu1 %v5122_v24  ;;  %v5224_v24 = vld [vmem:[%s6993_s1 + $0xb50] ss:$8 sps:$4 sm:$0xff]  }
 0x138   :  { %3247 = vmatpush1.bf16.msra.mxu0 %v5125_v25  ;;  %2983 = vmatprep.subr.bf16.mxu1 %v5133_v26  ;;  %v5229_v25 = vld [vmem:[%s6993_s1 + $0xb64] ss:$8 sps:$4 sm:$0xff]   ;;  %v5227_v26 = vld [vmem:[%s6993_s1 + $0xb60] ss:$8 sps:$4 sm:$0xff]  }
 0x139   :  { %3248 = vmatprep.subr.bf16.mxu0 %v5138_v27  ;;  %v5232_v27 = vld [vmem:[%s6993_s1 + $0xb74] ss:$8 sps:$4 sm:$0xff]  }
 0x13b   :  { %2984 = vmatpush1.bf16.msra.mxu1 %v5131_v28  ;;  %v5230_v28 = vld [vmem:[%s6993_s1 + $0xb70] ss:$8 sps:$4 sm:$0xff]  }
 0x13c   :  { %3249 = vmatpush1.bf16.msra.mxu0 %v5136_v29  ;;  %2985 = vmatprep.subr.bf16.mxu1 %v5142_v30  ;;  %v5235_v29 = vld [vmem:[%s6993_s1 + $0xb84] ss:$8 sps:$4 sm:$0xff]   ;;  %v5233_v30 = vld [vmem:[%s6993_s1 + $0xb80] ss:$8 sps:$4 sm:$0xff]  }
 0x13d   :  { %3250 = vmatprep.subr.bf16.mxu0 %v5145_v31  ;;  %v5238_v31 = vld [vmem:[%s6993_s1 + $0xb94] ss:$8 sps:$4 sm:$0xff]  }
 0x13f   :  { %2986 = vmatpush1.bf16.msra.mxu1 %v5140_v32  ;;  %v5236_v32 = vld [vmem:[%s6993_s1 + $0xb90] ss:$8 sps:$4 sm:$0xff]  }
 0x140   :  { %3251 = vmatpush1.bf16.msra.mxu0 %v5143_v33  ;;  %v5292_v33 = vld [vmem:[%s6995_s3] ss:$8 sps:$4 sm:$0xff]  }
 0x141   :  { %3273 = vmatprep.subr.bf16.mxu0 %v5154_v34  ;;  %v5294_v34 = vld [vmem:[%s6995_s3 + $0x4] ss:$8 sps:$4 sm:$0xff]  }
 0x142   :  { %2988 = vmatmul.mubr.bf16.vlgmr.msra.gmra.mrb[0].mxu1 %v5146_v35  ;;  %v5241_v35 = vld [vmem:[%s6993_s1 + $0xba4] ss:$8 sps:$4 sm:$0xff]   ;;  %3648 = vmatprep.subr.bf16.mxu1 %v5294_v34 }
 0x143   :  { %3253 = vmatmul.mubr.bf16.vlgmr.msra.gmra.mrb[0].mxu0 %v5149_v36  ;;  %2997 = vmatprep.mubr.bf16.mxu1 %v5158_v38  ;;  %v5297_v36 = vld [vmem:[%s6995_s3 + $0x14] ss:$8 sps:$4 sm:$0xff]   ;;  %v5295_v38 = vld [vmem:[%s6995_s3 + $0x10] ss:$8 sps:$4 sm:$0xff]  }
 0x144   :  { %3274 = vmatpush1.bf16.msra.mxu0 %v5152_v37  ;;  %3262 = vmatprep.mubr.bf16.mxu0 %v5197_v40  ;;  %v5239_v37 = vld [vmem:[%s6993_s1 + $0xba0] ss:$8 sps:$4 sm:$0xff]   ;;  %v5244_v40 = vld [vmem:[%s6993_s1 + $0xbb4] ss:$8 sps:$4 sm:$0xff]  }
 0x145   :  { %3275 = vmatprep.subr.bf16.mxu0 %v5157_v39  ;;  %3649 = vmatpush1.bf16.msra.mxu1 %v5292_v33  ;;  %v5300_v39 = vld [vmem:[%s6995_s3 + $0x24] ss:$8 sps:$4 sm:$0xff]  }
 0x146   :  { %3650 = vmatprep.subr.bf16.mxu1 %v5297_v36 }
 0x148   :  { %3276 = vmatpush1.bf16.msra.mxu0 %v5155_v41  ;;  %v5242_v41 = vld [vmem:[%s6993_s1 + $0xbb0] ss:$8 sps:$4 sm:$0xff]  }
 0x149   :  { %3277 = vmatprep.subr.bf16.mxu0 %v5163_v42  ;;  %3651 = vmatpush1.bf16.msra.mxu1 %v5295_v38  ;;  %v5298_v42 = vld [vmem:[%s6995_s3 + $0x20] ss:$8 sps:$4 sm:$0xff]  }
 0x14a   :  { %2998 = vmatmul.mubr.bf16.gmra.mrb[4].mxu1 %v5160_v43  ;;  %3652 = vmatprep.subr.bf16.mxu1 %v5300_v39  ;;  %v5303_v43 = vld [vmem:[%s6995_s3 + $0x34] ss:$8 sps:$4 sm:$0xff]   ;;  %v5336_v39 = vld [vmem:[%s6995_s3 + $0xe4] ss:$8 sps:$4 sm:$0xff]  }
 0x14b   :  { %3263 = vmatmul.mubr.bf16.gmra.mrb[4].mxu0 %v5202_v44  ;;  %v5247_v44 = vld [vmem:[%s6993_s1 + $0xbc4] ss:$8 sps:$4 sm:$0xff]  }
 0x14c   :  { %3278 = vmatpush1.bf16.msra.mxu0 %v5161_v45  ;;  %3305 = vmatprep.mubr.bf16.mxu0 %v5208_v46  ;;  %v5245_v45 = vld [vmem:[%s6993_s1 + $0xbc0] ss:$8 sps:$4 sm:$0xff]   ;;  %v5301_v46 = vld [vmem:[%s6995_s3 + $0x30] ss:$8 sps:$4 sm:$0xff]  }
 0x14d   :  { %3279 = vmatprep.subr.bf16.mxu0 %v5166_v47  ;;  %3653 = vmatpush1.bf16.msra.mxu1 %v5298_v42  ;;  %v5306_v47 = vld [vmem:[%s6995_s3 + $0x44] ss:$8 sps:$4 sm:$0xff]   ;;  %v5337_v42 = vld [vmem:[%s6995_s3 + $0xf0] ss:$8 sps:$4 sm:$0xff]  }
 0x14e   :  { %3654 = vmatprep.subr.bf16.mxu1 %v5303_v43  ;;  %v5342_v43 = vld [vmem:[%s6996_s5 + $0x4] ss:$8 sps:$4 sm:$0xff]  }
 0x150   :  { %3280 = vmatpush1.bf16.msra.mxu0 %v5164_v48  ;;  %v5250_v48 = vld [vmem:[%s6993_s1 + $0xbd4] ss:$8 sps:$4 sm:$0xff]  }
 0x151   :  { %3281 = vmatprep.subr.bf16.mxu0 %v5169_v49  ;;  %v5248_v49 = vld [vmem:[%s6993_s1 + $0xbd0] ss:$8 sps:$4 sm:$0xff]   ;;  %3655 = vmatpush1.bf16.msra.mxu1 %v5301_v46 }
 0x152   :  { %3656 = vmatprep.subr.bf16.mxu1 %v5306_v47  ;;  %v479_v47 = vld [vmem:[%s6997_s2] sm:$0x3] }
 0x154   :  { %3282 = vmatpush1.bf16.msra.mxu0 %v5167_v50  ;;  %v5304_v50 = vld [vmem:[%s6995_s3 + $0x40] ss:$8 sps:$4 sm:$0xff]  }
 0x155   :  { %3283 = vmatprep.subr.bf16.mxu0 %v5172_v51  ;;  %v5309_v51 = vld [vmem:[%s6995_s3 + $0x54] ss:$8 sps:$4 sm:$0xff]   ;;  %3657 = vmatpush1.bf16.msra.mxu1 %v5304_v50 }
 0x156   :  { %3658 = vmatprep.subr.bf16.mxu1 %v5309_v51 }
 0x158   :  { %3284 = vmatpush1.bf16.msra.mxu0 %v5170_v52  ;;  %v5255_v52 = vld [vmem:[%s6993_s1 + $0xbe4] ss:$8 sps:$4 sm:$0xff]  }
 0x159   :  { %3285 = vmatprep.subr.bf16.mxu0 %v5175_v53  ;;  %v5307_v53 = vld [vmem:[%s6995_s3 + $0x50] ss:$8 sps:$4 sm:$0xff]  }
 0x15a   :  { %3659 = vmatpush1.bf16.msra.mxu1 %v5307_v53 }
 0x15c   :  { %3286 = vmatpush1.bf16.msra.mxu0 %v5173_v54  ;;  %v5253_v54 = vld [vmem:[%s6993_s1 + $0xbe0] ss:$8 sps:$4 sm:$0xff]  }
 0x15d   :  { %3287 = vmatprep.subr.bf16.mxu0 %v5178_v55  ;;  %v5312_v55 = vld [vmem:[%s6995_s3 + $0x64] ss:$8 sps:$4 sm:$0xff]  }
 0x15e   :  { %3660 = vmatprep.subr.bf16.mxu1 %v5312_v55 }
 0x160   :  { %3288 = vmatpush1.bf16.msra.mxu0 %v5176_v56  ;;  %v5259_v56 = vld [vmem:[%s6993_s1 + $0xbf4] ss:$8 sps:$4 sm:$0xff]  }
 0x161   :  { %3289 = vmatprep.subr.bf16.mxu0 %v5181_v57  ;;  %v5310_v57 = vld [vmem:[%s6995_s3 + $0x60] ss:$8 sps:$4 sm:$0xff]  }
 0x162   :  { %3661 = vmatpush1.bf16.msra.mxu1 %v5310_v57 }
 0x164   :  { %3290 = vmatpush1.bf16.msra.mxu0 %v5179_v58  ;;  %v5257_v58 = vld [vmem:[%s6993_s1 + $0xbf0] ss:$8 sps:$4 sm:$0xff]  }
 0x165   :  { %3291 = vmatprep.subr.bf16.mxu0 %v5184_v59  ;;  %v5315_v59 = vld [vmem:[%s6995_s3 + $0x74] ss:$8 sps:$4 sm:$0xff]  }
 0x166   :  { %3662 = vmatprep.subr.bf16.mxu1 %v5315_v59 }
 0x168   :  { %3292 = vmatpush1.bf16.msra.mxu0 %v5182_v60  ;;  %v5265_v60 = vld [vmem:[%s6993_s1 + $0xc04] ss:$8 sps:$4 sm:$0xff]  }
 0x169   :  { %3293 = vmatprep.subr.bf16.mxu0 %v5187_v61  ;;  %v5260_v61 = vld [vmem:[%s6994_s0 + $0x58] ss:$100 sps:$4 sm:$0xff]  }
 0x16c   :  { %3294 = vmatpush1.bf16.msra.mxu0 %v5185_v62  ;;  %v5313_v62 = vld [vmem:[%s6995_s3 + $0x70] ss:$8 sps:$4 sm:$0xff]  }
 0x16d   :  { %3295 = vmatprep.subr.bf16.mxu0 %v5190_v63  ;;  %v5263_v63 = vld [vmem:[%s6993_s1 + $0xc00] ss:$8 sps:$4 sm:$0xff]   ;;  %3663 = vmatpush1.bf16.msra.mxu1 %v5313_v62 }
 0x170   :  { %3296 = vmatpush1.bf16.msra.mxu0 %v5188_v0  ;;  %v5281_v0 = vld [vmem:[%s6994_s0 + $0x124] ss:$100 sps:$4 sm:$0xff]  }
 0x171   :  { %3297 = vmatprep.subr.bf16.mxu0 %v5193_v1  ;;  %v5268_v1 = vld [vmem:[%s6993_s1 + $0xc14] ss:$8 sps:$4 sm:$0xff]  }
 0x174   :  { %3298 = vmatpush1.bf16.msra.mxu0 %v5191_v2  ;;  %v5318_v2 = vld [vmem:[%s6995_s3 + $0x84] ss:$8 sps:$4 sm:$0xff]  }
 0x175   :  { %3299 = vmatprep.subr.bf16.mxu0 %v5196_v3  ;;  %v5316_v3 = vld [vmem:[%s6995_s3 + $0x80] ss:$8 sps:$4 sm:$0xff]   ;;  %3664 = vmatprep.subr.bf16.mxu1 %v5318_v2 }
 0x176   :  { %3665 = vmatpush1.bf16.msra.mxu1 %v5316_v3 }
 0x178   :  { %3300 = vmatpush1.bf16.msra.mxu0 %v5194_v4  ;;  %v5266_v4 = vld [vmem:[%s6993_s1 + $0xc10] ss:$8 sps:$4 sm:$0xff]  }
 0x179   :  { %3301 = vmatprep.subr.bf16.mxu0 %v5201_v5  ;;  %v5321_v5 = vld [vmem:[%s6995_s3 + $0x94] ss:$8 sps:$4 sm:$0xff]  }
 0x17a   :  { %3666 = vmatprep.subr.bf16.mxu1 %v5321_v5 }
 0x17c   :  { %3302 = vmatpush1.bf16.msra.mxu0 %v5199_v6  ;;  %v5271_v6 = vld [vmem:[%s6993_s1 + $0xc24] ss:$8 sps:$4 sm:$0xff]  }
 0x17d   :  { %3303 = vmatprep.subr.bf16.mxu0 %v5205_v7  ;;  %v5283_v7 = vld [vmem:[%s6994_s0 + $0x120] ss:$100 sps:$4 sm:$0xff]  }
 0x180   :  { %3304 = vmatpush1.bf16.msra.mxu0 %v5203_v8  ;;  %v5319_v8 = vld [vmem:[%s6995_s3 + $0x90] ss:$8 sps:$4 sm:$0xff]  }
 0x181   :  { %3326 = vmatprep.subr.bf16.mxu0 %v5211_v9  ;;  %v5269_v9 = vld [vmem:[%s6993_s1 + $0xc20] ss:$8 sps:$4 sm:$0xff]   ;;  %3667 = vmatpush1.bf16.msra.mxu1 %v5319_v8 }
 0x182   :  { %v5340_v8 = vld [vmem:[%s6996_s5] ss:$8 sps:$4 sm:$0xff]  }
 0x183   :  { %3306 = vmatmul.mubr.bf16.vlgmr.msra.gmra.mrb[0].mxu0 %v5206_v10  ;;  %v5274_v10 = vld [vmem:[%s6993_s1 + $0xc34] ss:$8 sps:$4 sm:$0xff]  }
 0x184   :  { %3327 = vmatpush1.bf16.msra.mxu0 %v5209_v11  ;;  %3315 = vmatprep.mubr.bf16.mxu0 %v5251_v12  ;;  %v5324_v11 = vld [vmem:[%s6995_s3 + $0xa4] ss:$8 sps:$4 sm:$0xff]   ;;  %v5322_v12 = vld [vmem:[%s6995_s3 + $0xa0] ss:$8 sps:$4 sm:$0xff]  }
 0x185   :  { %3328 = vmatprep.subr.bf16.mxu0 %v5214_v13  ;;  %v5272_v13 = vld [vmem:[%s6993_s1 + $0xc30] ss:$8 sps:$4 sm:$0xff]   ;;  %3668 = vmatprep.subr.bf16.mxu1 %v5324_v11 }
 0x186   :  { %3669 = vmatpush1.bf16.msra.mxu1 %v5322_v12  ;;  %v5345_v12 = vld [vmem:[%s6996_s5 + $0x14] ss:$8 sps:$4 sm:$0xff]  }
 0x188   :  { %3329 = vmatpush1.bf16.msra.mxu0 %v5212_v14  ;;  %v5388_v14 = vmov 0  }
 0x189   :  { %3330 = vmatprep.subr.bf16.mxu0 %v5217_v15  ;;  %v5327_v15 = vld [vmem:[%s6995_s3 + $0xb4] ss:$8 sps:$4 sm:$0xff]  }
 0x18a   :  { %3670 = vmatprep.subr.bf16.mxu1 %v5327_v15 }
 0x18b   :  { %3316 = vmatmul.mubr.bf16.gmra.mrb[4].mxu0 %v5256_v16  ;;  %v5277_v16 = vld [vmem:[%s6993_s1 + $0xc44] ss:$8 sps:$4 sm:$0xff]  }
 0x18c   :  { %3331 = vmatpush1.bf16.msra.mxu0 %v5215_v17  ;;  %3358 = vmatprep.mubr.bf16.mxu0 %v5262_v18  ;;  %v5325_v17 = vld [vmem:[%s6995_s3 + $0xb0] ss:$8 sps:$4 sm:$0xff]   ;;  %v5275_v18 = vld [vmem:[%s6993_s1 + $0xc40] ss:$8 sps:$4 sm:$0xff]  }
 0x18d   :  { %3332 = vmatprep.subr.bf16.mxu0 %v5220_v19  ;;  %v5330_v19 = vld [vmem:[%s6995_s3 + $0xc4] ss:$8 sps:$4 sm:$0xff]   ;;  %3671 = vmatpush1.bf16.msra.mxu1 %v5325_v17 }
 0x18e   :  { %3672 = vmatprep.subr.bf16.mxu1 %v5330_v19  ;;  %v5343_v19 = vld [vmem:[%s6996_s5 + $0x10] ss:$8 sps:$4 sm:$0xff]  }
 0x190   :  { %3333 = vmatpush1.bf16.msra.mxu0 %v5218_v20  ;;  %v5280_v20 = vld [vmem:[%s6993_s1 + $0xc54] ss:$8 sps:$4 sm:$0xff]  }
 0x191   :  { %3334 = vmatprep.subr.bf16.mxu0 %v5223_v21  ;;  %v5328_v21 = vld [vmem:[%s6995_s3 + $0xc0] ss:$8 sps:$4 sm:$0xff]  }
 0x192   :  { %3673 = vmatpush1.bf16.msra.mxu1 %v5328_v21 }
 0x194   :  { %3335 = vmatpush1.bf16.msra.mxu0 %v5221_v22  ;;  %v5278_v22 = vld [vmem:[%s6993_s1 + $0xc50] ss:$8 sps:$4 sm:$0xff]  }
 0x195   :  { %3336 = vmatprep.subr.bf16.mxu0 %v5226_v23  ;;  %v5333_v23 = vld [vmem:[%s6995_s3 + $0xd4] ss:$8 sps:$4 sm:$0xff]  }
 0x196   :  { %3674 = vmatprep.subr.bf16.mxu1 %v5333_v23 }
 0x198   :  { %3337 = vmatpush1.bf16.msra.mxu0 %v5224_v24  ;;  %v5286_v24 = vld [vmem:[%s6993_s1 + $0xc64] ss:$8 sps:$4 sm:$0xff]  }
 0x199   :  { %3338 = vmatprep.subr.bf16.mxu0 %v5229_v25  ;;  %v5331_v25 = vld [vmem:[%s6995_s3 + $0xd0] ss:$8 sps:$4 sm:$0xff]  }
 0x19a   :  { %3675 = vmatpush1.bf16.msra.mxu1 %v5331_v25 }
 0x19b   :  { %3676 = vmatprep.subr.bf16.mxu1 %v5336_v39  ;;  %v5364_v39 = vld [vmem:[%s6996_s5 + $0x80] ss:$8 sps:$4 sm:$0xff]  }
 0x19c   :  { %3339 = vmatpush1.bf16.msra.mxu0 %v5227_v26  ;;  %v5284_v26 = vld [vmem:[%s6993_s1 + $0xc60] ss:$8 sps:$4 sm:$0xff]  }
 0x19d   :  { %3340 = vmatprep.subr.bf16.mxu0 %v5232_v27  ;;  %v5289_v27 = vld [vmem:[%s6993_s1 + $0xc74] ss:$8 sps:$4 sm:$0xff]  }
 0x1a0   :  { %3341 = vmatpush1.bf16.msra.mxu0 %v5230_v28  ;;  %v5287_v28 = vld [vmem:[%s6993_s1 + $0xc70] ss:$8 sps:$4 sm:$0xff]  }
 0x1a1   :  { %3342 = vmatprep.subr.bf16.mxu0 %v5235_v29  ;;  %v5290_v29 = vld [vmem:[%s6994_s0 + $0x60] ss:$100 sps:$4 sm:$0xff]  }
 0x1a4   :  { %3343 = vmatpush1.bf16.msra.mxu0 %v5233_v30  ;;  %v5291_v30 = vld [vmem:[%s6994_s0 + $0x128] ss:$100 sps:$4 sm:$0xff]  }
 0x1a5   :  { %3344 = vmatprep.subr.bf16.mxu0 %v5238_v31 }
 0x1a8   :  { %3345 = vmatpush1.bf16.msra.mxu0 %v5236_v32 }
 0x1a9   :  { %3346 = vmatprep.subr.bf16.mxu0 %v5241_v35 }
 0x1ac   :  { %3347 = vmatpush1.bf16.msra.mxu0 %v5239_v37 }
 0x1ad   :  { %3348 = vmatprep.subr.bf16.mxu0 %v5244_v40  ;;  %v5334_v40 = vld [vmem:[%s6995_s3 + $0xe0] ss:$8 sps:$4 sm:$0xff]  }
 0x1ae   :  { %3677 = vmatpush1.bf16.msra.mxu1 %v5334_v40  ;;  %v5369_v40 = vld [vmem:[%s6996_s5 + $0x94] ss:$8 sps:$4 sm:$0xff]  }
 0x1b0   :  { %3349 = vmatpush1.bf16.msra.mxu0 %v5242_v41  ;;  %v5339_v41 = vld [vmem:[%s6995_s3 + $0xf4] ss:$8 sps:$4 sm:$0xff]  }
 0x1b1   :  { %3350 = vmatprep.subr.bf16.mxu0 %v5247_v44  ;;  %3678 = vmatprep.subr.bf16.mxu1 %v5339_v41  ;;  %v481_v44 = vlaneseq  ;;  %v5367_v41 = vld [vmem:[%s6996_s5 + $0x90] ss:$8 sps:$4 sm:$0xff]  }
 0x1b2   :  { %3679 = vmatpush1.bf16.msra.mxu1 %v5337_v42  ;;  %v5372_v42 = vld [vmem:[%s6996_s5 + $0xa4] ss:$8 sps:$4 sm:$0xff]  }
 0x1b3   :  { %3917 = vmatprep.subr.bf16.mxu1 %v5342_v43  ;;  %v5370_v43 = vld [vmem:[%s6996_s5 + $0xa0] ss:$8 sps:$4 sm:$0xff]  }
 0x1b4   :  { %3351 = vmatpush1.bf16.msra.mxu0 %v5245_v45  ;;  %v482_v45 = vshrl.u32 %v481_v44, 7  ;;  %v5375_v44 = vld [vmem:[%s6996_s5 + $0xb4] ss:$8 sps:$4 sm:$0xff]  }
 0x1b5   :  { %3352 = vmatprep.subr.bf16.mxu0 %v5250_v48 }
 0x1b6   :  { %v6878_v46 = vsub.s32 0, %v482_v45  ;;  %v6883_v48 = vsub.s32 1, %v482_v45  ;;  %v5373_v45 = vld [vmem:[%s6996_s5 + $0xb0] ss:$8 sps:$4 sm:$0xff]  }
 0x1b8   :  { %3353 = vmatpush1.bf16.msra.mxu0 %v5248_v49  ;;  %v484_v49 = vrot.slane %v479_v47, %v6878_v46  ;;  %v488_v50 = vrot.slane %v479_v47, %v6883_v48  ;;  %v5378_v47 = vld [vmem:[%s6996_s5 + $0xc4] ss:$8 sps:$4 sm:$0xff]  }
 0x1b9   :  { %3354 = vmatprep.subr.bf16.mxu0 %v5255_v52 }
 0x1bc   :  { %3355 = vmatpush1.bf16.msra.mxu0 %v5253_v54 }
 0x1bd   :  { %3356 = vmatprep.subr.bf16.mxu0 %v5259_v56 }
 0x1c0   :  { %3357 = vmatpush1.bf16.msra.mxu0 %v5257_v58 }
 0x1c1   :  { %3379 = vmatprep.subr.bf16.mxu0 %v5265_v60 }
 0x1c3   :  { %3359 = vmatmul.mubr.bf16.vlgmr.msra.gmra.mrb[0].mxu0 %v5260_v61 }
 0x1c4   :  { %3380 = vmatpush1.bf16.msra.mxu0 %v5263_v63  ;;  %3368 = vmatprep.mubr.bf16.mxu0 %v5281_v0 }
 0x1c5   :  { %3381 = vmatprep.subr.bf16.mxu0 %v5268_v1 }
 0x1c8   :  { %3382 = vmatpush1.bf16.msra.mxu0 %v5266_v4 }
 0x1c9   :  { %3383 = vmatprep.subr.bf16.mxu0 %v5271_v6 }
 0x1cb   :  { %3369 = vmatmul.mubr.bf16.gmra.mrb[4].mxu0 %v5283_v7 }
 0x1cc   :  { %3384 = vmatpush1.bf16.msra.mxu0 %v5269_v9  ;;  %3411 = vmatprep.mubr.bf16.mxu0 %v5388_v14 }
 0x1cd   :  { %3385 = vmatprep.subr.bf16.mxu0 %v5274_v10 }
 0x1d0   :  { %3386 = vmatpush1.bf16.msra.mxu0 %v5272_v13 }
 0x1d1   :  { %3387 = vmatprep.subr.bf16.mxu0 %v5277_v16 }
 0x1d4   :  { %3388 = vmatpush1.bf16.msra.mxu0 %v5275_v18 }
 0x1d5   :  { %3389 = vmatprep.subr.bf16.mxu0 %v5280_v20 }
 0x1d8   :  { %3390 = vmatpush1.bf16.msra.mxu0 %v5278_v22  ;;  %v5348_v22 = vld [vmem:[%s6996_s5 + $0x24] ss:$8 sps:$4 sm:$0xff]  }
 0x1d9   :  { %3391 = vmatprep.subr.bf16.mxu0 %v5286_v24 }
 0x1dc   :  { %3392 = vmatpush1.bf16.msra.mxu0 %v5284_v26 }
 0x1dd   :  { %3393 = vmatprep.subr.bf16.mxu0 %v5289_v27  ;;  %v5346_v27 = vld [vmem:[%s6996_s5 + $0x20] ss:$8 sps:$4 sm:$0xff]  }
 0x1e0   :  { %3394 = vmatpush1.bf16.msra.mxu0 %v5287_v28  ;;  %v5351_v28 = vld [vmem:[%s6996_s5 + $0x34] ss:$8 sps:$4 sm:$0xff]  }
 0x1e3   :  { %3412 = vmatmul.mubr.bf16.vlgmr.msra.gmra.mrb[0].mxu0 %v5290_v29  ;;  %v5349_v29 = vld [vmem:[%s6996_s5 + $0x30] ss:$8 sps:$4 sm:$0xff]  }
 0x1e4   :  { %3421 = vmatprep.mubr.bf16.mxu0 %v5388_v14 }
 0x1eb   :  { %3422 = vmatmul.mubr.bf16.gmra.mrb[4].mxu0 %v5291_v30  ;;  %v5354_v30 = vld [vmem:[%s6996_s5 + $0x44] ss:$8 sps:$4 sm:$0xff]  }
 0x215   :  { %v2989_v31 = vpop.f32.mrb[0].mxu1 }
 0x216   :  { %v2991_v32 = vpop.f32.mrb[1].mxu1  ;;  %v4513_v51 = vadd.f32 %v2989_v31, %v484_v49  ;;  %v5352_v31 = vld [vmem:[%s6996_s5 + $0x40] ss:$8 sps:$4 sm:$0xff]  }
 0x217   :  { %v2993_v33 = vpop.f32.mrb[2].mxu1  ;;  %v4515_v52 = vadd.f32 %v2991_v32, %v488_v50  ;;  %v5357_v32 = vld [vmem:[%s6996_s5 + $0x54] ss:$8 sps:$4 sm:$0xff]  }
 0x218   :  { %v2995_v34 = vpop.f32.mrb[3].mxu1  ;;  %v4517_v54 = vadd.f32 %v2993_v33, %v484_v49  ;;  %v5355_v33 = vld [vmem:[%s6996_s5 + $0x50] ss:$8 sps:$4 sm:$0xff]  }
 0x219   :  { %v4519_v57 = vadd.f32 %v2995_v34, %v488_v50  ;;  %v5360_v34 = vld [vmem:[%s6996_s5 + $0x64] ss:$8 sps:$4 sm:$0xff]  }
 0x21d   :  { %v2999_v35 = vpop.f32.mrb[4].mxu1 }
 0x21e   :  { %v3001_v36 = vpop.f32.mrb[5].mxu1  ;;  %v4521_v3 = vadd.f32 %v2999_v35, %v484_v49  ;;  %v5358_v35 = vld [vmem:[%s6996_s5 + $0x60] ss:$8 sps:$4 sm:$0xff]  }
 0x21f   :  { %v3003_v37 = vpop.f32.mrb[6].mxu1  ;;  %v4523_v5 = vadd.f32 %v3001_v36, %v488_v50  ;;  %v5363_v36 = vld [vmem:[%s6996_s5 + $0x74] ss:$8 sps:$4 sm:$0xff]  }
 0x220   :  { %v3005_v38 = vpop.f32.mrb[7].mxu1  ;;  %v4525_v9 = vadd.f32 %v3003_v37, %v484_v49  ;;  %v5361_v37 = vld [vmem:[%s6996_s5 + $0x70] ss:$8 sps:$4 sm:$0xff]   ;;  %v5376_v49 = vld [vmem:[%s6996_s5 + $0xc0] ss:$8 sps:$4 sm:$0xff]  }
 0x221   :  { %v4527_v13 = vadd.f32 %v3005_v38, %v488_v50  ;;  %v5366_v38 = vld [vmem:[%s6996_s5 + $0x84] ss:$8 sps:$4 sm:$0xff]   ;;  %v5381_v50 = vld [vmem:[%s6996_s5 + $0xd4] ss:$8 sps:$4 sm:$0xff]  }
 0x2b6   :  { %v3413_v53 = vpop.f32.mrb[0].mxu0 }
 0x2b7   :  { %v4514_v55 = vadd.f32 %v4513_v51, %v3413_v53  ;;  %v3415_v56 = vpop.f32.mrb[1].mxu0  ;;  %v5379_v51 = vld [vmem:[%s6996_s5 + $0xd0] ss:$8 sps:$4 sm:$0xff]   ;;  %v5382_v53 = vld [vmem:[%s6996_s5 + $0xe0] ss:$8 sps:$4 sm:$0xff]  }
 0x2b8   :  { %v4516_v58 = vadd.f32 %v4515_v52, %v3415_v56  ;;  %v3417_v59 = vpop.f32.mrb[2].mxu0  ;;  %v5384_v52 = vld [vmem:[%s6996_s5 + $0xe4] ss:$8 sps:$4 sm:$0xff]   ;;  %v3476_v56 = vld [vmem:[%s6998_s4] sm:$0x3] }
 0x2b9   :  { %v4518_v60 = vadd.f32 %v4517_v54, %v3417_v59  ;;  %v3419_v61 = vpop.f32.mrb[3].mxu0  ;;  %v3432_v63 = vmax.f32 %v4514_v55, 0.0  ;;  %v5387_v54 = vld [vmem:[%s6996_s5 + $0xf4] ss:$8 sps:$4 sm:$0xff]   ;;  %v5385_v55 = vld [vmem:[%s6996_s5 + $0xf0] ss:$8 sps:$4 sm:$0xff]  }
 0x2ba   :  { %v4520_v62 = vadd.f32 %v4519_v57, %v3419_v61  ;;  %v3433_v1 = vmax.f32 %v4516_v58, 0.0  ;;  %v3481_v57 = vrot.slane %v3476_v56, %v6878_v46  ;;  %v3485_v58 = vrot.slane %v3476_v56, %v6883_v48 }
 0x2bb   :  { %v3434_v0 = vmax.f32 %v4518_v60, 0.0 }
 0x2bc   :  { %v3435_v2 = vmax.f32 %v4520_v62, 0.0 }
 0x2bd   :  { %v3440_v4 = vpack.c.bf16 %v3434_v0, %v3432_v63 }
 0x2be   :  { %v3441_v6 = vpack.c.bf16 %v3435_v2, %v3433_v1  ;;  %v3423_v7 = vpop.f32.mrb[4].mxu0 }
 0x2bf   :  { %v4522_v10 = vadd.f32 %v4521_v3, %v3423_v7  ;;  %v3425_v11 = vpop.f32.mrb[5].mxu0 }
 0x2c0   :  { %v4524_v14 = vadd.f32 %v4523_v5, %v3425_v11  ;;  %v3427_v15 = vpop.f32.mrb[6].mxu0  ;;  %3680 = vmatprep.mubr.bf16.mxu1 %v3441_v6 }
 0x2c1   :  { %v4526_v16 = vadd.f32 %v4525_v9, %v3427_v15  ;;  %v3429_v17 = vpop.f32.mrb[7].mxu0  ;;  %3681 = vmatmul.mubr.bf16.vlgmr.msra.gmra.mrb[8].mxu1 %v3440_v4  ;;  %v3436_v20 = vmax.f32 %v4522_v10, 0.0 }
 0x2c2   :  { %v4528_v18 = vadd.f32 %v4527_v13, %v3429_v17  ;;  %3918 = vmatpush1.bf16.msra.mxu1 %v5340_v8  ;;  %v3437_v23 = vmax.f32 %v4524_v14, 0.0 }
 0x2c3   :  { %v3438_v21 = vmax.f32 %v4526_v16, 0.0  ;;  %3919 = vmatprep.subr.bf16.mxu1 %v5345_v12 }
 0x2c4   :  { %v3439_v24 = vmax.f32 %v4528_v18, 0.0 }
 0x2c5   :  { %v3442_v25 = vpack.c.bf16 %v3438_v21, %v3436_v20 }
 0x2c6   :  { %v3443_v26 = vpack.c.bf16 %v3439_v24, %v3437_v23  ;;  %3920 = vmatpush1.bf16.msra.mxu1 %v5343_v19  ;;  %v3745_v23 = vld [vmem:[%s6999_s6] sm:$0x3] }
 0x2c7   :  { %3921 = vmatprep.subr.bf16.mxu1 %v5348_v22  ;;  %v3750_v24 = vrot.slane %v3745_v23, %v6878_v46 }
 0x2c8   :  { %3690 = vmatprep.mubr.bf16.mxu1 %v3443_v26 }
 0x2c9   :  { %3691 = vmatmul.mubr.bf16.gmra.mrb[12].mxu1 %v3442_v25  ;;  %v3754_v25 = vrot.slane %v3745_v23, %v6883_v48 }
 0x2ca   :  { %3922 = vmatpush1.bf16.msra.mxu1 %v5346_v27 }
 0x2cb   :  { %3923 = vmatprep.subr.bf16.mxu1 %v5351_v28 }
 0x2ce   :  { %3924 = vmatpush1.bf16.msra.mxu1 %v5349_v29 }
 0x2cf   :  { %3925 = vmatprep.subr.bf16.mxu1 %v5354_v30 }
 0x2d2   :  { %3926 = vmatpush1.bf16.msra.mxu1 %v5352_v31 }
 0x2d3   :  { %3927 = vmatprep.subr.bf16.mxu1 %v5357_v32 }
 0x2d6   :  { %3928 = vmatpush1.bf16.msra.mxu1 %v5355_v33 }
 0x2d7   :  { %3929 = vmatprep.subr.bf16.mxu1 %v5360_v34 }
 0x2da   :  { %3930 = vmatpush1.bf16.msra.mxu1 %v5358_v35 }
 0x2db   :  { %3931 = vmatprep.subr.bf16.mxu1 %v5363_v36 }
 0x2de   :  { %3932 = vmatpush1.bf16.msra.mxu1 %v5361_v37 }
 0x2df   :  { %3933 = vmatprep.subr.bf16.mxu1 %v5366_v38 }
 0x2e2   :  { %3934 = vmatpush1.bf16.msra.mxu1 %v5364_v39 }
 0x2e3   :  { %3935 = vmatprep.subr.bf16.mxu1 %v5369_v40 }
 0x2e6   :  { %3936 = vmatpush1.bf16.msra.mxu1 %v5367_v41 }
 0x2e7   :  { %3937 = vmatprep.subr.bf16.mxu1 %v5372_v42 }
 0x2ea   :  { %3938 = vmatpush1.bf16.msra.mxu1 %v5370_v43 }
 0x2eb   :  { %3939 = vmatprep.subr.bf16.mxu1 %v5375_v44 }
 0x2ee   :  { %3940 = vmatpush1.bf16.msra.mxu1 %v5373_v45 }
 0x2ef   :  { %3941 = vmatprep.subr.bf16.mxu1 %v5378_v47 }
 0x2f2   :  { %3942 = vmatpush1.bf16.msra.mxu1 %v5376_v49 }
 0x2f3   :  { %3943 = vmatprep.subr.bf16.mxu1 %v5381_v50 }
 0x2f6   :  { %3944 = vmatpush1.bf16.msra.mxu1 %v5379_v51 }
 0x2f7   :  { %3945 = vmatprep.subr.bf16.mxu1 %v5384_v52 }
 0x2fa   :  { %3946 = vmatpush1.bf16.msra.mxu1 %v5382_v53 }
 0x2fb   :  { %3947 = vmatprep.subr.bf16.mxu1 %v5387_v54 }
 0x2fe   :  { %3948 = vmatpush1.bf16.msra.mxu1 %v5385_v55 }
 0x394   :  { %v3682_v59 = vpop.f32.mrb[8].mxu1 }
 0x395   :  { %v3683_v60 = vadd.f32 %v3682_v59, %v3481_v57  ;;  %v3684_v61 = vpop.f32.mrb[9].mxu1 }
 0x396   :  { %v3685_v62 = vadd.f32 %v3684_v61, %v3485_v58  ;;  %v3686_v63 = vpop.f32.mrb[10].mxu1 }
 0x397   :  { %v3687_v0 = vadd.f32 %v3686_v63, %v3481_v57  ;;  %v3688_v1 = vpop.f32.mrb[11].mxu1  ;;  %v3701_v3 = vmax.f32 %v3683_v60, 0.0 }
 0x398   :  { %v3689_v2 = vadd.f32 %v3688_v1, %v3485_v58  ;;  %v3702_v5 = vmax.f32 %v3685_v62, 0.0 }
 0x399   :  { %v3703_v4 = vmax.f32 %v3687_v0, 0.0 }
 0x39a   :  { %v3704_v6 = vmax.f32 %v3689_v2, 0.0 }
 0x39b   :  { %v3709_v7 = vpack.c.bf16 %v3703_v4, %v3701_v3 }
 0x39c   :  { %v3710_v8 = vpack.c.bf16 %v3704_v6, %v3702_v5  ;;  %v3692_v9 = vpop.f32.mrb[12].mxu1 }
 0x39d   :  { %v3693_v10 = vadd.f32 %v3692_v9, %v3481_v57  ;;  %v3694_v11 = vpop.f32.mrb[13].mxu1 }
 0x39e   :  { %v3695_v12 = vadd.f32 %v3694_v11, %v3485_v58  ;;  %v3696_v13 = vpop.f32.mrb[14].mxu1  ;;  %3949 = vmatprep.mubr.bf16.mxu1 %v3710_v8 }
 0x39f   :  { %v3697_v14 = vadd.f32 %v3696_v13, %v3481_v57  ;;  %v3698_v15 = vpop.f32.mrb[15].mxu1  ;;  %3950 = vmatmul.mubr.bf16.vlgmr.msra.gmra.mrb[16].mxu1 %v3709_v7  ;;  %v3705_v17 = vmax.f32 %v3693_v10, 0.0 }
 0x3a0   :  { %v3699_v16 = vadd.f32 %v3698_v15, %v3485_v58  ;;  %v3706_v19 = vmax.f32 %v3695_v12, 0.0 }
 0x3a1   :  { %v3707_v18 = vmax.f32 %v3697_v14, 0.0 }
 0x3a2   :  { %v3708_v20 = vmax.f32 %v3699_v16, 0.0 }
 0x3a3   :  { %v3711_v21 = vpack.c.bf16 %v3707_v18, %v3705_v17 }
 0x3a4   :  { %v3712_v22 = vpack.c.bf16 %v3708_v20, %v3706_v19 }
 0x3a6   :  { %3959 = vmatprep.mubr.bf16.mxu1 %v3712_v22 }
 0x3a7   :  { %3960 = vmatmul.mubr.bf16.gmra.mrb[20].mxu1 %v3711_v21 }
 0x472   :  { %v3951_v26 = vpop.f32.mrb[16].mxu1 }
 0x473   :  { %v3952_v27 = vadd.f32 %v3951_v26, %v3750_v24  ;;  %v3953_v28 = vpop.f32.mrb[17].mxu1 }
 0x474   :  { %v3954_v29 = vadd.f32 %v3953_v28, %v3754_v25  ;;  %v3955_v30 = vpop.f32.mrb[18].mxu1 }
 0x475   :  { %v3956_v31 = vadd.f32 %v3955_v30, %v3750_v24  ;;  %v3957_v32 = vpop.f32.mrb[19].mxu1  ;;  %v3970_v34 = vmax.f32 %v3952_v27, 0.0 }
 0x476   :  { %v3958_v33 = vadd.f32 %v3957_v32, %v3754_v25  ;;  %v3971_v36 = vmax.f32 %v3954_v29, 0.0 }
 0x477   :  { %v3972_v35 = vmax.f32 %v3956_v31, 0.0 }
 0x478   :  { %v3973_v37 = vmax.f32 %v3958_v33, 0.0 }
 0x479   :  { %v3978_v38 = vmax.f32 %v3970_v34, %v3972_v35 }
 0x47a   :  { %v3979_v39 = vmax.f32 %v3971_v36, %v3973_v37  ;;  %v3961_v40 = vpop.f32.mrb[20].mxu1 }
 0x47b   :  { %v3962_v41 = vadd.f32 %v3961_v40, %v3750_v24  ;;  %v3963_v42 = vpop.f32.mrb[21].mxu1 }
 0x47c   :  { %v3964_v46 = vadd.f32 %v3963_v42, %v3754_v25  ;;  %v3965_v43 = vpop.f32.mrb[22].mxu1 }
 0x47d   :  { %v3966_v48 = vadd.f32 %v3965_v43, %v3750_v24  ;;  %v3967_v44 = vpop.f32.mrb[23].mxu1  ;;  %v3974_v47 = vmax.f32 %v3962_v41, 0.0 }
 0x47e   :  { %v3968_v45 = vadd.f32 %v3967_v44, %v3754_v25  ;;  %v3975_v50 = vmax.f32 %v3964_v46, 0.0 }
 0x47f   :  { %v3976_v49 = vmax.f32 %v3966_v48, 0.0 }
 0x480   :  { %v3977_v51 = vmax.f32 %v3968_v45, 0.0 }
 0x481   :  { %v3980_v52 = vmax.f32 %v3974_v47, %v3976_v49 }
 0x482   :  { %v3981_v53 = vmax.f32 %v3975_v50, %v3977_v51 }
 0x483   :  { %v3982_v54 = vmax.f32 %v3978_v38, %v3980_v52 }
 0x484   :  { %v3983_v55 = vmax.f32 %v3979_v39, %v3981_v53 }
 0x486   :  { %v4512_v56 = vpack.c.bf16 %v3983_v55, %v3982_v54 }
 0x488   :  { %3992 = vst [vmem:[%s7000_s7] sm:$0xff] %v4512_v56 }

// kernel: conv3_forward.5
= control target key start
LH: loop header
LB: loop body
LE: loop exit
PB: predicated region body
PF: predicated region fallthrough
CT: control target
= control target key end

     0   :  { %s9302_s0 = inlined_call_operand.vmem [shape: bf16[8,2304], index: 0, kind: input, shape index: {}]   ;;  %s9303_s1 = inlined_call_operand.vmem [shape: bf16[2304,384], index: 1, kind: input, shape index: {}]   ;;  %s9304_s2 = inlined_call_operand.vmem [shape: f32[1,384], index: 2, kind: input, shape index: {}]   ;;  %s9305_s3 = inlined_call_operand.vmem [shape: bf16[384,384], index: 3, kind: input, shape index: {}]   ;;  %s9306_s4 = inlined_call_operand.vmem [shape: f32[1,384], index: 4, kind: input, shape index: {}]   ;;  %s9307_s5 = inlined_call_operand.vmem [shape: bf16[384,384], index: 5, kind: input, shape index: {}]   ;;  %s9308_s6 = inlined_call_operand.vmem [shape: f32[1,384], index: 6, kind: input, shape index: {}]   ;;  %s9309_s7 = inlined_call_operand.vmem [shape: bf16[384,128], index: 7, kind: input, shape index: {}]   ;;  %s9310_s8 = inlined_call_operand.vmem [shape: f32[1,128], index: 8, kind: input, shape index: {}]   ;;  %s9311_s9 = inlined_call_operand.hbm [shape: f32[2,128], index: 9, kind: output, shape index: {}]  }
   0x1   :  { %v6406_v0 = vld [vmem:[%s9303_s1 + $0x4] ss:$12 sps:$4 sm:$0xff]   ;;  %v6408_v1 = vld [vmem:[%s9303_s1] ss:$12 sps:$4 sm:$0xff]   ;;  %v6409_v2 = vld [vmem:[%s9303_s1 + $0x1c] ss:$12 sps:$4 sm:$0xff]  }
   0x2   :  { %3003 = vmatprep.subr.bf16.mxu0 %v6406_v0  ;;  %v6411_v3 = vld [vmem:[%s9303_s1 + $0x18] ss:$12 sps:$4 sm:$0xff]   ;;  %v6412_v4 = vld [vmem:[%s9303_s1 + $0x34] ss:$12 sps:$4 sm:$0xff]   ;;  %v6414_v5 = vld [vmem:[%s9303_s1 + $0x30] ss:$12 sps:$4 sm:$0xff]  }
   0x3   :  { %3004 = vmatpush1.bf16.msra.mxu0 %v6408_v1  ;;  %v6415_v6 = vld [vmem:[%s9303_s1 + $0x4c] ss:$12 sps:$4 sm:$0xff]   ;;  %v6417_v7 = vld [vmem:[%s9303_s1 + $0x48] ss:$12 sps:$4 sm:$0xff]   ;;  %v6418_v8 = vld [vmem:[%s9303_s1 + $0x64] ss:$12 sps:$4 sm:$0xff]  }
   0x4   :  { %3005 = vmatprep.subr.bf16.mxu0 %v6409_v2  ;;  %v6420_v9 = vld [vmem:[%s9303_s1 + $0x60] ss:$12 sps:$4 sm:$0xff]   ;;  %v6421_v10 = vld [vmem:[%s9303_s1 + $0x7c] ss:$12 sps:$4 sm:$0xff]   ;;  %v6423_v11 = vld [vmem:[%s9303_s1 + $0x78] ss:$12 sps:$4 sm:$0xff]  }
   0x5   :  { %v6424_v12 = vld [vmem:[%s9303_s1 + $0x94] ss:$12 sps:$4 sm:$0xff]   ;;  %v6426_v15 = vld [vmem:[%s9303_s1 + $0x90] ss:$12 sps:$4 sm:$0xff]   ;;  %v6427_v16 = vld [vmem:[%s9303_s1 + $0xac] ss:$12 sps:$4 sm:$0xff]  }
   0x6   :  { %v7336_v13 = vld [vmem:[%s9302_s0] sm:$0xff]  ;;  %v6429_v17 = vld [vmem:[%s9303_s1 + $0xa8] ss:$12 sps:$4 sm:$0xff]   ;;  %v6483_v29 = vld [vmem:[%s9303_s1 + $0x110] ss:$12 sps:$4 sm:$0xff]  }
   0x7   :  { %3006 = vmatpush1.bf16.msra.mxu0 %v6411_v3  ;;  %v5387_v14 = vcombine.high %v7336_v13, %v7336_v13  ;;  %v6468_v18 = vld [vmem:[%s9303_s1 + $0xc8] ss:$12 sps:$4 sm:$0xff]   ;;  %v6430_v19 = vld [vmem:[%s9303_s1 + $0xc4] ss:$12 sps:$4 sm:$0xff]   ;;  %v6432_v20 = vld [vmem:[%s9303_s1 + $0xc0] ss:$12 sps:$4 sm:$0xff]   ;;  %v5386_v53 = vcombine.low %v7336_v13, %v7336_v13 }
   0x8   :  { %3007 = vmatprep.subr.bf16.mxu0 %v6412_v4  ;;  %6005 = vmatprep.subr.bf16.mxu1 %v6468_v18  ;;  %v6472_v21 = vld [vmem:[%s9303_s1 + $0x8] ss:$12 sps:$4 sm:$0xff]   ;;  %v6473_v22 = vld [vmem:[%s9303_s1 + $0xe0] ss:$12 sps:$4 sm:$0xff]   ;;  %v6478_v25 = vld [vmem:[%s9303_s1 + $0xf8] ss:$12 sps:$4 sm:$0xff]  }
   0x9   :  { %3035 = vmatprep.mubr.bf16.mxu0 %v5387_v14  ;;  %3404 = vmatprep.mubr.bf16.mxu1 %v5387_v14  ;;  %v6433_v23 = vld [vmem:[%s9303_s1 + $0xdc] ss:$12 sps:$4 sm:$0xff]   ;;  %v6477_v24 = vld [vmem:[%s9303_s1 + $0x20] ss:$12 sps:$4 sm:$0xff]   ;;  %v6435_v26 = vld [vmem:[%s9303_s1 + $0xd8] ss:$12 sps:$4 sm:$0xff]  }
   0xa   :  { %6006 = vmatpush3.bf16.msra.mxu1 %v6472_v21  ;;  %v6436_v27 = vld [vmem:[%s9303_s1 + $0xf4] ss:$12 sps:$4 sm:$0xff]   ;;  %v6482_v28 = vld [vmem:[%s9303_s1 + $0x38] ss:$12 sps:$4 sm:$0xff]   ;;  %v6438_v30 = vld [vmem:[%s9303_s1 + $0xf0] ss:$12 sps:$4 sm:$0xff]  }
   0xb   :  { %3008 = vmatpush1.bf16.msra.mxu0 %v6414_v5  ;;  %6007 = vmatprep.subr.bf16.mxu1 %v6473_v22  ;;  %v6439_v31 = vld [vmem:[%s9303_s1 + $0x10c] ss:$12 sps:$4 sm:$0xff]   ;;  %v6487_v32 = vld [vmem:[%s9303_s1 + $0x50] ss:$12 sps:$4 sm:$0xff]   ;;  %v6488_v33 = vld [vmem:[%s9303_s1 + $0x128] ss:$12 sps:$4 sm:$0xff]  }
   0xc   :  { %3009 = vmatprep.subr.bf16.mxu0 %v6415_v6  ;;  %v6441_v34 = vld [vmem:[%s9303_s1 + $0x108] ss:$12 sps:$4 sm:$0xff]   ;;  %v6442_v35 = vld [vmem:[%s9303_s1 + $0x124] ss:$12 sps:$4 sm:$0xff]   ;;  %v6493_v37 = vld [vmem:[%s9303_s1 + $0x140] ss:$12 sps:$4 sm:$0xff]  }
   0xd   :  { %v6492_v36 = vld [vmem:[%s9303_s1 + $0x68] ss:$12 sps:$4 sm:$0xff]   ;;  %v6444_v38 = vld [vmem:[%s9303_s1 + $0x120] ss:$12 sps:$4 sm:$0xff]   ;;  %v6498_v41 = vld [vmem:[%s9303_s1 + $0x158] ss:$12 sps:$4 sm:$0xff]  }
   0xe   :  { %6008 = vmatpush3.bf16.msra.mxu1 %v6477_v24  ;;  %v6445_v39 = vld [vmem:[%s9303_s1 + $0x13c] ss:$12 sps:$4 sm:$0xff]   ;;  %v6497_v40 = vld [vmem:[%s9303_s1 + $0x80] ss:$12 sps:$4 sm:$0xff]   ;;  %v6447_v42 = vld [vmem:[%s9303_s1 + $0x138] ss:$12 sps:$4 sm:$0xff]  }
   0xf   :  { %3010 = vmatpush1.bf16.msra.mxu0 %v6417_v7  ;;  %6009 = vmatprep.subr.bf16.mxu1 %v6478_v25  ;;  %v6448_v43 = vld [vmem:[%s9303_s1 + $0x154] ss:$12 sps:$4 sm:$0xff]   ;;  %v6502_v44 = vld [vmem:[%s9303_s1 + $0x98] ss:$12 sps:$4 sm:$0xff]   ;;  %v6503_v45 = vld [vmem:[%s9303_s1 + $0x170] ss:$12 sps:$4 sm:$0xff]  }
  0x10   :  { %3011 = vmatprep.subr.bf16.mxu0 %v6418_v8  ;;  %v6450_v46 = vld [vmem:[%s9303_s1 + $0x150] ss:$12 sps:$4 sm:$0xff]   ;;  %v6451_v47 = vld [vmem:[%s9303_s1 + $0x16c] ss:$12 sps:$4 sm:$0xff]   ;;  %v6508_v49 = vld [vmem:[%s9303_s1 + $0x248] ss:$12 sps:$4 sm:$0xff]  }
  0x11   :  { %v6507_v48 = vld [vmem:[%s9303_s1 + $0xb0] ss:$12 sps:$4 sm:$0xff]   ;;  %v6453_v50 = vld [vmem:[%s9303_s1 + $0x168] ss:$12 sps:$4 sm:$0xff]   ;;  %v6513_v54 = vld [vmem:[%s9303_s1 + $0x260] ss:$12 sps:$4 sm:$0xff]  }
  0x12   :  { %6010 = vmatpush3.bf16.msra.mxu1 %v6482_v28  ;;  %v6458_v51 = vld [vmem:[%s9303_s1 + $0x184] ss:$12 sps:$4 sm:$0xff]   ;;  %v6512_v52 = vld [vmem:[%s9303_s1 + $0x188] ss:$12 sps:$4 sm:$0xff]   ;;  %v6456_v55 = vld [vmem:[%s9303_s1 + $0x180] ss:$12 sps:$4 sm:$0xff]  }
  0x13   :  { %3012 = vmatpush1.bf16.msra.mxu0 %v6420_v9  ;;  %6011 = vmatprep.subr.bf16.mxu1 %v6483_v29  ;;  %v6461_v56 = vld [vmem:[%s9303_s1 + $0x19c] ss:$12 sps:$4 sm:$0xff]   ;;  %v6517_v57 = vld [vmem:[%s9303_s1 + $0x1a0] ss:$12 sps:$4 sm:$0xff]   ;;  %v6459_v58 = vld [vmem:[%s9303_s1 + $0x198] ss:$12 sps:$4 sm:$0xff]  }
  0x14   :  { %3013 = vmatprep.subr.bf16.mxu0 %v6421_v10  ;;  %v6518_v59 = vld [vmem:[%s9303_s1 + $0x278] ss:$12 sps:$4 sm:$0xff]   ;;  %v6464_v60 = vld [vmem:[%s9303_s1 + $0x1b4] ss:$12 sps:$4 sm:$0xff]   ;;  %v35_v62 = vld [vmem:[%s9302_s0 + $0x8] sm:$0xff] }
  0x15   :  { %v6522_v61 = vld [vmem:[%s9303_s1 + $0x1b8] ss:$12 sps:$4 sm:$0xff]   ;;  %v6523_v63 = vld [vmem:[%s9303_s1 + $0x290] ss:$12 sps:$4 sm:$0xff]   ;;  %v5389_v0 = vcombine.high %v35_v62, %v35_v62  ;;  %v6528_v4 = vld [vmem:[%s9303_s1 + $0x2a8] ss:$12 sps:$4 sm:$0xff]   ;;  %v7555_v24 = vcombine.low %v35_v62, %v35_v62 }
  0x16   :  { %6012 = vmatpush3.bf16.msra.mxu1 %v6487_v32  ;;  %v6462_v1 = vld [vmem:[%s9303_s1 + $0x1b0] ss:$12 sps:$4 sm:$0xff]   ;;  %v6467_v2 = vld [vmem:[%s9303_s1 + $0x1cc] ss:$12 sps:$4 sm:$0xff]   ;;  %v6465_v5 = vld [vmem:[%s9303_s1 + $0x1c8] ss:$12 sps:$4 sm:$0xff]  }
  0x17   :  { %3014 = vmatpush1.bf16.msra.mxu0 %v6423_v11  ;;  %6013 = vmatprep.subr.bf16.mxu1 %v6488_v33  ;;  %v6527_v3 = vld [vmem:[%s9303_s1 + $0x1d0] ss:$12 sps:$4 sm:$0xff]   ;;  %v6534_v7 = vld [vmem:[%s9303_s1 + $0x1e8] ss:$12 sps:$4 sm:$0xff]   ;;  %v6535_v8 = vld [vmem:[%s9303_s1 + $0x2c0] ss:$12 sps:$4 sm:$0xff]  }
  0x18   :  { %3015 = vmatprep.subr.bf16.mxu0 %v6424_v12  ;;  %v6471_v6 = vld [vmem:[%s9303_s1 + $0x1e4] ss:$12 sps:$4 sm:$0xff]   ;;  %v6469_v9 = vld [vmem:[%s9303_s1 + $0x1e0] ss:$12 sps:$4 sm:$0xff]   ;;  %v6476_v10 = vld [vmem:[%s9303_s1 + $0x1fc] ss:$12 sps:$4 sm:$0xff]  }
  0x19   :  { %v6539_v11 = vld [vmem:[%s9303_s1 + $0x200] ss:$12 sps:$4 sm:$0xff]   ;;  %v6540_v12 = vld [vmem:[%s9303_s1 + $0x2d8] ss:$12 sps:$4 sm:$0xff]   ;;  %v6484_v21 = vld [vmem:[%s9303_s1 + $0x228] ss:$12 sps:$4 sm:$0xff]  }
  0x1a   :  { %6014 = vmatpush3.bf16.msra.mxu1 %v6492_v36  ;;  %v6474_v13 = vld [vmem:[%s9303_s1 + $0x1f8] ss:$12 sps:$4 sm:$0xff]   ;;  %v6481_v14 = vld [vmem:[%s9303_s1 + $0x214] ss:$12 sps:$4 sm:$0xff]   ;;  %v6565_v33 = vld [vmem:[%s9303_s1 + $0x410] ss:$12 sps:$4 sm:$0xff]  }
  0x1b   :  { %3016 = vmatpush1.bf16.msra.mxu0 %v6426_v15  ;;  %6015 = vmatprep.subr.bf16.mxu1 %v6493_v37  ;;  %v6544_v15 = vld [vmem:[%s9303_s1 + $0x218] ss:$12 sps:$4 sm:$0xff]   ;;  %v6555_v25 = vld [vmem:[%s9303_s1 + $0x3e0] ss:$12 sps:$4 sm:$0xff]   ;;  %v6569_v36 = vld [vmem:[%s9303_s1 + $0x350] ss:$12 sps:$4 sm:$0xff]  }
  0x1c   :  { %3017 = vmatprep.subr.bf16.mxu0 %v6427_v16  ;;  %v6545_v16 = vld [vmem:[%s9303_s1 + $0x2f0] ss:$12 sps:$4 sm:$0xff]   ;;  %v6486_v18 = vld [vmem:[%s9303_s1 + $0x22c] ss:$12 sps:$4 sm:$0xff]   ;;  %v6570_v37 = vld [vmem:[%s9303_s1 + $0x428] ss:$12 sps:$4 sm:$0xff]  }
  0x1d   :  { %v6491_v22 = vld [vmem:[%s9303_s1 + $0x244] ss:$12 sps:$4 sm:$0xff]   ;;  %v6559_v28 = vld [vmem:[%s9303_s1 + $0x320] ss:$12 sps:$4 sm:$0xff]   ;;  %v6538_v62 = vld [vmem:[%s9303_s1 + $0x31c] ss:$12 sps:$4 sm:$0xff]  }
  0x1e   :  { %6016 = vmatpush3.bf16.msra.mxu1 %v6497_v40  ;;  %v6560_v29 = vld [vmem:[%s9303_s1 + $0x3f8] ss:$12 sps:$4 sm:$0xff]   ;;  %v36_v40 = vld [vmem:[%s9302_s0 + $0x10] sm:$0xff] }
  0x1f   :  { %3018 = vmatpush1.bf16.msra.mxu0 %v6429_v17  ;;  %6017 = vmatprep.subr.bf16.mxu1 %v6498_v41  ;;  %v6479_v17 = vld [vmem:[%s9303_s1 + $0x210] ss:$12 sps:$4 sm:$0xff]   ;;  %v6564_v32 = vld [vmem:[%s9303_s1 + $0x338] ss:$12 sps:$4 sm:$0xff]   ;;  %v6574_v41 = vld [vmem:[%s9303_s1 + $0x368] ss:$12 sps:$4 sm:$0xff]  }
  0x20   :  { %3019 = vmatprep.subr.bf16.mxu0 %v6430_v19  ;;  %v6549_v19 = vld [vmem:[%s9303_s1 + $0x230] ss:$12 sps:$4 sm:$0xff]  }
  0x22   :  { %6018 = vmatpush3.bf16.msra.mxu1 %v6502_v44  ;;  %v6509_v44 = vld [vmem:[%s9303_s1 + $0x2a0] ss:$12 sps:$4 sm:$0xff]  }
  0x23   :  { %3020 = vmatpush1.bf16.msra.mxu0 %v6432_v20  ;;  %6019 = vmatprep.subr.bf16.mxu1 %v6503_v45  ;;  %v6550_v20 = vld [vmem:[%s9303_s1 + $0x3c8] ss:$12 sps:$4 sm:$0xff]  }
  0x24   :  { %3021 = vmatprep.subr.bf16.mxu0 %v6433_v23  ;;  %v6554_v23 = vld [vmem:[%s9303_s1 + $0x308] ss:$12 sps:$4 sm:$0xff]  }
  0x25   :  { %v6516_v45 = vld [vmem:[%s9303_s1 + $0x2bc] ss:$12 sps:$4 sm:$0xff]  }
  0x26   :  { %6020 = vmatpush3.bf16.msra.mxu1 %v6507_v48  ;;  %v6514_v48 = vld [vmem:[%s9303_s1 + $0x2b8] ss:$12 sps:$4 sm:$0xff]  }
  0x27   :  { %3022 = vmatpush1.bf16.msra.mxu0 %v6435_v26  ;;  %6027 = vmatprep.subr.bf16.mxu1 %v6508_v49  ;;  %v6489_v26 = vld [vmem:[%s9303_s1 + $0x240] ss:$12 sps:$4 sm:$0xff]  }
  0x28   :  { %3023 = vmatprep.subr.bf16.mxu0 %v6436_v27  ;;  %v6496_v27 = vld [vmem:[%s9303_s1 + $0x25c] ss:$12 sps:$4 sm:$0xff]   ;;  %v6521_v49 = vld [vmem:[%s9303_s1 + $0x2d4] ss:$12 sps:$4 sm:$0xff]  }
  0x29   :  { %3405 = vmatmul.mubr.bf16.vlgmr.msra.gmra.mrb[0].mxu1 %v5386_v53 }
  0x2a   :  { %6028 = vmatpush3.bf16.msra.mxu1 %v6512_v52  ;;  %3444 = vmatprep.mubr.bf16.mxu1 %v5389_v0  ;;  %v6519_v52 = vld [vmem:[%s9303_s1 + $0x2d0] ss:$12 sps:$4 sm:$0xff]  }
  0x2b   :  { %3024 = vmatpush1.bf16.msra.mxu0 %v6438_v30  ;;  %6029 = vmatprep.subr.bf16.mxu1 %v6513_v54  ;;  %v6494_v30 = vld [vmem:[%s9303_s1 + $0x258] ss:$12 sps:$4 sm:$0xff]   ;;  %v6589_v54 = vld [vmem:[%s9303_s1 + $0x3b0] ss:$12 sps:$4 sm:$0xff]  }
  0x2c   :  { %3025 = vmatprep.subr.bf16.mxu0 %v6439_v31  ;;  %v6501_v31 = vld [vmem:[%s9303_s1 + $0x274] ss:$12 sps:$4 sm:$0xff]  }
  0x2e   :  { %6030 = vmatpush3.bf16.msra.mxu1 %v6517_v57  ;;  %v6533_v57 = vld [vmem:[%s9303_s1 + $0x304] ss:$12 sps:$4 sm:$0xff]  }
  0x2f   :  { %3026 = vmatpush1.bf16.msra.mxu0 %v6441_v34  ;;  %6031 = vmatprep.subr.bf16.mxu1 %v6518_v59  ;;  %v6499_v34 = vld [vmem:[%s9303_s1 + $0x270] ss:$12 sps:$4 sm:$0xff]   ;;  %v6596_v59 = vld [vmem:[%s9303_s1 + $0x488] ss:$12 sps:$4 sm:$0xff]  }
  0x30   :  { %3027 = vmatprep.subr.bf16.mxu0 %v6442_v35  ;;  %v6506_v35 = vld [vmem:[%s9303_s1 + $0x28c] ss:$12 sps:$4 sm:$0xff]  }
  0x32   :  { %6032 = vmatpush3.bf16.msra.mxu1 %v6522_v61  ;;  %v6531_v61 = vld [vmem:[%s9303_s1 + $0x300] ss:$12 sps:$4 sm:$0xff]  }
  0x33   :  { %3028 = vmatpush1.bf16.msra.mxu0 %v6444_v38  ;;  %6033 = vmatprep.subr.bf16.mxu1 %v6523_v63  ;;  %v6504_v38 = vld [vmem:[%s9303_s1 + $0x288] ss:$12 sps:$4 sm:$0xff]   ;;  %v6601_v63 = vld [vmem:[%s9303_s1 + $0x4a0] ss:$12 sps:$4 sm:$0xff]  }
  0x34   :  { %3029 = vmatprep.subr.bf16.mxu0 %v6445_v39  ;;  %v6511_v39 = vld [vmem:[%s9303_s1 + $0x2a4] ss:$12 sps:$4 sm:$0xff]  }
  0x36   :  { %6034 = vmatpush3.bf16.msra.mxu1 %v6527_v3  ;;  %v6606_v3 = vld [vmem:[%s9303_s1 + $0x4b8] ss:$12 sps:$4 sm:$0xff]  }
  0x37   :  { %3030 = vmatpush1.bf16.msra.mxu0 %v6447_v42  ;;  %6035 = vmatprep.subr.bf16.mxu1 %v6528_v4  ;;  %v5391_v42 = vcombine.high %v36_v40, %v36_v40  ;;  %v6607_v4 = vld [vmem:[%s9303_s1 + $0x590] ss:$12 sps:$4 sm:$0xff]  }
  0x38   :  { %3031 = vmatprep.subr.bf16.mxu0 %v6448_v43  ;;  %v6575_v43 = vld [vmem:[%s9303_s1 + $0x440] ss:$12 sps:$4 sm:$0xff]  }
  0x3a   :  { %6036 = vmatpush3.bf16.msra.mxu1 %v6534_v7 }
  0x3b   :  { %3032 = vmatpush1.bf16.msra.mxu0 %v6450_v46  ;;  %6037 = vmatprep.subr.bf16.mxu1 %v6535_v8  ;;  %v6579_v46 = vld [vmem:[%s9303_s1 + $0x380] ss:$12 sps:$4 sm:$0xff]  }
  0x3c   :  { %3033 = vmatprep.subr.bf16.mxu0 %v6451_v47  ;;  %v6580_v47 = vld [vmem:[%s9303_s1 + $0x458] ss:$12 sps:$4 sm:$0xff]  }
  0x3d   :  { %v6548_v8 = vld [vmem:[%s9303_s1 + $0x34c] ss:$12 sps:$4 sm:$0xff]  }
  0x3e   :  { %6038 = vmatpush3.bf16.msra.mxu1 %v6539_v11  ;;  %v6546_v11 = vld [vmem:[%s9303_s1 + $0x348] ss:$12 sps:$4 sm:$0xff]  }
  0x3f   :  { %3034 = vmatpush1.bf16.msra.mxu0 %v6453_v50  ;;  %6039 = vmatprep.subr.bf16.mxu1 %v6540_v12  ;;  %v6584_v50 = vld [vmem:[%s9303_s1 + $0x398] ss:$12 sps:$4 sm:$0xff]  }
  0x40   :  { %3044 = vmatprep.subr.bf16.mxu0 %v6458_v51  ;;  %v6585_v51 = vld [vmem:[%s9303_s1 + $0x470] ss:$12 sps:$4 sm:$0xff]  }
  0x41   :  { %v6553_v12 = vld [vmem:[%s9303_s1 + $0x364] ss:$12 sps:$4 sm:$0xff]  }
  0x42   :  { %3036 = vmatmul.mubr.bf16.vlgmr.msra.gmra.mrb[0].mxu0 %v5386_v53  ;;  %6040 = vmatpush3.bf16.msra.mxu1 %v6544_v15  ;;  %v6526_v53 = vld [vmem:[%s9303_s1 + $0x2ec] ss:$12 sps:$4 sm:$0xff]  }
  0x43   :  { %3045 = vmatpush1.bf16.msra.mxu0 %v6456_v55  ;;  %3076 = vmatprep.mubr.bf16.mxu0 %v5389_v0  ;;  %v6592_v55 = vld [vmem:[%s9303_s1 + $0x548] ss:$12 sps:$4 sm:$0xff]   ;;  %v6602_v0 = vld [vmem:[%s9303_s1 + $0x578] ss:$12 sps:$4 sm:$0xff]   ;;  %v6551_v15 = vld [vmem:[%s9303_s1 + $0x360] ss:$12 sps:$4 sm:$0xff]  }
  0x44   :  { %3046 = vmatprep.subr.bf16.mxu0 %v6461_v56  ;;  %6041 = vmatprep.subr.bf16.mxu1 %v6545_v16  ;;  %v6524_v56 = vld [vmem:[%s9303_s1 + $0x2e8] ss:$12 sps:$4 sm:$0xff]  }
  0x45   :  { %v6558_v16 = vld [vmem:[%s9303_s1 + $0x37c] ss:$12 sps:$4 sm:$0xff]  }
  0x46   :  { %6042 = vmatpush3.bf16.msra.mxu1 %v6549_v19  ;;  %v6556_v19 = vld [vmem:[%s9303_s1 + $0x378] ss:$12 sps:$4 sm:$0xff]  }
  0x47   :  { %3047 = vmatpush1.bf16.msra.mxu0 %v6459_v58  ;;  %6049 = vmatprep.subr.bf16.mxu1 %v6550_v20  ;;  %v7654_v58 = vcombine.low %v36_v40, %v36_v40  ;;  %v6563_v20 = vld [vmem:[%s9303_s1 + $0x394] ss:$12 sps:$4 sm:$0xff]   ;;  %v6648_v40 = vld [vmem:[%s9303_s1 + $0x638] ss:$12 sps:$4 sm:$0xff]  }
  0x48   :  { %3048 = vmatprep.subr.bf16.mxu0 %v6464_v60  ;;  %v6597_v60 = vld [vmem:[%s9303_s1 + $0x560] ss:$12 sps:$4 sm:$0xff]  }
  0x49   :  { %3445 = vmatmul.mubr.bf16.vlgmr.msra.gmra.mrb[4].mxu1 %v7555_v24 }
  0x4a   :  { %6050 = vmatpush3.bf16.msra.mxu1 %v6554_v23  ;;  %3484 = vmatprep.mubr.bf16.mxu1 %v5391_v42  ;;  %v6561_v23 = vld [vmem:[%s9303_s1 + $0x390] ss:$12 sps:$4 sm:$0xff]  }
  0x4b   :  { %3049 = vmatpush1.bf16.msra.mxu0 %v6462_v1  ;;  %6051 = vmatprep.subr.bf16.mxu1 %v6555_v25  ;;  %v6536_v1 = vld [vmem:[%s9303_s1 + $0x318] ss:$12 sps:$4 sm:$0xff]   ;;  %v6631_v25 = vld [vmem:[%s9303_s1 + $0x530] ss:$12 sps:$4 sm:$0xff]  }
  0x4c   :  { %3050 = vmatprep.subr.bf16.mxu0 %v6467_v2  ;;  %v6543_v2 = vld [vmem:[%s9303_s1 + $0x334] ss:$12 sps:$4 sm:$0xff]  }
  0x4e   :  { %6052 = vmatpush3.bf16.msra.mxu1 %v6559_v28 }
  0x4f   :  { %3051 = vmatpush1.bf16.msra.mxu0 %v6465_v5  ;;  %6053 = vmatprep.subr.bf16.mxu1 %v6560_v29  ;;  %v37_v5 = vld [vmem:[%s9302_s0 + $0x18] sm:$0xff]  ;;  %v6573_v29 = vld [vmem:[%s9303_s1 + $0x3c4] ss:$12 sps:$4 sm:$0xff]  }
  0x50   :  { %3052 = vmatprep.subr.bf16.mxu0 %v6471_v6  ;;  %v6541_v6 = vld [vmem:[%s9303_s1 + $0x330] ss:$12 sps:$4 sm:$0xff]   ;;  %v7694_v7 = vcombine.high %v37_v5, %v37_v5  ;;  %v7757_v28 = vcombine.low %v37_v5, %v37_v5 }
  0x52   :  { %6054 = vmatpush3.bf16.msra.mxu1 %v6564_v32  ;;  %v6571_v32 = vld [vmem:[%s9303_s1 + $0x3c0] ss:$12 sps:$4 sm:$0xff]  }
  0x53   :  { %3053 = vmatpush1.bf16.msra.mxu0 %v6469_v9  ;;  %6055 = vmatprep.subr.bf16.mxu1 %v6565_v33  ;;  %v6611_v9 = vld [vmem:[%s9303_s1 + $0x4d0] ss:$12 sps:$4 sm:$0xff]  }
  0x54   :  { %3054 = vmatprep.subr.bf16.mxu0 %v6476_v10  ;;  %v6612_v10 = vld [vmem:[%s9303_s1 + $0x5a8] ss:$12 sps:$4 sm:$0xff]  }
  0x55   :  { %v6578_v33 = vld [vmem:[%s9303_s1 + $0x3dc] ss:$12 sps:$4 sm:$0xff]  }
  0x56   :  { %6056 = vmatpush3.bf16.msra.mxu1 %v6569_v36  ;;  %v38_v36 = vld [vmem:[%s9302_s0 + $0x20] sm:$0xff] }
  0x57   :  { %3055 = vmatpush1.bf16.msra.mxu0 %v6474_v13  ;;  %6057 = vmatprep.subr.bf16.mxu1 %v6570_v37  ;;  %v6616_v13 = vld [vmem:[%s9303_s1 + $0x4e8] ss:$12 sps:$4 sm:$0xff]   ;;  %v7784_v37 = vcombine.high %v38_v36, %v38_v36 }
  0x58   :  { %3056 = vmatprep.subr.bf16.mxu0 %v6481_v14  ;;  %v6617_v14 = vld [vmem:[%s9303_s1 + $0x5c0] ss:$12 sps:$4 sm:$0xff]  }
  0x5a   :  { %6058 = vmatpush3.bf16.msra.mxu1 %v6574_v41  ;;  %v6649_v41 = vld [vmem:[%s9303_s1 + $0x710] ss:$12 sps:$4 sm:$0xff]  }
  0x5b   :  { %3057 = vmatpush1.bf16.msra.mxu0 %v6479_v17  ;;  %6059 = vmatprep.subr.bf16.mxu1 %v6575_v43  ;;  %v6621_v17 = vld [vmem:[%s9303_s1 + $0x500] ss:$12 sps:$4 sm:$0xff]  }
  0x5c   :  { %3058 = vmatprep.subr.bf16.mxu0 %v6486_v18  ;;  %v6622_v18 = vld [vmem:[%s9303_s1 + $0x5d8] ss:$12 sps:$4 sm:$0xff]  }
  0x5d   :  { %v6588_v43 = vld [vmem:[%s9303_s1 + $0x40c] ss:$12 sps:$4 sm:$0xff]  }
  0x5e   :  { %6060 = vmatpush3.bf16.msra.mxu1 %v6579_v46  ;;  %v6586_v46 = vld [vmem:[%s9303_s1 + $0x408] ss:$12 sps:$4 sm:$0xff]  }
  0x5f   :  { %3059 = vmatpush1.bf16.msra.mxu0 %v6484_v21  ;;  %6061 = vmatprep.subr.bf16.mxu1 %v6580_v47  ;;  %v6626_v21 = vld [vmem:[%s9303_s1 + $0x518] ss:$12 sps:$4 sm:$0xff]  }
  0x60   :  { %3060 = vmatprep.subr.bf16.mxu0 %v6491_v22  ;;  %v6627_v22 = vld [vmem:[%s9303_s1 + $0x5f0] ss:$12 sps:$4 sm:$0xff]  }
  0x61   :  { %v6595_v47 = vld [vmem:[%s9303_s1 + $0x424] ss:$12 sps:$4 sm:$0xff]  }
  0x62   :  { %6062 = vmatpush3.bf16.msra.mxu1 %v6584_v50  ;;  %v6593_v50 = vld [vmem:[%s9303_s1 + $0x420] ss:$12 sps:$4 sm:$0xff]  }
  0x63   :  { %3061 = vmatpush1.bf16.msra.mxu0 %v6489_v26  ;;  %6063 = vmatprep.subr.bf16.mxu1 %v6585_v51  ;;  %v6634_v26 = vld [vmem:[%s9303_s1 + $0x6c8] ss:$12 sps:$4 sm:$0xff]  }
  0x64   :  { %3062 = vmatprep.subr.bf16.mxu0 %v6496_v27  ;;  %v6566_v27 = vld [vmem:[%s9303_s1 + $0x3a8] ss:$12 sps:$4 sm:$0xff]  }
  0x65   :  { %v6600_v51 = vld [vmem:[%s9303_s1 + $0x43c] ss:$12 sps:$4 sm:$0xff]  }
  0x66   :  { %6064 = vmatpush3.bf16.msra.mxu1 %v6589_v54  ;;  %v6598_v54 = vld [vmem:[%s9303_s1 + $0x438] ss:$12 sps:$4 sm:$0xff]  }
  0x67   :  { %3063 = vmatpush1.bf16.msra.mxu0 %v6494_v30  ;;  %6071 = vmatprep.subr.bf16.mxu1 %v6592_v55  ;;  %v6638_v30 = vld [vmem:[%s9303_s1 + $0x608] ss:$12 sps:$4 sm:$0xff]  }
  0x68   :  { %3064 = vmatprep.subr.bf16.mxu0 %v6501_v31  ;;  %v6639_v31 = vld [vmem:[%s9303_s1 + $0x6e0] ss:$12 sps:$4 sm:$0xff]  }
  0x69   :  { %3485 = vmatmul.mubr.bf16.vlgmr.msra.gmra.mrb[8].mxu1 %v7654_v58  ;;  %v6605_v55 = vld [vmem:[%s9303_s1 + $0x454] ss:$12 sps:$4 sm:$0xff]  }
  0x6a   :  { %6072 = vmatpush3.bf16.msra.mxu1 %v6596_v59  ;;  %3524 = vmatprep.mubr.bf16.mxu1 %v7694_v7  ;;  %v6603_v59 = vld [vmem:[%s9303_s1 + $0x450] ss:$12 sps:$4 sm:$0xff]  }
  0x6b   :  { %3065 = vmatpush1.bf16.msra.mxu0 %v6499_v34  ;;  %6073 = vmatprep.subr.bf16.mxu1 %v6597_v60  ;;  %v6643_v34 = vld [vmem:[%s9303_s1 + $0x620] ss:$12 sps:$4 sm:$0xff]  }
  0x6c   :  { %3066 = vmatprep.subr.bf16.mxu0 %v6506_v35  ;;  %v6644_v35 = vld [vmem:[%s9303_s1 + $0x6f8] ss:$12 sps:$4 sm:$0xff]  }
  0x6d   :  { %v6610_v60 = vld [vmem:[%s9303_s1 + $0x46c] ss:$12 sps:$4 sm:$0xff]  }
  0x6e   :  { %6074 = vmatpush3.bf16.msra.mxu1 %v6601_v63  ;;  %v6608_v63 = vld [vmem:[%s9303_s1 + $0x468] ss:$12 sps:$4 sm:$0xff]  }
  0x6f   :  { %3067 = vmatpush1.bf16.msra.mxu0 %v6504_v38  ;;  %6075 = vmatprep.subr.bf16.mxu1 %v6602_v0  ;;  %v6576_v38 = vld [vmem:[%s9303_s1 + $0x3d8] ss:$12 sps:$4 sm:$0xff]  }
  0x70   :  { %3068 = vmatprep.subr.bf16.mxu0 %v6511_v39  ;;  %v6583_v39 = vld [vmem:[%s9303_s1 + $0x3f4] ss:$12 sps:$4 sm:$0xff]   ;;  %v6615_v0 = vld [vmem:[%s9303_s1 + $0x484] ss:$12 sps:$4 sm:$0xff]  }
  0x72   :  { %6076 = vmatpush3.bf16.msra.mxu1 %v6606_v3  ;;  %v7873_v3 = vld [vmem:[%s9302_s0 + $0x28] sm:$0xff] }
  0x73   :  { %3069 = vmatpush1.bf16.msra.mxu0 %v6509_v44  ;;  %6077 = vmatprep.subr.bf16.mxu1 %v6607_v4  ;;  %v6653_v44 = vld [vmem:[%s9303_s1 + $0x650] ss:$12 sps:$4 sm:$0xff]   ;;  %v6681_v4 = vld [vmem:[%s9303_s1 + $0x860] ss:$12 sps:$4 sm:$0xff]   ;;  %v7880_v5 = vcombine.high %v7873_v3, %v7873_v3 }
  0x74   :  { %3070 = vmatprep.subr.bf16.mxu0 %v6516_v45  ;;  %v6654_v45 = vld [vmem:[%s9303_s1 + $0x728] ss:$12 sps:$4 sm:$0xff]  }
  0x76   :  { %6078 = vmatpush3.bf16.msra.mxu1 %v6611_v9  ;;  %v6685_v9 = vld [vmem:[%s9303_s1 + $0x7a0] ss:$12 sps:$4 sm:$0xff]  }
  0x77   :  { %3071 = vmatpush1.bf16.msra.mxu0 %v6514_v48  ;;  %6079 = vmatprep.subr.bf16.mxu1 %v6612_v10  ;;  %v6658_v48 = vld [vmem:[%s9303_s1 + $0x668] ss:$12 sps:$4 sm:$0xff]   ;;  %v6686_v10 = vld [vmem:[%s9303_s1 + $0x878] ss:$12 sps:$4 sm:$0xff]  }
  0x78   :  { %3072 = vmatprep.subr.bf16.mxu0 %v6521_v49  ;;  %v6659_v49 = vld [vmem:[%s9303_s1 + $0x740] ss:$12 sps:$4 sm:$0xff]  }
  0x7a   :  { %6080 = vmatpush3.bf16.msra.mxu1 %v6616_v13  ;;  %v6690_v13 = vld [vmem:[%s9303_s1 + $0x7b8] ss:$12 sps:$4 sm:$0xff]  }
  0x7b   :  { %3073 = vmatpush1.bf16.msra.mxu0 %v6519_v52  ;;  %6081 = vmatprep.subr.bf16.mxu1 %v6617_v14  ;;  %v6663_v52 = vld [vmem:[%s9303_s1 + $0x680] ss:$12 sps:$4 sm:$0xff]   ;;  %v6623_v14 = vld [vmem:[%s9303_s1 + $0x4b0] ss:$12 sps:$4 sm:$0xff]  }
  0x7c   :  { %3074 = vmatprep.subr.bf16.mxu0 %v6526_v53  ;;  %v6664_v53 = vld [vmem:[%s9303_s1 + $0x758] ss:$12 sps:$4 sm:$0xff]  }
  0x7e   :  { %6082 = vmatpush3.bf16.msra.mxu1 %v6621_v17  ;;  %v6628_v17 = vld [vmem:[%s9303_s1 + $0x4c8] ss:$12 sps:$4 sm:$0xff]  }
  0x7f   :  { %3075 = vmatpush1.bf16.msra.mxu0 %v6524_v56  ;;  %6083 = vmatprep.subr.bf16.mxu1 %v6622_v18  ;;  %v6668_v56 = vld [vmem:[%s9303_s1 + $0x698] ss:$12 sps:$4 sm:$0xff]  }
  0x80   :  { %3085 = vmatprep.subr.bf16.mxu0 %v6533_v57  ;;  %v6669_v57 = vld [vmem:[%s9303_s1 + $0x770] ss:$12 sps:$4 sm:$0xff]  }
  0x81   :  { %v6637_v18 = vld [vmem:[%s9303_s1 + $0x4e4] ss:$12 sps:$4 sm:$0xff]  }
  0x82   :  { %3077 = vmatmul.mubr.bf16.vlgmr.msra.gmra.mrb[0].mxu0 %v7555_v24  ;;  %v6568_v24 = vld [vmem:[%s9303_s1 + $0x3ac] ss:$12 sps:$4 sm:$0xff]   ;;  %6084 = vmatpush3.bf16.msra.mxu1 %v6626_v21 }
  0x83   :  { %3086 = vmatpush1.bf16.msra.mxu0 %v6531_v61  ;;  %3117 = vmatprep.mubr.bf16.mxu0 %v5391_v42  ;;  %v6581_v42 = vld [vmem:[%s9303_s1 + $0x3f0] ss:$12 sps:$4 sm:$0xff]   ;;  %v6635_v21 = vld [vmem:[%s9303_s1 + $0x4e0] ss:$12 sps:$4 sm:$0xff]  }
  0x84   :  { %3087 = vmatprep.subr.bf16.mxu0 %v6538_v62  ;;  %6085 = vmatprep.subr.bf16.mxu1 %v6627_v22  ;;  %v6673_v61 = vld [vmem:[%s9303_s1 + $0x6b0] ss:$12 sps:$4 sm:$0xff]   ;;  %v6676_v62 = vld [vmem:[%s9303_s1 + $0x848] ss:$12 sps:$4 sm:$0xff]  }
  0x85   :  { %v6642_v22 = vld [vmem:[%s9303_s1 + $0x4fc] ss:$12 sps:$4 sm:$0xff]  }
  0x86   :  { %6086 = vmatpush3.bf16.msra.mxu1 %v6631_v25  ;;  %v6640_v25 = vld [vmem:[%s9303_s1 + $0x4f8] ss:$12 sps:$4 sm:$0xff]  }
  0x87   :  { %3088 = vmatpush1.bf16.msra.mxu0 %v6536_v1  ;;  %6093 = vmatprep.subr.bf16.mxu1 %v6634_v26  ;;  %v7865_v1 = vcombine.low %v38_v36, %v38_v36  ;;  %v6647_v26 = vld [vmem:[%s9303_s1 + $0x514] ss:$12 sps:$4 sm:$0xff]   ;;  %v6657_v36 = vld [vmem:[%s9303_s1 + $0x544] ss:$12 sps:$4 sm:$0xff]  }
  0x88   :  { %3089 = vmatprep.subr.bf16.mxu0 %v6543_v2  ;;  %v6680_v2 = vld [vmem:[%s9303_s1 + $0x788] ss:$12 sps:$4 sm:$0xff]  }
  0x89   :  { %3525 = vmatmul.mubr.bf16.vlgmr.msra.gmra.mrb[12].mxu1 %v7757_v28 }
  0x8a   :  { %6094 = vmatpush3.bf16.msra.mxu1 %v6638_v30  ;;  %3564 = vmatprep.mubr.bf16.mxu1 %v7784_v37  ;;  %v6645_v30 = vld [vmem:[%s9303_s1 + $0x510] ss:$12 sps:$4 sm:$0xff]  }
  0x8b   :  { %3090 = vmatpush1.bf16.msra.mxu0 %v6541_v6  ;;  %6095 = vmatprep.subr.bf16.mxu1 %v6639_v31  ;;  %v6613_v6 = vld [vmem:[%s9303_s1 + $0x480] ss:$12 sps:$4 sm:$0xff]  }
  0x8c   :  { %3091 = vmatprep.subr.bf16.mxu0 %v6548_v8  ;;  %v6620_v8 = vld [vmem:[%s9303_s1 + $0x49c] ss:$12 sps:$4 sm:$0xff]   ;;  %v6652_v31 = vld [vmem:[%s9303_s1 + $0x52c] ss:$12 sps:$4 sm:$0xff]  }
  0x8e   :  { %6096 = vmatpush3.bf16.msra.mxu1 %v6643_v34  ;;  %v6718_v34 = vld [vmem:[%s9303_s1 + $0x9c8] ss:$12 sps:$4 sm:$0xff]  }
  0x8f   :  { %3092 = vmatpush1.bf16.msra.mxu0 %v6546_v11  ;;  %6097 = vmatprep.subr.bf16.mxu1 %v6644_v35  ;;  %v6618_v11 = vld [vmem:[%s9303_s1 + $0x498] ss:$12 sps:$4 sm:$0xff]   ;;  %v7976_v35 = vld [vmem:[%s9302_s0 + $0x30] sm:$0xff] }
  0x90   :  { %3093 = vmatprep.subr.bf16.mxu0 %v6553_v12  ;;  %v6625_v12 = vld [vmem:[%s9303_s1 + $0x4b4] ss:$12 sps:$4 sm:$0xff]  }
  0x92   :  { %6098 = vmatpush3.bf16.msra.mxu1 %v6648_v40  ;;  %v6723_v40 = vld [vmem:[%s9303_s1 + $0x9e0] ss:$12 sps:$4 sm:$0xff]  }
  0x93   :  { %3094 = vmatpush1.bf16.msra.mxu0 %v6551_v15  ;;  %6099 = vmatprep.subr.bf16.mxu1 %v6649_v41  ;;  %v6695_v15 = vld [vmem:[%s9303_s1 + $0x7d0] ss:$12 sps:$4 sm:$0xff]   ;;  %v7993_v41 = vcombine.high %v7976_v35, %v7976_v35 }
  0x94   :  { %3095 = vmatprep.subr.bf16.mxu0 %v6558_v16  ;;  %v6696_v16 = vld [vmem:[%s9303_s1 + $0x8a8] ss:$12 sps:$4 sm:$0xff]  }
  0x96   :  { %6100 = vmatpush3.bf16.msra.mxu1 %v6653_v44  ;;  %v6727_v44 = vld [vmem:[%s9303_s1 + $0x920] ss:$12 sps:$4 sm:$0xff]  }
  0x97   :  { %3096 = vmatpush1.bf16.msra.mxu0 %v6556_v19  ;;  %6101 = vmatprep.subr.bf16.mxu1 %v6654_v45  ;;  %v6700_v19 = vld [vmem:[%s9303_s1 + $0x7e8] ss:$12 sps:$4 sm:$0xff]   ;;  %v6728_v45 = vld [vmem:[%s9303_s1 + $0x9f8] ss:$12 sps:$4 sm:$0xff]  }
  0x98   :  { %3097 = vmatprep.subr.bf16.mxu0 %v6563_v20  ;;  %v6701_v20 = vld [vmem:[%s9303_s1 + $0x8c0] ss:$12 sps:$4 sm:$0xff]  }
  0x9a   :  { %6102 = vmatpush3.bf16.msra.mxu1 %v6658_v48  ;;  %v6732_v48 = vld [vmem:[%s9303_s1 + $0x938] ss:$12 sps:$4 sm:$0xff]  }
  0x9b   :  { %3098 = vmatpush1.bf16.msra.mxu0 %v6561_v23  ;;  %6103 = vmatprep.subr.bf16.mxu1 %v6659_v49  ;;  %v6705_v23 = vld [vmem:[%s9303_s1 + $0x800] ss:$12 sps:$4 sm:$0xff]   ;;  %v6733_v49 = vld [vmem:[%s9303_s1 + $0xa10] ss:$12 sps:$4 sm:$0xff]  }
  0x9c   :  { %3099 = vmatprep.subr.bf16.mxu0 %v6568_v24  ;;  %v6706_v24 = vld [vmem:[%s9303_s1 + $0x8d8] ss:$12 sps:$4 sm:$0xff]  }
  0x9e   :  { %6104 = vmatpush3.bf16.msra.mxu1 %v6663_v52  ;;  %v6737_v52 = vld [vmem:[%s9303_s1 + $0x950] ss:$12 sps:$4 sm:$0xff]  }
  0x9f   :  { %3100 = vmatpush1.bf16.msra.mxu0 %v6566_v27  ;;  %6105 = vmatprep.subr.bf16.mxu1 %v6664_v53  ;;  %v6710_v27 = vld [vmem:[%s9303_s1 + $0x818] ss:$12 sps:$4 sm:$0xff]   ;;  %v6738_v53 = vld [vmem:[%s9303_s1 + $0xa28] ss:$12 sps:$4 sm:$0xff]  }
  0xa0   :  { %3101 = vmatprep.subr.bf16.mxu0 %v6573_v29  ;;  %v6711_v29 = vld [vmem:[%s9303_s1 + $0x8f0] ss:$12 sps:$4 sm:$0xff]  }
  0xa2   :  { %6106 = vmatpush3.bf16.msra.mxu1 %v6668_v56  ;;  %v6742_v56 = vld [vmem:[%s9303_s1 + $0x968] ss:$12 sps:$4 sm:$0xff]  }
  0xa3   :  { %3102 = vmatpush1.bf16.msra.mxu0 %v6571_v32  ;;  %6107 = vmatprep.subr.bf16.mxu1 %v6669_v57  ;;  %v6715_v32 = vld [vmem:[%s9303_s1 + $0x830] ss:$12 sps:$4 sm:$0xff]   ;;  %v6743_v57 = vld [vmem:[%s9303_s1 + $0xa40] ss:$12 sps:$4 sm:$0xff]  }
  0xa4   :  { %3103 = vmatprep.subr.bf16.mxu0 %v6578_v33  ;;  %v6650_v33 = vld [vmem:[%s9303_s1 + $0x528] ss:$12 sps:$4 sm:$0xff]  }
  0xa6   :  { %6108 = vmatpush3.bf16.msra.mxu1 %v6673_v61  ;;  %v6747_v61 = vld [vmem:[%s9303_s1 + $0x980] ss:$12 sps:$4 sm:$0xff]  }
  0xa7   :  { %3104 = vmatpush1.bf16.msra.mxu0 %v6576_v38  ;;  %6115 = vmatprep.subr.bf16.mxu1 %v6676_v62  ;;  %v7983_v38 = vcombine.low %v7873_v3, %v7873_v3  ;;  %v6748_v62 = vld [vmem:[%s9303_s1 + $0xa58] ss:$12 sps:$4 sm:$0xff]   ;;  %v6753_v3 = vld [vmem:[%s9303_s1 + $0xa70] ss:$12 sps:$4 sm:$0xff]  }
  0xa8   :  { %3105 = vmatprep.subr.bf16.mxu0 %v6583_v39  ;;  %v6722_v39 = vld [vmem:[%s9303_s1 + $0x908] ss:$12 sps:$4 sm:$0xff]  }
  0xa9   :  { %3565 = vmatmul.mubr.bf16.vlgmr.msra.gmra.mrb[16].mxu1 %v7865_v1 }
  0xaa   :  { %6116 = vmatpush3.bf16.msra.mxu1 %v6680_v2  ;;  %3604 = vmatprep.mubr.bf16.mxu1 %v7880_v5  ;;  %v6752_v2 = vld [vmem:[%s9303_s1 + $0x998] ss:$12 sps:$4 sm:$0xff]  }
  0xab   :  { %3106 = vmatpush1.bf16.msra.mxu0 %v6581_v42  ;;  %6117 = vmatprep.subr.bf16.mxu1 %v6681_v4  ;;  %v6655_v42 = vld [vmem:[%s9303_s1 + $0x540] ss:$12 sps:$4 sm:$0xff]   ;;  %v6687_v4 = vld [vmem:[%s9303_s1 + $0x5d0] ss:$12 sps:$4 sm:$0xff]  }
  0xac   :  { %3107 = vmatprep.subr.bf16.mxu0 %v6588_v43  ;;  %v6662_v43 = vld [vmem:[%s9303_s1 + $0x55c] ss:$12 sps:$4 sm:$0xff]  }
  0xae   :  { %6118 = vmatpush3.bf16.msra.mxu1 %v6685_v9  ;;  %v6760_v9 = vld [vmem:[%s9303_s1 + $0xb48] ss:$12 sps:$4 sm:$0xff]  }
  0xaf   :  { %3108 = vmatpush1.bf16.msra.mxu0 %v6586_v46  ;;  %6119 = vmatprep.subr.bf16.mxu1 %v6686_v10  ;;  %v6660_v46 = vld [vmem:[%s9303_s1 + $0x558] ss:$12 sps:$4 sm:$0xff]  }
  0xb0   :  { %3109 = vmatprep.subr.bf16.mxu0 %v6595_v47  ;;  %v6667_v47 = vld [vmem:[%s9303_s1 + $0x574] ss:$12 sps:$4 sm:$0xff]   ;;  %v8084_v10 = vld [vmem:[%s9302_s0 + $0x38] sm:$0xff] }
  0xb2   :  { %6120 = vmatpush3.bf16.msra.mxu1 %v6690_v13  ;;  %v8094_v13 = vcombine.low %v7976_v35, %v7976_v35  ;;  %v6731_v35 = vld [vmem:[%s9303_s1 + $0x694] ss:$12 sps:$4 sm:$0xff]  }
  0xb3   :  { %3110 = vmatpush1.bf16.msra.mxu0 %v6593_v50  ;;  %v6665_v50 = vld [vmem:[%s9303_s1 + $0x570] ss:$12 sps:$4 sm:$0xff]  }
  0xb4   :  { %3111 = vmatprep.subr.bf16.mxu0 %v6600_v51  ;;  %v6672_v51 = vld [vmem:[%s9303_s1 + $0x58c] ss:$12 sps:$4 sm:$0xff]  }
  0xb7   :  { %3112 = vmatpush1.bf16.msra.mxu0 %v6598_v54  ;;  %v6670_v54 = vld [vmem:[%s9303_s1 + $0x588] ss:$12 sps:$4 sm:$0xff]  }
  0xb8   :  { %3113 = vmatprep.subr.bf16.mxu0 %v6605_v55  ;;  %v6679_v55 = vld [vmem:[%s9303_s1 + $0x5a4] ss:$12 sps:$4 sm:$0xff]  }
  0xbb   :  { %3114 = vmatpush1.bf16.msra.mxu0 %v6603_v59  ;;  %v6677_v59 = vld [vmem:[%s9303_s1 + $0x5a0] ss:$12 sps:$4 sm:$0xff]  }
  0xbc   :  { %3115 = vmatprep.subr.bf16.mxu0 %v6610_v60  ;;  %v6684_v60 = vld [vmem:[%s9303_s1 + $0x5bc] ss:$12 sps:$4 sm:$0xff]  }
  0xbf   :  { %3116 = vmatpush1.bf16.msra.mxu0 %v6608_v63  ;;  %v6682_v63 = vld [vmem:[%s9303_s1 + $0x5b8] ss:$12 sps:$4 sm:$0xff]  }
  0xc0   :  { %3126 = vmatprep.subr.bf16.mxu0 %v6615_v0  ;;  %v6689_v0 = vld [vmem:[%s9303_s1 + $0x5d4] ss:$12 sps:$4 sm:$0xff]  }
  0xc2   :  { %3118 = vmatmul.mubr.bf16.vlgmr.msra.gmra.mrb[0].mxu0 %v7654_v58  ;;  %v6691_v58 = vld [vmem:[%s9303_s1 + $0x890] ss:$12 sps:$4 sm:$0xff]  }
  0xc3   :  { %3127 = vmatpush1.bf16.msra.mxu0 %v6613_v6  ;;  %3158 = vmatprep.mubr.bf16.mxu0 %v7694_v7  ;;  %v6630_v7 = vld [vmem:[%s9303_s1 + $0x4cc] ss:$12 sps:$4 sm:$0xff]  }
  0xc4   :  { %3128 = vmatprep.subr.bf16.mxu0 %v6620_v8  ;;  %6121 = vmatprep.subr.bf16.mxu1 %v6691_v58  ;;  %v6694_v6 = vld [vmem:[%s9303_s1 + $0x5ec] ss:$12 sps:$4 sm:$0xff]   ;;  %v6757_v8 = vld [vmem:[%s9303_s1 + $0x9b0] ss:$12 sps:$4 sm:$0xff]   ;;  %v6764_v58 = vld [vmem:[%s9303_s1 + $0xa88] ss:$12 sps:$4 sm:$0xff]  }
  0xc5   :  { %6122 = vmatpush3.bf16.msra.mxu1 %v6695_v15  ;;  %v6697_v15 = vld [vmem:[%s9303_s1 + $0x600] ss:$12 sps:$4 sm:$0xff]  }
  0xc6   :  { %6123 = vmatprep.subr.bf16.mxu1 %v6696_v16  ;;  %v6704_v16 = vld [vmem:[%s9303_s1 + $0x61c] ss:$12 sps:$4 sm:$0xff]  }
  0xc7   :  { %3129 = vmatpush1.bf16.msra.mxu0 %v6618_v11  ;;  %v6692_v11 = vld [vmem:[%s9303_s1 + $0x5e8] ss:$12 sps:$4 sm:$0xff]  }
  0xc8   :  { %3130 = vmatprep.subr.bf16.mxu0 %v6625_v12  ;;  %v6699_v12 = vld [vmem:[%s9303_s1 + $0x604] ss:$12 sps:$4 sm:$0xff]  }
  0xc9   :  { %6124 = vmatpush3.bf16.msra.mxu1 %v6700_v19  ;;  %v6702_v19 = vld [vmem:[%s9303_s1 + $0x618] ss:$12 sps:$4 sm:$0xff]  }
  0xca   :  { %6125 = vmatprep.subr.bf16.mxu1 %v6701_v20  ;;  %v6709_v20 = vld [vmem:[%s9303_s1 + $0x634] ss:$12 sps:$4 sm:$0xff]  }
  0xcb   :  { %3131 = vmatpush1.bf16.msra.mxu0 %v6623_v14  ;;  %v6765_v14 = vld [vmem:[%s9303_s1 + $0xb60] ss:$12 sps:$4 sm:$0xff]  }
  0xcc   :  { %3132 = vmatprep.subr.bf16.mxu0 %v6630_v7  ;;  %v8104_v7 = vcombine.high %v8084_v10, %v8084_v10 }
  0xcd   :  { %6126 = vmatpush3.bf16.msra.mxu1 %v6705_v23  ;;  %v6779_v23 = vld [vmem:[%s9303_s1 + $0xad0] ss:$12 sps:$4 sm:$0xff]  }
  0xce   :  { %6127 = vmatprep.subr.bf16.mxu1 %v6706_v24  ;;  %v6780_v24 = vld [vmem:[%s9303_s1 + $0xba8] ss:$12 sps:$4 sm:$0xff]  }
  0xcf   :  { %3133 = vmatpush1.bf16.msra.mxu0 %v6628_v17  ;;  %v6769_v17 = vld [vmem:[%s9303_s1 + $0xaa0] ss:$12 sps:$4 sm:$0xff]  }
  0xd0   :  { %3134 = vmatprep.subr.bf16.mxu0 %v6637_v18  ;;  %v6770_v18 = vld [vmem:[%s9303_s1 + $0xb78] ss:$12 sps:$4 sm:$0xff]  }
  0xd1   :  { %6128 = vmatpush3.bf16.msra.mxu1 %v6710_v27  ;;  %v6784_v27 = vld [vmem:[%s9303_s1 + $0xae8] ss:$12 sps:$4 sm:$0xff]  }
  0xd2   :  { %6129 = vmatprep.subr.bf16.mxu1 %v6711_v29  ;;  %v6785_v29 = vld [vmem:[%s9303_s1 + $0xbc0] ss:$12 sps:$4 sm:$0xff]  }
  0xd3   :  { %3135 = vmatpush1.bf16.msra.mxu0 %v6635_v21  ;;  %v6774_v21 = vld [vmem:[%s9303_s1 + $0xab8] ss:$12 sps:$4 sm:$0xff]  }
  0xd4   :  { %3136 = vmatprep.subr.bf16.mxu0 %v6642_v22  ;;  %v6707_v22 = vld [vmem:[%s9303_s1 + $0x630] ss:$12 sps:$4 sm:$0xff]  }
  0xd5   :  { %6130 = vmatpush3.bf16.msra.mxu1 %v6715_v32  ;;  %v6789_v32 = vld [vmem:[%s9303_s1 + $0xb00] ss:$12 sps:$4 sm:$0xff]  }
  0xd6   :  { %6137 = vmatprep.subr.bf16.mxu1 %v6718_v34  ;;  %v6724_v34 = vld [vmem:[%s9303_s1 + $0x678] ss:$12 sps:$4 sm:$0xff]  }
  0xd7   :  { %3137 = vmatpush1.bf16.msra.mxu0 %v6640_v25  ;;  %v6712_v25 = vld [vmem:[%s9303_s1 + $0x648] ss:$12 sps:$4 sm:$0xff]  }
  0xd8   :  { %3138 = vmatprep.subr.bf16.mxu0 %v6647_v26  ;;  %3605 = vmatmul.mubr.bf16.vlgmr.msra.gmra.mrb[20].mxu1 %v7983_v38  ;;  %v6721_v26 = vld [vmem:[%s9303_s1 + $0x664] ss:$12 sps:$4 sm:$0xff]  }
  0xd9   :  { %6138 = vmatpush3.bf16.msra.mxu1 %v6722_v39  ;;  %3644 = vmatprep.mubr.bf16.mxu1 %v7993_v41  ;;  %v6795_v39 = vld [vmem:[%s9303_s1 + $0xbf0] ss:$12 sps:$4 sm:$0xff]  }
  0xda   :  { %6139 = vmatprep.subr.bf16.mxu1 %v6723_v40  ;;  %v6729_v40 = vld [vmem:[%s9303_s1 + $0x690] ss:$12 sps:$4 sm:$0xff]  }
  0xdb   :  { %3139 = vmatpush1.bf16.msra.mxu0 %v6645_v30  ;;  %v6719_v30 = vld [vmem:[%s9303_s1 + $0x660] ss:$12 sps:$4 sm:$0xff]  }
  0xdc   :  { %3140 = vmatprep.subr.bf16.mxu0 %v6652_v31  ;;  %v6726_v31 = vld [vmem:[%s9303_s1 + $0x67c] ss:$12 sps:$4 sm:$0xff]  }
  0xdd   :  { %6140 = vmatpush3.bf16.msra.mxu1 %v6727_v44  ;;  %v6802_v44 = vld [vmem:[%s9303_s1 + $0xcc8] ss:$12 sps:$4 sm:$0xff]  }
  0xde   :  { %6141 = vmatprep.subr.bf16.mxu1 %v6728_v45  ;;  %v6734_v45 = vld [vmem:[%s9303_s1 + $0x6a8] ss:$12 sps:$4 sm:$0xff]  }
  0xdf   :  { %3141 = vmatpush1.bf16.msra.mxu0 %v6650_v33  ;;  %v6790_v33 = vld [vmem:[%s9303_s1 + $0xbd8] ss:$12 sps:$4 sm:$0xff]  }
  0xe0   :  { %3142 = vmatprep.subr.bf16.mxu0 %v6657_v36  ;;  %v6794_v36 = vld [vmem:[%s9303_s1 + $0xb18] ss:$12 sps:$4 sm:$0xff]  }
  0xe1   :  { %6142 = vmatpush3.bf16.msra.mxu1 %v6732_v48  ;;  %v8207_v48 = vcombine.low %v8084_v10, %v8084_v10  ;;  %v6831_v10 = vld [vmem:[%s9303_s1 + $0xc80] ss:$12 sps:$4 sm:$0xff]  }
  0xe2   :  { %6143 = vmatprep.subr.bf16.mxu1 %v6733_v49  ;;  %v6806_v49 = vld [vmem:[%s9303_s1 + $0xc08] ss:$12 sps:$4 sm:$0xff]  }
  0xe3   :  { %3143 = vmatpush1.bf16.msra.mxu0 %v6655_v42  ;;  %v6736_v42 = vld [vmem:[%s9303_s1 + $0x6ac] ss:$12 sps:$4 sm:$0xff]  }
  0xe4   :  { %3144 = vmatprep.subr.bf16.mxu0 %v6662_v43  ;;  %v6799_v43 = vld [vmem:[%s9303_s1 + $0xb30] ss:$12 sps:$4 sm:$0xff]  }
  0xe5   :  { %6144 = vmatpush3.bf16.msra.mxu1 %v6737_v52 }
  0xe6   :  { %6145 = vmatprep.subr.bf16.mxu1 %v6738_v53  ;;  %v6746_v53 = vld [vmem:[%s9303_s1 + $0x6dc] ss:$12 sps:$4 sm:$0xff]  }
  0xe7   :  { %3145 = vmatpush1.bf16.msra.mxu0 %v6660_v46  ;;  %v8200_v46 = vld [vmem:[%s9302_s0 + $0x40] sm:$0xff] }
  0xe8   :  { %3146 = vmatprep.subr.bf16.mxu0 %v6667_v47  ;;  %v6741_v47 = vld [vmem:[%s9303_s1 + $0x6c4] ss:$12 sps:$4 sm:$0xff]   ;;  %v8220_v52 = vcombine.high %v8200_v46, %v8200_v46 }
  0xe9   :  { %6146 = vmatpush3.bf16.msra.mxu1 %v6742_v56  ;;  %v6744_v56 = vld [vmem:[%s9303_s1 + $0x6d8] ss:$12 sps:$4 sm:$0xff]  }
  0xea   :  { %6147 = vmatprep.subr.bf16.mxu1 %v6743_v57  ;;  %v6751_v57 = vld [vmem:[%s9303_s1 + $0x6f4] ss:$12 sps:$4 sm:$0xff]  }
  0xeb   :  { %3147 = vmatpush1.bf16.msra.mxu0 %v6665_v50  ;;  %v6739_v50 = vld [vmem:[%s9303_s1 + $0x6c0] ss:$12 sps:$4 sm:$0xff]  }
  0xec   :  { %3148 = vmatprep.subr.bf16.mxu0 %v6672_v51  ;;  %v6807_v51 = vld [vmem:[%s9303_s1 + $0xce0] ss:$12 sps:$4 sm:$0xff]  }
  0xed   :  { %6148 = vmatpush3.bf16.msra.mxu1 %v6747_v61  ;;  %v6749_v61 = vld [vmem:[%s9303_s1 + $0x6f0] ss:$12 sps:$4 sm:$0xff]  }
  0xee   :  { %6149 = vmatprep.subr.bf16.mxu1 %v6748_v62  ;;  %v6756_v62 = vld [vmem:[%s9303_s1 + $0x70c] ss:$12 sps:$4 sm:$0xff]  }
  0xef   :  { %3149 = vmatpush1.bf16.msra.mxu0 %v6670_v54  ;;  %v6811_v54 = vld [vmem:[%s9303_s1 + $0xc20] ss:$12 sps:$4 sm:$0xff]  }
  0xf0   :  { %3150 = vmatprep.subr.bf16.mxu0 %v6679_v55  ;;  %v6812_v55 = vld [vmem:[%s9303_s1 + $0xcf8] ss:$12 sps:$4 sm:$0xff]  }
  0xf1   :  { %6150 = vmatpush3.bf16.msra.mxu1 %v6752_v2  ;;  %v6754_v2 = vld [vmem:[%s9303_s1 + $0x708] ss:$12 sps:$4 sm:$0xff]  }
  0xf2   :  { %6151 = vmatprep.subr.bf16.mxu1 %v6753_v3  ;;  %v6763_v3 = vld [vmem:[%s9303_s1 + $0x724] ss:$12 sps:$4 sm:$0xff]  }
  0xf3   :  { %3151 = vmatpush1.bf16.msra.mxu0 %v6677_v59  ;;  %v6816_v59 = vld [vmem:[%s9303_s1 + $0xc38] ss:$12 sps:$4 sm:$0xff]  }
  0xf4   :  { %3152 = vmatprep.subr.bf16.mxu0 %v6684_v60  ;;  %v6817_v60 = vld [vmem:[%s9303_s1 + $0xd10] ss:$12 sps:$4 sm:$0xff]  }
  0xf5   :  { %6152 = vmatpush3.bf16.msra.mxu1 %v6757_v8  ;;  %v6761_v8 = vld [vmem:[%s9303_s1 + $0x720] ss:$12 sps:$4 sm:$0xff]  }
  0xf6   :  { %6159 = vmatprep.subr.bf16.mxu1 %v6760_v9  ;;  %v6768_v9 = vld [vmem:[%s9303_s1 + $0x73c] ss:$12 sps:$4 sm:$0xff]  }
  0xf7   :  { %3153 = vmatpush1.bf16.msra.mxu0 %v6682_v63  ;;  %v6821_v63 = vld [vmem:[%s9303_s1 + $0xc50] ss:$12 sps:$4 sm:$0xff]  }
  0xf8   :  { %3154 = vmatprep.subr.bf16.mxu0 %v6689_v0  ;;  %3645 = vmatmul.mubr.bf16.vlgmr.msra.gmra.mrb[24].mxu1 %v8094_v13  ;;  %v6822_v0 = vld [vmem:[%s9303_s1 + $0xd28] ss:$12 sps:$4 sm:$0xff]  }
  0xf9   :  { %6160 = vmatpush3.bf16.msra.mxu1 %v6764_v58  ;;  %3684 = vmatprep.mubr.bf16.mxu1 %v8104_v7  ;;  %v6773_v58 = vld [vmem:[%s9303_s1 + $0x754] ss:$12 sps:$4 sm:$0xff]  }
  0xfa   :  { %6161 = vmatprep.subr.bf16.mxu1 %v6765_v14  ;;  %v6836_v14 = vld [vmem:[%s9303_s1 + $0xc98] ss:$12 sps:$4 sm:$0xff]  }
  0xfb   :  { %3155 = vmatpush1.bf16.msra.mxu0 %v6687_v4  ;;  %v6826_v4 = vld [vmem:[%s9303_s1 + $0xc68] ss:$12 sps:$4 sm:$0xff]  }
  0xfc   :  { %3156 = vmatprep.subr.bf16.mxu0 %v6694_v6  ;;  %v6827_v6 = vld [vmem:[%s9303_s1 + $0xd40] ss:$12 sps:$4 sm:$0xff]  }
  0xfd   :  { %6162 = vmatpush3.bf16.msra.mxu1 %v6769_v17  ;;  %v6778_v17 = vld [vmem:[%s9303_s1 + $0x76c] ss:$12 sps:$4 sm:$0xff]  }
  0xfe   :  { %6163 = vmatprep.subr.bf16.mxu1 %v6770_v18  ;;  %v6841_v18 = vld [vmem:[%s9303_s1 + $0xcb0] ss:$12 sps:$4 sm:$0xff]  }
  0xff   :  { %3157 = vmatpush1.bf16.msra.mxu0 %v6692_v11  ;;  %v6832_v11 = vld [vmem:[%s9303_s1 + $0xd58] ss:$12 sps:$4 sm:$0xff]  }
 0x100   :  { %3167 = vmatprep.subr.bf16.mxu0 %v6699_v12  ;;  %v6766_v12 = vld [vmem:[%s9303_s1 + $0x738] ss:$12 sps:$4 sm:$0xff]  }
 0x101   :  { %6164 = vmatpush3.bf16.msra.mxu1 %v6774_v21  ;;  %v8310_v21 = vcombine.low %v8200_v46, %v8200_v46  ;;  %v6844_v46 = vld [vmem:[%s9303_s1 + $0x8a0] ss:$12 sps:$4 sm:$0xff]  }
 0x102   :  { %3159 = vmatmul.mubr.bf16.vlgmr.msra.gmra.mrb[0].mxu0 %v7757_v28  ;;  %v6775_v28 = vld [vmem:[%s9303_s1 + $0xb90] ss:$12 sps:$4 sm:$0xff]  }
 0x103   :  { %3168 = vmatpush1.bf16.msra.mxu0 %v6697_v15  ;;  %3199 = vmatprep.mubr.bf16.mxu0 %v7784_v37  ;;  %v6714_v37 = vld [vmem:[%s9303_s1 + $0x64c] ss:$12 sps:$4 sm:$0xff]   ;;  %v6837_v15 = vld [vmem:[%s9303_s1 + $0xd70] ss:$12 sps:$4 sm:$0xff]  }
 0x104   :  { %3169 = vmatprep.subr.bf16.mxu0 %v6704_v16  ;;  %6165 = vmatprep.subr.bf16.mxu1 %v6775_v28  ;;  %v6771_v16 = vld [vmem:[%s9303_s1 + $0x750] ss:$12 sps:$4 sm:$0xff]   ;;  %v6781_v28 = vld [vmem:[%s9303_s1 + $0x780] ss:$12 sps:$4 sm:$0xff]  }
 0x105   :  { %6166 = vmatpush3.bf16.msra.mxu1 %v6779_v23  ;;  %v6793_v23 = vld [vmem:[%s9303_s1 + $0x7b4] ss:$12 sps:$4 sm:$0xff]  }
 0x106   :  { %6167 = vmatprep.subr.bf16.mxu1 %v6780_v24  ;;  %v6791_v24 = vld [vmem:[%s9303_s1 + $0x7b0] ss:$12 sps:$4 sm:$0xff]  }
 0x107   :  { %3170 = vmatpush1.bf16.msra.mxu0 %v6702_v19  ;;  %v6776_v19 = vld [vmem:[%s9303_s1 + $0x768] ss:$12 sps:$4 sm:$0xff]  }
 0x108   :  { %3171 = vmatprep.subr.bf16.mxu0 %v6709_v20  ;;  %v6783_v20 = vld [vmem:[%s9303_s1 + $0x784] ss:$12 sps:$4 sm:$0xff]  }
 0x109   :  { %6168 = vmatpush3.bf16.msra.mxu1 %v6784_v27  ;;  %v6810_v27 = vld [vmem:[%s9303_s1 + $0x7fc] ss:$12 sps:$4 sm:$0xff]  }
 0x10a   :  { %6169 = vmatprep.subr.bf16.mxu1 %v6785_v29  ;;  %v6808_v29 = vld [vmem:[%s9303_s1 + $0x7f8] ss:$12 sps:$4 sm:$0xff]  }
 0x10b   :  { %3172 = vmatpush1.bf16.msra.mxu0 %v6707_v22  ;;  %v6788_v22 = vld [vmem:[%s9303_s1 + $0x79c] ss:$12 sps:$4 sm:$0xff]  }
 0x10c   :  { %3173 = vmatprep.subr.bf16.mxu0 %v6714_v37  ;;  %v6786_v37 = vld [vmem:[%s9303_s1 + $0x798] ss:$12 sps:$4 sm:$0xff]  }
 0x10d   :  { %6170 = vmatpush3.bf16.msra.mxu1 %v6789_v32  ;;  %v6820_v32 = vld [vmem:[%s9303_s1 + $0x82c] ss:$12 sps:$4 sm:$0xff]  }
 0x10e   :  { %6171 = vmatprep.subr.bf16.mxu1 %v6790_v33  ;;  %v6818_v33 = vld [vmem:[%s9303_s1 + $0x828] ss:$12 sps:$4 sm:$0xff]  }
 0x10f   :  { %3174 = vmatpush1.bf16.msra.mxu0 %v6712_v25  ;;  %v6796_v25 = vld [vmem:[%s9303_s1 + $0x7c8] ss:$12 sps:$4 sm:$0xff]  }
 0x110   :  { %3175 = vmatprep.subr.bf16.mxu0 %v6721_v26  ;;  %v6803_v26 = vld [vmem:[%s9303_s1 + $0x7e0] ss:$12 sps:$4 sm:$0xff]  }
 0x111   :  { %6172 = vmatpush3.bf16.msra.mxu1 %v6794_v36  ;;  %v6830_v36 = vld [vmem:[%s9303_s1 + $0x85c] ss:$12 sps:$4 sm:$0xff]  }
 0x112   :  { %6173 = vmatprep.subr.bf16.mxu1 %v6795_v39  ;;  %v6828_v39 = vld [vmem:[%s9303_s1 + $0x858] ss:$12 sps:$4 sm:$0xff]  }
 0x113   :  { %3176 = vmatpush1.bf16.msra.mxu0 %v6719_v30  ;;  %v6815_v30 = vld [vmem:[%s9303_s1 + $0x814] ss:$12 sps:$4 sm:$0xff]  }
 0x114   :  { %3177 = vmatprep.subr.bf16.mxu0 %v6726_v31  ;;  %v6813_v31 = vld [vmem:[%s9303_s1 + $0x810] ss:$12 sps:$4 sm:$0xff]  }
 0x115   :  { %6174 = vmatpush3.bf16.msra.mxu1 %v6799_v43  ;;  %v6840_v43 = vld [vmem:[%s9303_s1 + $0x88c] ss:$12 sps:$4 sm:$0xff]  }
 0x116   :  { %6181 = vmatprep.subr.bf16.mxu1 %v6802_v44  ;;  %v6838_v44 = vld [vmem:[%s9303_s1 + $0x888] ss:$12 sps:$4 sm:$0xff]  }
 0x117   :  { %3178 = vmatpush1.bf16.msra.mxu0 %v6724_v34  ;;  %v6825_v34 = vld [vmem:[%s9303_s1 + $0x844] ss:$12 sps:$4 sm:$0xff]  }
 0x118   :  { %3179 = vmatprep.subr.bf16.mxu0 %v6731_v35  ;;  %3685 = vmatmul.mubr.bf16.vlgmr.msra.gmra.mrb[28].mxu1 %v8207_v48  ;;  %v6823_v35 = vld [vmem:[%s9303_s1 + $0x840] ss:$12 sps:$4 sm:$0xff]  }
 0x119   :  { %6182 = vmatpush3.bf16.msra.mxu1 %v6806_v49  ;;  %3724 = vmatprep.mubr.bf16.mxu1 %v8220_v52  ;;  %v6847_v49 = vld [vmem:[%s9303_s1 + $0x8b8] ss:$12 sps:$4 sm:$0xff]  }
 0x11a   :  { %6183 = vmatprep.subr.bf16.mxu1 %v6807_v51  ;;  %v6850_v51 = vld [vmem:[%s9303_s1 + $0x8d0] ss:$12 sps:$4 sm:$0xff]  }
 0x11b   :  { %3180 = vmatpush1.bf16.msra.mxu0 %v6729_v40  ;;  %v6835_v40 = vld [vmem:[%s9303_s1 + $0x874] ss:$12 sps:$4 sm:$0xff]  }
 0x11c   :  { %3181 = vmatprep.subr.bf16.mxu0 %v6736_v42  ;;  %v6833_v42 = vld [vmem:[%s9303_s1 + $0x870] ss:$12 sps:$4 sm:$0xff]  }
 0x11d   :  { %6184 = vmatpush3.bf16.msra.mxu1 %v6811_v54  ;;  %v6853_v54 = vld [vmem:[%s9303_s1 + $0x8e8] ss:$12 sps:$4 sm:$0xff]  }
 0x11e   :  { %6185 = vmatprep.subr.bf16.mxu1 %v6812_v55  ;;  %v6858_v55 = vld [vmem:[%s9303_s1 + $0x904] ss:$12 sps:$4 sm:$0xff]  }
 0x11f   :  { %3182 = vmatpush1.bf16.msra.mxu0 %v6734_v45  ;;  %v6846_v45 = vld [vmem:[%s9303_s1 + $0x8a4] ss:$12 sps:$4 sm:$0xff]  }
 0x120   :  { %3183 = vmatprep.subr.bf16.mxu0 %v6741_v47  ;;  %v6849_v47 = vld [vmem:[%s9303_s1 + $0x8bc] ss:$12 sps:$4 sm:$0xff]  }
 0x121   :  { %6186 = vmatpush3.bf16.msra.mxu1 %v6816_v59  ;;  %v6859_v59 = vld [vmem:[%s9303_s1 + $0x918] ss:$12 sps:$4 sm:$0xff]  }
 0x122   :  { %6187 = vmatprep.subr.bf16.mxu1 %v6817_v60  ;;  %v6864_v60 = vld [vmem:[%s9303_s1 + $0x934] ss:$12 sps:$4 sm:$0xff]  }
 0x123   :  { %3184 = vmatpush1.bf16.msra.mxu0 %v6739_v50  ;;  %v6852_v50 = vld [vmem:[%s9303_s1 + $0x8d4] ss:$12 sps:$4 sm:$0xff]  }
 0x124   :  { %3185 = vmatprep.subr.bf16.mxu0 %v6746_v53  ;;  %v6855_v53 = vld [vmem:[%s9303_s1 + $0x8ec] ss:$12 sps:$4 sm:$0xff]  }
 0x125   :  { %6188 = vmatpush3.bf16.msra.mxu1 %v6821_v63  ;;  %v6868_v63 = vld [vmem:[%s9303_s1 + $0x960] ss:$12 sps:$4 sm:$0xff]  }
 0x126   :  { %6189 = vmatprep.subr.bf16.mxu1 %v6822_v0  ;;  %v6873_v0 = vld [vmem:[%s9303_s1 + $0x97c] ss:$12 sps:$4 sm:$0xff]  }
 0x127   :  { %3186 = vmatpush1.bf16.msra.mxu0 %v6744_v56  ;;  %v6856_v56 = vld [vmem:[%s9303_s1 + $0x900] ss:$12 sps:$4 sm:$0xff]  }
 0x128   :  { %3187 = vmatprep.subr.bf16.mxu0 %v6751_v57  ;;  %v6861_v57 = vld [vmem:[%s9303_s1 + $0x91c] ss:$12 sps:$4 sm:$0xff]  }
 0x129   :  { %6190 = vmatpush3.bf16.msra.mxu1 %v6826_v4  ;;  %v6874_v4 = vld [vmem:[%s9303_s1 + $0x990] ss:$12 sps:$4 sm:$0xff]  }
 0x12a   :  { %6191 = vmatprep.subr.bf16.mxu1 %v6827_v6  ;;  %v6879_v6 = vld [vmem:[%s9303_s1 + $0x9ac] ss:$12 sps:$4 sm:$0xff]  }
 0x12b   :  { %3188 = vmatpush1.bf16.msra.mxu0 %v6749_v61  ;;  %v6862_v61 = vld [vmem:[%s9303_s1 + $0x930] ss:$12 sps:$4 sm:$0xff]  }
 0x12c   :  { %3189 = vmatprep.subr.bf16.mxu0 %v6756_v62  ;;  %v6865_v62 = vld [vmem:[%s9303_s1 + $0x948] ss:$12 sps:$4 sm:$0xff]  }
 0x12d   :  { %6192 = vmatpush3.bf16.msra.mxu1 %v6831_v10 }
 0x12e   :  { %6193 = vmatprep.subr.bf16.mxu1 %v6832_v11 }
 0x12f   :  { %3190 = vmatpush1.bf16.msra.mxu0 %v6754_v2  ;;  %v6871_v2 = vld [vmem:[%s9303_s1 + $0x978] ss:$12 sps:$4 sm:$0xff]  }
 0x130   :  { %3191 = vmatprep.subr.bf16.mxu0 %v6763_v3  ;;  %v6876_v3 = vld [vmem:[%s9303_s1 + $0x994] ss:$12 sps:$4 sm:$0xff]  }
 0x131   :  { %6194 = vmatpush3.bf16.msra.mxu1 %v6836_v14 }
 0x132   :  { %6195 = vmatprep.subr.bf16.mxu1 %v6837_v15 }
 0x133   :  { %3192 = vmatpush1.bf16.msra.mxu0 %v6761_v8  ;;  %v6877_v8 = vld [vmem:[%s9303_s1 + $0x9a8] ss:$12 sps:$4 sm:$0xff]  }
 0x134   :  { %3193 = vmatprep.subr.bf16.mxu0 %v6768_v9  ;;  %v6882_v9 = vld [vmem:[%s9303_s1 + $0x9c4] ss:$12 sps:$4 sm:$0xff]  }
 0x135   :  { %6196 = vmatpush3.bf16.msra.mxu1 %v6841_v18 }
 0x137   :  { %3194 = vmatpush1.bf16.msra.mxu0 %v6766_v12 }
 0x138   :  { %3195 = vmatprep.subr.bf16.mxu0 %v6773_v58  ;;  %3725 = vmatmul.mubr.bf16.vlgmr.msra.gmra.mrb[32].mxu1 %v8310_v21 }
 0x13b   :  { %3196 = vmatpush1.bf16.msra.mxu0 %v6771_v16 }
 0x13c   :  { %3197 = vmatprep.subr.bf16.mxu0 %v6778_v17 }
 0x13f   :  { %3198 = vmatpush1.bf16.msra.mxu0 %v6776_v19 }
 0x140   :  { %3208 = vmatprep.subr.bf16.mxu0 %v6783_v20 }
 0x142   :  { %3200 = vmatmul.mubr.bf16.vlgmr.msra.gmra.mrb[0].mxu0 %v7865_v1  ;;  %v6798_v1 = vld [vmem:[%s9303_s1 + $0x7cc] ss:$12 sps:$4 sm:$0xff]  }
 0x143   :  { %3209 = vmatpush1.bf16.msra.mxu0 %v6781_v28  ;;  %3240 = vmatprep.mubr.bf16.mxu0 %v7880_v5  ;;  %v6805_v5 = vld [vmem:[%s9303_s1 + $0x7e4] ss:$12 sps:$4 sm:$0xff]  }
 0x144   :  { %3210 = vmatprep.subr.bf16.mxu0 %v6788_v22 }
 0x147   :  { %3211 = vmatpush1.bf16.msra.mxu0 %v6786_v37 }
 0x148   :  { %3212 = vmatprep.subr.bf16.mxu0 %v6793_v23 }
 0x14b   :  { %3213 = vmatpush1.bf16.msra.mxu0 %v6791_v24 }
 0x14c   :  { %3214 = vmatprep.subr.bf16.mxu0 %v6798_v1 }
 0x14f   :  { %3215 = vmatpush1.bf16.msra.mxu0 %v6796_v25 }
 0x150   :  { %3216 = vmatprep.subr.bf16.mxu0 %v6805_v5 }
 0x153   :  { %3217 = vmatpush1.bf16.msra.mxu0 %v6803_v26 }
 0x154   :  { %3218 = vmatprep.subr.bf16.mxu0 %v6810_v27 }
 0x157   :  { %3219 = vmatpush1.bf16.msra.mxu0 %v6808_v29 }
 0x158   :  { %3220 = vmatprep.subr.bf16.mxu0 %v6815_v30 }
 0x15b   :  { %3221 = vmatpush1.bf16.msra.mxu0 %v6813_v31 }
 0x15c   :  { %3222 = vmatprep.subr.bf16.mxu0 %v6820_v32 }
 0x15f   :  { %3223 = vmatpush1.bf16.msra.mxu0 %v6818_v33 }
 0x160   :  { %3224 = vmatprep.subr.bf16.mxu0 %v6825_v34 }
 0x163   :  { %3225 = vmatpush1.bf16.msra.mxu0 %v6823_v35 }
 0x164   :  { %3226 = vmatprep.subr.bf16.mxu0 %v6830_v36 }
 0x167   :  { %3227 = vmatpush1.bf16.msra.mxu0 %v6828_v39 }
 0x168   :  { %3228 = vmatprep.subr.bf16.mxu0 %v6835_v40 }
 0x16b   :  { %3229 = vmatpush1.bf16.msra.mxu0 %v6833_v42 }
 0x16c   :  { %3230 = vmatprep.subr.bf16.mxu0 %v6840_v43 }
 0x16f   :  { %3231 = vmatpush1.bf16.msra.mxu0 %v6838_v44 }
 0x170   :  { %3232 = vmatprep.subr.bf16.mxu0 %v6846_v45 }
 0x173   :  { %3233 = vmatpush1.bf16.msra.mxu0 %v6844_v46 }
 0x174   :  { %3234 = vmatprep.subr.bf16.mxu0 %v6849_v47 }
 0x177   :  { %3235 = vmatpush1.bf16.msra.mxu0 %v6847_v49 }
 0x178   :  { %3236 = vmatprep.subr.bf16.mxu0 %v6852_v50 }
 0x17b   :  { %3237 = vmatpush1.bf16.msra.mxu0 %v6850_v51 }
 0x17c   :  { %3238 = vmatprep.subr.bf16.mxu0 %v6855_v53 }
 0x17f   :  { %3239 = vmatpush1.bf16.msra.mxu0 %v6853_v54 }
 0x180   :  { %3249 = vmatprep.subr.bf16.mxu0 %v6858_v55 }
 0x182   :  { %3241 = vmatmul.mubr.bf16.vlgmr.msra.gmra.mrb[0].mxu0 %v7983_v38  ;;  %v6867_v38 = vld [vmem:[%s9303_s1 + $0x94c] ss:$12 sps:$4 sm:$0xff]  }
 0x183   :  { %3250 = vmatpush1.bf16.msra.mxu0 %v6856_v56  ;;  %3281 = vmatprep.mubr.bf16.mxu0 %v7993_v41  ;;  %v6870_v41 = vld [vmem:[%s9303_s1 + $0x964] ss:$12 sps:$4 sm:$0xff]  }
 0x184   :  { %3251 = vmatprep.subr.bf16.mxu0 %v6861_v57 }
 0x187   :  { %3252 = vmatpush1.bf16.msra.mxu0 %v6859_v59 }
 0x188   :  { %3253 = vmatprep.subr.bf16.mxu0 %v6864_v60 }
 0x18b   :  { %3254 = vmatpush1.bf16.msra.mxu0 %v6862_v61 }
 0x18c   :  { %3255 = vmatprep.subr.bf16.mxu0 %v6867_v38 }
 0x18f   :  { %3256 = vmatpush1.bf16.msra.mxu0 %v6865_v62 }
 0x190   :  { %3257 = vmatprep.subr.bf16.mxu0 %v6870_v41 }
 0x193   :  { %3258 = vmatpush1.bf16.msra.mxu0 %v6868_v63 }
 0x194   :  { %3259 = vmatprep.subr.bf16.mxu0 %v6873_v0 }
 0x197   :  { %3260 = vmatpush1.bf16.msra.mxu0 %v6871_v2 }
 0x198   :  { %3261 = vmatprep.subr.bf16.mxu0 %v6876_v3 }
 0x19b   :  { %3262 = vmatpush1.bf16.msra.mxu0 %v6874_v4 }
 0x19c   :  { %3263 = vmatprep.subr.bf16.mxu0 %v6879_v6 }
 0x19d   :  { %14 = vsyncpa [#allocation3], 0  ;;  %v6880_v10 = vld [vmem:[%s9303_s1 + $0x9c0] ss:$12 sps:$4 sm:$0xff]   ;;  %v6885_v11 = vld [vmem:[%s9303_s1 + $0x9dc] ss:$12 sps:$4 sm:$0xff]   ;;  %v621_v14 = vlaneseq }
 0x19e   :  { %v6883_v12 = vld [vmem:[%s9303_s1 + $0x9d8] ss:$12 sps:$4 sm:$0xff]   ;;  %v6021_v58 = vpop.f32.mrb[0].mxu1  ;;  %v6888_v15 = vld [vmem:[%s9303_s1 + $0x9f4] ss:$12 sps:$4 sm:$0xff]   ;;  %vm7241_vm0 = vmmov 0  }
 0x19f   :  { %3264 = vmatpush1.bf16.msra.mxu0 %v6877_v8  ;;  %v6022_v16 = vpop.f32.mrb[1].mxu1  ;;  %v8473_v17 = vshrl.u32 %v621_v14, 7  ;;  %v8478_v20 = vld [vmem:[%s9304_s2] sm:$0x7]  ;;  %v6886_v22 = vld [vmem:[%s9303_s1 + $0x9f0] ss:$12 sps:$4 sm:$0xff]  }
 0x1a0   :  { %3265 = vmatprep.subr.bf16.mxu0 %v6882_v9  ;;  %v6023_v18 = vadd.f32 %v6022_v16, %v6021_v58  ;;  %v6024_v19 = vpop.f32.mrb[2].mxu1  ;;  %v6891_v24 = vld [vmem:[%s9303_s1 + $0xa0c] ss:$12 sps:$4 sm:$0xff]   ;;  %v6889_v29 = vld [vmem:[%s9303_s1 + $0xa08] ss:$12 sps:$4 sm:$0xff]   ;;  %s7243_s2 = smov [#allocation2]  }
 0x1a1   :  { %v6025_v28 = vpop.f32.mrb[3].mxu1  ;;  %v8484_v37 = vsub.s32 2, %v8473_v17  ;;  %v6894_v32 = vld [vmem:[%s9303_s1 + $0xa24] ss:$12 sps:$4 sm:$0xff]   ;;  %v6892_v40 = vld [vmem:[%s9303_s1 + $0xa20] ss:$12 sps:$4 sm:$0xff]  }
 0x1a2   :  { %v6043_v23 = vpop.f32.mrb[4].mxu1  ;;  %v6897_v44 = vld [vmem:[%s9303_s1 + $0xa3c] ss:$12 sps:$4 sm:$0xff]   ;;  %v6895_v50 = vld [vmem:[%s9303_s1 + $0xa38] ss:$12 sps:$4 sm:$0xff]   ;;  %s5378_s25 = sshll.u32 %s7243_s2, 4  ;;  %s5379_s25 = int_to_ptr.vmem [resolvable:$true] %s5378_s25 }
 0x1a3   :  { %3266 = vmatpush1.bf16.msra.mxu0 %v6880_v10  ;;  %v6044_v1 = vpop.f32.mrb[5].mxu1  ;;  %v632_v25 = vrot.slane %v8478_v20, %v8484_v37  ;;  %v6900_v54 = vld [vmem:[%s9303_s1 + $0xa54] ss:$12 sps:$4 sm:$0xff]   ;;  %v6898_v60 = vld [vmem:[%s9303_s1 + $0xa50] ss:$12 sps:$4 sm:$0xff]   ;;  %p7221_p1 = scmp.lt.s32.totalorder %s5379_s25, %s5379_s25 }
 0x1a4   :  { %3267 = vmatprep.subr.bf16.mxu0 %v6885_v11  ;;  %v6045_v5 = vadd.f32 %v6044_v1, %v6043_v23  ;;  %v6046_v26 = vpop.f32.mrb[6].mxu1  ;;  %v6903_v62 = vld [vmem:[%s9303_s1 + $0xa6c] ss:$12 sps:$4 sm:$0xff]   ;;  %v6901_v3 = vld [vmem:[%s9303_s1 + $0xa68] ss:$12 sps:$4 sm:$0xff]  }
 0x1a5   :  { %v6047_v27 = vpop.f32.mrb[7].mxu1  ;;  %v3407_v30 = vadd.f32 %v6023_v18, %v632_v25  ;;  %v6906_v6 = vld [vmem:[%s9303_s1 + $0xa84] ss:$12 sps:$4 sm:$0xff]   ;;  %v6904_v8 = vld [vmem:[%s9303_s1 + $0xa80] ss:$12 sps:$4 sm:$0xff]  }
 0x1a6   :  { %v6065_v31 = vpop.f32.mrb[8].mxu1  ;;  %v6909_v9 = vld [vmem:[%s9303_s1 + $0xa9c] ss:$12 sps:$4 sm:$0xff]   ;;  %v7000_v10 = vld [vmem:[%s9305_s3] ss:$12 sps:$4 sm:$0xff]  }
 0x1a7   :  { %3268 = vmatpush1.bf16.msra.mxu0 %v6883_v12  ;;  %v6066_v33 = vpop.f32.mrb[9].mxu1  ;;  %v3447_v34 = vadd.f32 %v6045_v5, %v3407_v30  ;;  %v7002_v11 = vld [vmem:[%s9305_s3 + $0x4] ss:$12 sps:$4 sm:$0xff]   ;;  %v7005_v58 = vld [vmem:[%s9305_s3 + $0x1c] ss:$12 sps:$4 sm:$0xff]  }
 0x1a8   :  { %3269 = vmatprep.subr.bf16.mxu0 %v6888_v15  ;;  %v6067_v35 = vadd.f32 %v6066_v33, %v6065_v31  ;;  %v6068_v36 = vpop.f32.mrb[10].mxu1  ;;  %v6907_v12 = vld [vmem:[%s9303_s1 + $0xa98] ss:$12 sps:$4 sm:$0xff]   ;;  %4235 = vmatprep.subr.bf16.mxu1 %v7002_v11  ;;  %v6910_v15 = vld [vmem:[%s9303_s1 + $0xab0] ss:$12 sps:$4 sm:$0xff]  }
 0x1a9   :  { %v6069_v39 = vpop.f32.mrb[11].mxu1  ;;  %4236 = vmatpush1.bf16.msra.mxu1 %v7000_v10  ;;  %v7003_v14 = vld [vmem:[%s9305_s3 + $0x18] ss:$12 sps:$4 sm:$0xff]   ;;  %v7006_v18 = vld [vmem:[%s9305_s3 + $0x30] ss:$12 sps:$4 sm:$0xff]  }
 0x1aa   :  { %v3487_v42 = vadd.f32 %v6067_v35, %v3447_v34  ;;  %v6087_v43 = vpop.f32.mrb[12].mxu1  ;;  %4237 = vmatprep.subr.bf16.mxu1 %v7005_v58  ;;  %v6915_v16 = vld [vmem:[%s9303_s1 + $0xacc] ss:$12 sps:$4 sm:$0xff]   ;;  %v6913_v28 = vld [vmem:[%s9303_s1 + $0xac8] ss:$12 sps:$4 sm:$0xff]  }
 0x1ab   :  { %3270 = vmatpush1.bf16.msra.mxu0 %v6886_v22  ;;  %v6088_v45 = vpop.f32.mrb[13].mxu1  ;;  %v7011_v19 = vld [vmem:[%s9305_s3 + $0x4c] ss:$12 sps:$4 sm:$0xff]   ;;  %v6918_v22 = vld [vmem:[%s9303_s1 + $0xae4] ss:$12 sps:$4 sm:$0xff]  }
 0x1ac   :  { %3271 = vmatprep.subr.bf16.mxu0 %v6891_v24  ;;  %v6089_v46 = vadd.f32 %v6088_v45, %v6087_v43  ;;  %v6090_v47 = vpop.f32.mrb[14].mxu1  ;;  %v7009_v23 = vld [vmem:[%s9305_s3 + $0x48] ss:$12 sps:$4 sm:$0xff]   ;;  %v7014_v24 = vld [vmem:[%s9305_s3 + $0x64] ss:$12 sps:$4 sm:$0xff]  }
 0x1ad   :  { %v6091_v49 = vpop.f32.mrb[15].mxu1  ;;  %4238 = vmatpush1.bf16.msra.mxu1 %v7003_v14  ;;  %v6916_v1 = vld [vmem:[%s9303_s1 + $0xae0] ss:$12 sps:$4 sm:$0xff]   ;;  %v6921_v25 = vld [vmem:[%s9303_s1 + $0xafc] ss:$12 sps:$4 sm:$0xff]  }
 0x1ae   :  { %v3527_v51 = vadd.f32 %v6089_v46, %v3487_v42  ;;  %v6109_v53 = vpop.f32.mrb[16].mxu1  ;;  %v7012_v5 = vld [vmem:[%s9305_s3 + $0x60] ss:$12 sps:$4 sm:$0xff]   ;;  %v7017_v27 = vld [vmem:[%s9305_s3 + $0x7c] ss:$12 sps:$4 sm:$0xff]  }
 0x1af   :  { %3272 = vmatpush1.bf16.msra.mxu0 %v6889_v29  ;;  %v6110_v55 = vpop.f32.mrb[17].mxu1  ;;  %v6919_v29 = vld [vmem:[%s9303_s1 + $0xaf8] ss:$12 sps:$4 sm:$0xff]   ;;  %v6924_v31 = vld [vmem:[%s9303_s1 + $0xb14] ss:$12 sps:$4 sm:$0xff]  }
 0x1b0   :  { %3273 = vmatprep.subr.bf16.mxu0 %v6894_v32  ;;  %v6111_v56 = vadd.f32 %v6110_v55, %v6109_v53  ;;  %v6112_v57 = vpop.f32.mrb[18].mxu1  ;;  %v7015_v35 = vld [vmem:[%s9305_s3 + $0x78] ss:$12 sps:$4 sm:$0xff]   ;;  %v7020_v39 = vld [vmem:[%s9305_s3 + $0x94] ss:$12 sps:$4 sm:$0xff]  }
 0x1b1   :  { %v6113_v59 = vpop.f32.mrb[19].mxu1  ;;  %v6927_v42 = vld [vmem:[%s9303_s1 + $0xb2c] ss:$12 sps:$4 sm:$0xff]   ;;  %v7018_v43 = vld [vmem:[%s9305_s3 + $0x90] ss:$12 sps:$4 sm:$0xff]  }
 0x1b2   :  { %v3567_v61 = vadd.f32 %v6111_v56, %v3527_v51  ;;  %v6131_v38 = vpop.f32.mrb[20].mxu1  ;;  %v6925_v45 = vld [vmem:[%s9303_s1 + $0xb28] ss:$12 sps:$4 sm:$0xff]   ;;  %v6930_v46 = vld [vmem:[%s9303_s1 + $0xb44] ss:$12 sps:$4 sm:$0xff]  }
 0x1b3   :  { %3274 = vmatpush1.bf16.msra.mxu0 %v6892_v40  ;;  %v6132_v41 = vpop.f32.mrb[21].mxu1  ;;  %v6922_v40 = vld [vmem:[%s9303_s1 + $0xb10] ss:$12 sps:$4 sm:$0xff]   ;;  %v7021_v47 = vld [vmem:[%s9305_s3 + $0xa8] ss:$12 sps:$4 sm:$0xff]  }
 0x1b4   :  { %3275 = vmatprep.subr.bf16.mxu0 %v6897_v44  ;;  %v6133_v63 = vadd.f32 %v6132_v41, %v6131_v38  ;;  %v6134_v0 = vpop.f32.mrb[22].mxu1  ;;  %v7023_v44 = vld [vmem:[%s9305_s3 + $0xac] ss:$12 sps:$4 sm:$0xff]   ;;  %v7026_v49 = vld [vmem:[%s9305_s3 + $0xc4] ss:$12 sps:$4 sm:$0xff]  }
 0x1b5   :  { %v6135_v2 = vpop.f32.mrb[23].mxu1  ;;  %v6933_v51 = vld [vmem:[%s9303_s1 + $0xb5c] ss:$12 sps:$4 sm:$0xff]   ;;  %v7024_v53 = vld [vmem:[%s9305_s3 + $0xc0] ss:$12 sps:$4 sm:$0xff]  }
 0x1b6   :  { %v3607_v4 = vadd.f32 %v6133_v63, %v3567_v61  ;;  %v6931_v55 = vld [vmem:[%s9303_s1 + $0xb58] ss:$12 sps:$4 sm:$0xff]   ;;  %v6936_v56 = vld [vmem:[%s9303_s1 + $0xb74] ss:$12 sps:$4 sm:$0xff]   ;;  %v7030_v38 = vld [vmem:[%s9305_s3 + $0xf0] ss:$12 sps:$4 sm:$0xff]  }
 0x1b7   :  { %3276 = vmatpush1.bf16.msra.mxu0 %v6895_v50  ;;  %v6928_v50 = vld [vmem:[%s9303_s1 + $0xb40] ss:$12 sps:$4 sm:$0xff]   ;;  %v7027_v57 = vld [vmem:[%s9305_s3 + $0xd8] ss:$12 sps:$4 sm:$0xff]   ;;  %v6937_v41 = vld [vmem:[%s9303_s1 + $0xb88] ss:$12 sps:$4 sm:$0xff]  }
 0x1b8   :  { %3277 = vmatprep.subr.bf16.mxu0 %v6900_v54  ;;  %v7029_v54 = vld [vmem:[%s9305_s3 + $0xdc] ss:$12 sps:$4 sm:$0xff]   ;;  %v7032_v59 = vld [vmem:[%s9305_s3 + $0xf4] ss:$12 sps:$4 sm:$0xff]   ;;  %v6939_v61 = vld [vmem:[%s9303_s1 + $0xb8c] ss:$12 sps:$4 sm:$0xff]  }
 0x1b9   :  { %v6942_v63 = vld [vmem:[%s9303_s1 + $0xba4] ss:$12 sps:$4 sm:$0xff]   ;;  %v7033_v0 = vld [vmem:[%s9305_s3 + $0x108] ss:$12 sps:$4 sm:$0xff]  }
 0x1ba   :  { %v7038_v2 = vld [vmem:[%s9305_s3 + $0x124] ss:$12 sps:$4 sm:$0xff]  }
 0x1bb   :  { %3278 = vmatpush1.bf16.msra.mxu0 %v6898_v60  ;;  %v6934_v60 = vld [vmem:[%s9303_s1 + $0xb70] ss:$12 sps:$4 sm:$0xff]   ;;  %v6943_v10 = vld [vmem:[%s9303_s1 + $0xbb8] ss:$12 sps:$4 sm:$0xff]  }
 0x1bc   :  { %3279 = vmatprep.subr.bf16.mxu0 %v6903_v62  ;;  %v7035_v62 = vld [vmem:[%s9305_s3 + $0x10c] ss:$12 sps:$4 sm:$0xff]  }
 0x1bf   :  { %3280 = vmatpush1.bf16.msra.mxu0 %v6901_v3  ;;  %v6940_v3 = vld [vmem:[%s9303_s1 + $0xba0] ss:$12 sps:$4 sm:$0xff]  }
 0x1c0   :  { %3290 = vmatprep.subr.bf16.mxu0 %v6906_v6  ;;  %v7036_v6 = vld [vmem:[%s9305_s3 + $0x120] ss:$12 sps:$4 sm:$0xff]  }
 0x1c2   :  { %3282 = vmatmul.mubr.bf16.vlgmr.msra.gmra.mrb[0].mxu0 %v8094_v13  ;;  %v6912_v13 = vld [vmem:[%s9303_s1 + $0xab4] ss:$12 sps:$4 sm:$0xff]  }
 0x1c3   :  { %3291 = vmatpush1.bf16.msra.mxu0 %v6904_v8  ;;  %3322 = vmatprep.mubr.bf16.mxu0 %v8104_v7  ;;  %v7008_v7 = vld [vmem:[%s9305_s3 + $0x34] ss:$12 sps:$4 sm:$0xff]  }
 0x1c4   :  { %3292 = vmatprep.subr.bf16.mxu0 %v6909_v9  ;;  %4239 = vmatprep.subr.bf16.mxu1 %v7008_v7  ;;  %v7041_v9 = vld [vmem:[%s9305_s3 + $0x13c] ss:$12 sps:$4 sm:$0xff]   ;;  %v7039_v7 = vld [vmem:[%s9305_s3 + $0x138] ss:$12 sps:$4 sm:$0xff]  }
 0x1c5   :  { %4240 = vmatpush1.bf16.msra.mxu1 %v7006_v18  ;;  %v6951_v18 = vld [vmem:[%s9303_s1 + $0xbec] ss:$12 sps:$4 sm:$0xff]  }
 0x1c6   :  { %4241 = vmatprep.subr.bf16.mxu1 %v7011_v19  ;;  %v6949_v19 = vld [vmem:[%s9303_s1 + $0xbe8] ss:$12 sps:$4 sm:$0xff]  }
 0x1c7   :  { %3293 = vmatpush1.bf16.msra.mxu0 %v6907_v12  ;;  %v6948_v12 = vld [vmem:[%s9303_s1 + $0xbd4] ss:$12 sps:$4 sm:$0xff]  }
 0x1c8   :  { %3294 = vmatprep.subr.bf16.mxu0 %v6912_v13 }
 0x1c9   :  { %4242 = vmatpush1.bf16.msra.mxu1 %v7009_v23  ;;  %v6957_v23 = vld [vmem:[%s9303_s1 + $0xc1c] ss:$12 sps:$4 sm:$0xff]  }
 0x1ca   :  { %4243 = vmatprep.subr.bf16.mxu1 %v7014_v24  ;;  %v6955_v24 = vld [vmem:[%s9303_s1 + $0xc18] ss:$12 sps:$4 sm:$0xff]  }
 0x1cb   :  { %3295 = vmatpush1.bf16.msra.mxu0 %v6910_v15  ;;  %v6153_v26 = vpop.f32.mrb[24].mxu1 }
 0x1cc   :  { %3296 = vmatprep.subr.bf16.mxu0 %v6915_v16  ;;  %v6154_v30 = vpop.f32.mrb[25].mxu1  ;;  %v6946_v16 = vld [vmem:[%s9303_s1 + $0xbd0] ss:$12 sps:$4 sm:$0xff]  }
 0x1cd   :  { %v6155_v32 = vadd.f32 %v6154_v30, %v6153_v26  ;;  %v6156_v33 = vpop.f32.mrb[26].mxu1  ;;  %4244 = vmatpush1.bf16.msra.mxu1 %v7012_v5  ;;  %v6966_v5 = vld [vmem:[%s9303_s1 + $0xc64] ss:$12 sps:$4 sm:$0xff]   ;;  %v6964_v26 = vld [vmem:[%s9303_s1 + $0xc60] ss:$12 sps:$4 sm:$0xff]  }
 0x1ce   :  { %v6157_v34 = vpop.f32.mrb[27].mxu1  ;;  %4245 = vmatprep.subr.bf16.mxu1 %v7017_v27  ;;  %v6969_v27 = vld [vmem:[%s9303_s1 + $0xc7c] ss:$12 sps:$4 sm:$0xff]   ;;  %v6967_v30 = vld [vmem:[%s9303_s1 + $0xc78] ss:$12 sps:$4 sm:$0xff]  }
 0x1cf   :  { %3297 = vmatpush1.bf16.msra.mxu0 %v6913_v28  ;;  %v8595_v36 = vadd.f32 %v6155_v32, %v3607_v4  ;;  %v6945_v4 = vld [vmem:[%s9303_s1 + $0xbbc] ss:$12 sps:$4 sm:$0xff]   ;;  %v6954_v28 = vld [vmem:[%s9303_s1 + $0xc04] ss:$12 sps:$4 sm:$0xff]   ;;  %v6972_v32 = vld [vmem:[%s9303_s1 + $0xc94] ss:$12 sps:$4 sm:$0xff]  }
 0x1d0   :  { %3298 = vmatprep.subr.bf16.mxu0 %v6918_v22  ;;  %v6952_v22 = vld [vmem:[%s9303_s1 + $0xc00] ss:$12 sps:$4 sm:$0xff]  }
 0x1d1   :  { %4246 = vmatpush1.bf16.msra.mxu1 %v7015_v35 }
 0x1d2   :  { %4247 = vmatprep.subr.bf16.mxu1 %v7020_v39  ;;  %v6970_v39 = vld [vmem:[%s9303_s1 + $0xc90] ss:$12 sps:$4 sm:$0xff]  }
 0x1d3   :  { %3299 = vmatpush1.bf16.msra.mxu0 %v6916_v1  ;;  %v6960_v1 = vld [vmem:[%s9303_s1 + $0xc34] ss:$12 sps:$4 sm:$0xff]  }
 0x1d4   :  { %3300 = vmatprep.subr.bf16.mxu0 %v6921_v25  ;;  %v6958_v25 = vld [vmem:[%s9303_s1 + $0xc30] ss:$12 sps:$4 sm:$0xff]  }
 0x1d5   :  { %4248 = vmatpush1.bf16.msra.mxu1 %v7018_v43  ;;  %v6978_v43 = vld [vmem:[%s9303_s1 + $0xcc4] ss:$12 sps:$4 sm:$0xff]  }
 0x1d6   :  { %4249 = vmatprep.subr.bf16.mxu1 %v7023_v44  ;;  %v6976_v44 = vld [vmem:[%s9303_s1 + $0xcc0] ss:$12 sps:$4 sm:$0xff]  }
 0x1d7   :  { %3301 = vmatpush1.bf16.msra.mxu0 %v6919_v29 }
 0x1d8   :  { %3302 = vmatprep.subr.bf16.mxu0 %v6924_v31 }
 0x1d9   :  { %4250 = vmatpush1.bf16.msra.mxu1 %v7021_v47  ;;  %v6984_v47 = vld [vmem:[%s9303_s1 + $0xcf4] ss:$12 sps:$4 sm:$0xff]  }
 0x1da   :  { %4251 = vmatprep.subr.bf16.mxu1 %v7026_v49  ;;  %v6982_v49 = vld [vmem:[%s9303_s1 + $0xcf0] ss:$12 sps:$4 sm:$0xff]  }
 0x1db   :  { %3303 = vmatpush1.bf16.msra.mxu0 %v6922_v40  ;;  %v6975_v40 = vld [vmem:[%s9303_s1 + $0xcac] ss:$12 sps:$4 sm:$0xff]  }
 0x1dc   :  { %3304 = vmatprep.subr.bf16.mxu0 %v6927_v42  ;;  %v6973_v42 = vld [vmem:[%s9303_s1 + $0xca8] ss:$12 sps:$4 sm:$0xff]  }
 0x1dd   :  { %4252 = vmatpush1.bf16.msra.mxu1 %v7024_v53  ;;  %v6990_v53 = vld [vmem:[%s9303_s1 + $0xd24] ss:$12 sps:$4 sm:$0xff]  }
 0x1de   :  { %4253 = vmatprep.subr.bf16.mxu1 %v7029_v54  ;;  %v6988_v54 = vld [vmem:[%s9303_s1 + $0xd20] ss:$12 sps:$4 sm:$0xff]  }
 0x1df   :  { %3305 = vmatpush1.bf16.msra.mxu0 %v6925_v45  ;;  %v6981_v45 = vld [vmem:[%s9303_s1 + $0xcdc] ss:$12 sps:$4 sm:$0xff]  }
 0x1e0   :  { %3306 = vmatprep.subr.bf16.mxu0 %v6930_v46  ;;  %v6979_v46 = vld [vmem:[%s9303_s1 + $0xcd8] ss:$12 sps:$4 sm:$0xff]  }
 0x1e1   :  { %4254 = vmatpush1.bf16.msra.mxu1 %v7027_v57  ;;  %v6996_v57 = vld [vmem:[%s9303_s1 + $0xd54] ss:$12 sps:$4 sm:$0xff]  }
 0x1e2   :  { %4255 = vmatprep.subr.bf16.mxu1 %v7032_v59  ;;  %v6994_v59 = vld [vmem:[%s9303_s1 + $0xd50] ss:$12 sps:$4 sm:$0xff]  }
 0x1e3   :  { %3307 = vmatpush1.bf16.msra.mxu0 %v6928_v50  ;;  %v6987_v50 = vld [vmem:[%s9303_s1 + $0xd0c] ss:$12 sps:$4 sm:$0xff]  }
 0x1e4   :  { %3308 = vmatprep.subr.bf16.mxu0 %v6933_v51  ;;  %v6985_v51 = vld [vmem:[%s9303_s1 + $0xd08] ss:$12 sps:$4 sm:$0xff]  }
 0x1e5   :  { %4256 = vmatpush1.bf16.msra.mxu1 %v7030_v38  ;;  %v7044_v38 = vld [vmem:[%s9305_s3 + $0x154] ss:$12 sps:$4 sm:$0xff]  }
 0x1e6   :  { %4257 = vmatprep.subr.bf16.mxu1 %v7035_v62  ;;  %v7042_v62 = vld [vmem:[%s9305_s3 + $0x150] ss:$12 sps:$4 sm:$0xff]  }
 0x1e7   :  { %3309 = vmatpush1.bf16.msra.mxu0 %v6931_v55  ;;  %v6993_v55 = vld [vmem:[%s9303_s1 + $0xd3c] ss:$12 sps:$4 sm:$0xff]  }
 0x1e8   :  { %3310 = vmatprep.subr.bf16.mxu0 %v6936_v56  ;;  %v6991_v56 = vld [vmem:[%s9303_s1 + $0xd38] ss:$12 sps:$4 sm:$0xff]  }
 0x1e9   :  { %4258 = vmatpush1.bf16.msra.mxu1 %v7033_v0  ;;  %v7240_v0 = vmov 0.0  }
 0x1ea   :  { %4259 = vmatprep.subr.bf16.mxu1 %v7038_v2  ;;  %v8823_v2 = vsub.s32 0, %v8473_v17 }
 0x1eb   :  { %3311 = vmatpush1.bf16.msra.mxu0 %v6934_v60  ;;  %v6175_v8 = vpop.f32.mrb[28].mxu1  ;;  %v6999_v60 = vld [vmem:[%s9303_s1 + $0xd6c] ss:$12 sps:$4 sm:$0xff]  }
 0x1ec   :  { %3312 = vmatprep.subr.bf16.mxu0 %v6939_v61  ;;  %v6176_v11 = vpop.f32.mrb[29].mxu1  ;;  %v6997_v61 = vld [vmem:[%s9303_s1 + $0xd68] ss:$12 sps:$4 sm:$0xff]  }
 0x1ed   :  { %v6177_v58 = vadd.f32 %v6176_v11, %v6175_v8  ;;  %v6178_v13 = vpop.f32.mrb[30].mxu1  ;;  %4260 = vmatpush1.bf16.msra.mxu1 %v7036_v6 }
 0x1ee   :  { %v6179_v14 = vpop.f32.mrb[31].mxu1  ;;  %4261 = vmatprep.subr.bf16.mxu1 %v7041_v9 }
 0x1ef   :  { %3313 = vmatpush1.bf16.msra.mxu0 %v6937_v41  ;;  %v3687_v15 = vadd.f32 %v6177_v58, %v8595_v36  ;;  %v7047_v41 = vld [vmem:[%s9305_s3 + $0x16c] ss:$12 sps:$4 sm:$0xff]  }
 0x1f0   :  { %3314 = vmatprep.subr.bf16.mxu0 %v6942_v63  ;;  %v7045_v63 = vld [vmem:[%s9305_s3 + $0x168] ss:$12 sps:$4 sm:$0xff]  }
 0x1f1   :  { %4262 = vmatpush1.bf16.msra.mxu1 %v7039_v7 }
 0x1f2   :  { %4263 = vmatprep.subr.bf16.mxu1 %v7044_v38  ;;  %v7096_v38 = vld [vmem:[%s9307_s5] ss:$12 sps:$4 sm:$0xff]  }
 0x1f3   :  { %3315 = vmatpush1.bf16.msra.mxu0 %v6940_v3  ;;  %v8826_v3 = vsub.s32 1, %v8473_v17  ;;  %v7048_v17 = vld [vmem:[%s9305_s3 + $0x180] ss:$12 sps:$4 sm:$0xff]  }
 0x1f4   :  { %3316 = vmatprep.subr.bf16.mxu0 %v6945_v4  ;;  %v624_v4 = vrot.slane %v8478_v20, %v8823_v2 }
 0x1f5   :  { %4264 = vmatpush1.bf16.msra.mxu1 %v7042_v62  ;;  %v628_v6 = vrot.slane %v8478_v20, %v8826_v3  ;;  %v7051_v20 = vld [vmem:[%s9305_s3 + $0x198] ss:$12 sps:$4 sm:$0xff]   ;;  %v7101_v62 = vld [vmem:[%s9307_s5 + $0x1c] ss:$12 sps:$4 sm:$0xff]  }
 0x1f6   :  { %4265 = vmatprep.subr.bf16.mxu1 %v7047_v41  ;;  %v7099_v41 = vld [vmem:[%s9307_s5 + $0x18] ss:$12 sps:$4 sm:$0xff]  }
 0x1f7   :  { %3317 = vmatpush1.bf16.msra.mxu0 %v6943_v10 }
 0x1f8   :  { %3318 = vmatprep.subr.bf16.mxu0 %v6948_v12 }
 0x1f9   :  { %4266 = vmatpush1.bf16.msra.mxu1 %v7045_v63  ;;  %v7104_v63 = vld [vmem:[%s9307_s5 + $0x34] ss:$12 sps:$4 sm:$0xff]  }
 0x1fb   :  { %3319 = vmatpush1.bf16.msra.mxu0 %v6946_v16  ;;  %v7053_v16 = vld [vmem:[%s9305_s3 + $0x19c] ss:$12 sps:$4 sm:$0xff]  }
 0x1fc   :  { %3320 = vmatprep.subr.bf16.mxu0 %v6951_v18  ;;  %v7242_v18 = vmov 0  }
 0x1ff   :  { %3321 = vmatpush1.bf16.msra.mxu0 %v6949_v19  ;;  %v7056_v19 = vld [vmem:[%s9305_s3 + $0x1b4] ss:$12 sps:$4 sm:$0xff]  }
 0x200   :  { %3331 = vmatprep.subr.bf16.mxu0 %v6954_v28  ;;  %v7054_v28 = vld [vmem:[%s9305_s3 + $0x1b0] ss:$12 sps:$4 sm:$0xff]  }
 0x202   :  { %3323 = vmatmul.mubr.bf16.vlgmr.msra.gmra.mrb[0].mxu0 %v8207_v48  ;;  %v6963_v48 = vld [vmem:[%s9303_s1 + $0xc4c] ss:$12 sps:$4 sm:$0xff]  }
 0x203   :  { %3332 = vmatpush1.bf16.msra.mxu0 %v6952_v22  ;;  %3363 = vmatprep.mubr.bf16.mxu0 %v8220_v52  ;;  %v6961_v52 = vld [vmem:[%s9303_s1 + $0xc48] ss:$12 sps:$4 sm:$0xff]   ;;  %v7059_v22 = vld [vmem:[%s9305_s3 + $0x1cc] ss:$12 sps:$4 sm:$0xff]   ;;  %s7216_s1 = scalar_lea.vmem %s5379_s25, 32 }
 0x204   :  { %3333 = vmatprep.subr.bf16.mxu0 %v6957_v23  ;;  %v7057_v23 = vld [vmem:[%s9305_s3 + $0x1c8] ss:$12 sps:$4 sm:$0xff]   ;;  %p7217_p0 = scmp.ne.s32.totalorder %s5379_s25, %s7216_s1  ;;  %p7222_p2 = scmp.lt.s32.totalorder %s7216_s1, %s7216_s1 }
 0x206   :  { %p7223_p3 = por %p7222_p2, %p7221_p1 }
 0x207   :  { %3334 = vmatpush1.bf16.msra.mxu0 %v6955_v24  ;;  %v7062_v24 = vld [vmem:[%s9305_s3 + $0x1e4] ss:$12 sps:$4 sm:$0xff]  }
 0x208   :  { %3335 = vmatprep.subr.bf16.mxu0 %v6960_v1  ;;  %v7060_v1 = vld [vmem:[%s9305_s3 + $0x1e0] ss:$12 sps:$4 sm:$0xff]   ;;  %p7224_p4 = pnand %p7223_p3, %p7217_p0 }
 0x20b   :  { %3336 = vmatpush1.bf16.msra.mxu0 %v6958_v25  ;;  %v6197_v29 = vpop.f32.mrb[32].mxu1  ;;  %v7065_v25 = vld [vmem:[%s9305_s3 + $0x1fc] ss:$12 sps:$4 sm:$0xff]  }
 0x20c   :  { %3337 = vmatprep.subr.bf16.mxu0 %v6963_v48  ;;  %v6198_v31 = vpop.f32.mrb[33].mxu1  ;;  %v7063_v48 = vld [vmem:[%s9305_s3 + $0x1f8] ss:$12 sps:$4 sm:$0xff]  }
 0x20d   :  { %v6199_v33 = vadd.f32 %v6198_v31, %v6197_v29  ;;  %v6200_v34 = vpop.f32.mrb[34].mxu1  ;;  %v7073_v31 = vld [vmem:[%s9305_s3 + $0x8] ss:$12 sps:$4 sm:$0xff]  }
 0x20e   :  { %v6201_v35 = vpop.f32.mrb[35].mxu1  ;;  %v7075_v34 = vld [vmem:[%s9305_s3 + $0x20] ss:$12 sps:$4 sm:$0xff]  }
 0x20f   :  { %3338 = vmatpush1.bf16.msra.mxu0 %v6961_v52  ;;  %v8744_v36 = vadd.f32 %v6199_v33, %v3687_v15  ;;  %v7068_v52 = vld [vmem:[%s9305_s3 + $0x214] ss:$12 sps:$4 sm:$0xff]   ;;  %v7076_v35 = vld [vmem:[%s9305_s3 + $0xf8] ss:$12 sps:$4 sm:$0xff]  }
 0x210   :  { %3339 = vmatprep.subr.bf16.mxu0 %v6966_v5  ;;  %v7066_v5 = vld [vmem:[%s9305_s3 + $0x210] ss:$12 sps:$4 sm:$0xff]   ;;  %v7074_v33 = vld [vmem:[%s9305_s3 + $0xe0] ss:$12 sps:$4 sm:$0xff]  }
 0x211   :  { %v3734_v29 = vmax.f32 %v8744_v36, 0.0  ;;  %v7077_v36 = vld [vmem:[%s9305_s3 + $0x38] ss:$12 sps:$4 sm:$0xff]  }
 0x213   :  { %3340 = vmatpush1.bf16.msra.mxu0 %v6964_v26  ;;  %v7071_v26 = vld [vmem:[%s9305_s3 + $0x22c] ss:$12 sps:$4 sm:$0xff]  }
 0x214   :  { %3341 = vmatprep.subr.bf16.mxu0 %v6969_v27  ;;  %v7069_v27 = vld [vmem:[%s9305_s3 + $0x228] ss:$12 sps:$4 sm:$0xff]  }
 0x217   :  { %3342 = vmatpush1.bf16.msra.mxu0 %v6967_v30  ;;  %v7072_v30 = vld [vmem:[%s9305_s3 + $0xc8] ss:$12 sps:$4 sm:$0xff]  }
 0x218   :  { %3343 = vmatprep.subr.bf16.mxu0 %v6972_v32  ;;  %v3737_v32 = vpack.c.bf16 %v3734_v29, %v3734_v29  ;;  %v7141_v29 = vld [vmem:[%s9307_s5 + $0x168] ss:$12 sps:$4 sm:$0xff]  }
 0x21b   :  { %3344 = vmatpush1.bf16.msra.mxu0 %v6970_v39  ;;  %v7078_v39 = vld [vmem:[%s9305_s3 + $0x110] ss:$12 sps:$4 sm:$0xff]  }
 0x21c   :  { %3345 = vmatprep.subr.bf16.mxu0 %v6975_v40  ;;  %v7079_v40 = vld [vmem:[%s9305_s3 + $0x50] ss:$12 sps:$4 sm:$0xff]  }
 0x21f   :  { %3346 = vmatpush1.bf16.msra.mxu0 %v6973_v42  ;;  %v7080_v42 = vld [vmem:[%s9305_s3 + $0x128] ss:$12 sps:$4 sm:$0xff]  }
 0x220   :  { %3347 = vmatprep.subr.bf16.mxu0 %v6978_v43  ;;  %v7081_v43 = vld [vmem:[%s9305_s3 + $0x68] ss:$12 sps:$4 sm:$0xff]  }
 0x223   :  { %3348 = vmatpush1.bf16.msra.mxu0 %v6976_v44  ;;  %v7082_v44 = vld [vmem:[%s9305_s3 + $0x140] ss:$12 sps:$4 sm:$0xff]  }
 0x224   :  { %3349 = vmatprep.subr.bf16.mxu0 %v6981_v45  ;;  %v7083_v45 = vld [vmem:[%s9305_s3 + $0x80] ss:$12 sps:$4 sm:$0xff]  }
 0x227   :  { %3350 = vmatpush1.bf16.msra.mxu0 %v6979_v46  ;;  %v7084_v46 = vld [vmem:[%s9305_s3 + $0x158] ss:$12 sps:$4 sm:$0xff]  }
 0x228   :  { %3351 = vmatprep.subr.bf16.mxu0 %v6984_v47  ;;  %v7085_v47 = vld [vmem:[%s9305_s3 + $0x98] ss:$12 sps:$4 sm:$0xff]  }
 0x22b   :  { %3352 = vmatpush1.bf16.msra.mxu0 %v6982_v49  ;;  %v7086_v49 = vld [vmem:[%s9305_s3 + $0x170] ss:$12 sps:$4 sm:$0xff]  }
 0x22c   :  { %3353 = vmatprep.subr.bf16.mxu0 %v6987_v50  ;;  %v7087_v50 = vld [vmem:[%s9305_s3 + $0xb0] ss:$12 sps:$4 sm:$0xff]  }
 0x22f   :  { %3354 = vmatpush1.bf16.msra.mxu0 %v6985_v51  ;;  %v7088_v51 = vld [vmem:[%s9305_s3 + $0x188] ss:$12 sps:$4 sm:$0xff]  }
 0x230   :  { %3355 = vmatprep.subr.bf16.mxu0 %v6990_v53  ;;  %v7089_v53 = vld [vmem:[%s9305_s3 + $0x1a0] ss:$12 sps:$4 sm:$0xff]  }
 0x233   :  { %3356 = vmatpush1.bf16.msra.mxu0 %v6988_v54  ;;  %v7090_v54 = vld [vmem:[%s9305_s3 + $0x1b8] ss:$12 sps:$4 sm:$0xff]  }
 0x234   :  { %3357 = vmatprep.subr.bf16.mxu0 %v6993_v55  ;;  %v7091_v55 = vld [vmem:[%s9305_s3 + $0x1d0] ss:$12 sps:$4 sm:$0xff]  }
 0x237   :  { %3358 = vmatpush1.bf16.msra.mxu0 %v6991_v56  ;;  %v7092_v56 = vld [vmem:[%s9305_s3 + $0x1e8] ss:$12 sps:$4 sm:$0xff]  }
 0x238   :  { %3359 = vmatprep.subr.bf16.mxu0 %v6996_v57  ;;  %v7093_v57 = vld [vmem:[%s9305_s3 + $0x200] ss:$12 sps:$4 sm:$0xff]  }
 0x23b   :  { %3360 = vmatpush1.bf16.msra.mxu0 %v6994_v59  ;;  %v7094_v59 = vld [vmem:[%s9305_s3 + $0x218] ss:$12 sps:$4 sm:$0xff]  }
 0x23c   :  { %3361 = vmatprep.subr.bf16.mxu0 %v6999_v60  ;;  %v7095_v60 = vld [vmem:[%s9305_s3 + $0x230] ss:$12 sps:$4 sm:$0xff]  }
 0x23f   :  { %3362 = vmatpush1.bf16.msra.mxu0 %v6997_v61  ;;  %v7098_v61 = vld [vmem:[%s9307_s5 + $0x4] ss:$12 sps:$4 sm:$0xff]  }
 0x240   :  { %6316 = vmatprep.subr.bf16.mxu0 %v7240_v0 }
 0x242   :  { %3364 = vmatmul.mubr.bf16.vlgmr.msra.gmra.mrb[0].mxu0 %v8310_v21  ;;  %v7050_v21 = vld [vmem:[%s9305_s3 + $0x184] ss:$12 sps:$4 sm:$0xff]  }
 0x243   :  { %4276 = vmatprep.subr.bf16.mxu1 %v7050_v21  ;;  %6332 = vmatprep.mubr.msk.bf16.mxu0 %vm7241_vm0, %v7240_v0  ;;  %v7102_v21 = vld [vmem:[%s9307_s5 + $0x30] ss:$12 sps:$4 sm:$0xff]  }
 0x315   :  { %v3365_v8 = vpop.f32.mrb[0].mxu0 }
 0x316   :  { %v6356_v9 = vadd.f32 %v3365_v8, %v624_v4  ;;  %v3367_v10 = vpop.f32.mrb[1].mxu0  ;;  %v7107_v4 = vld [vmem:[%s9307_s5 + $0x4c] ss:$12 sps:$4 sm:$0xff]   ;;  %v7110_v8 = vld [vmem:[%s9307_s5 + $0x64] ss:$12 sps:$4 sm:$0xff]  }
 0x317   :  { %v6357_v11 = vadd.f32 %v3367_v10, %v628_v6  ;;  %v3369_v12 = vpop.f32.mrb[2].mxu0  ;;  %v7105_v6 = vld [vmem:[%s9307_s5 + $0x48] ss:$12 sps:$4 sm:$0xff]  }
 0x318   :  { %v3732_v58 = vmax.f32 %v6356_v9, 0.0  ;;  %v3370_v13 = vpop.f32.mrb[3].mxu0  ;;  %v7108_v9 = vld [vmem:[%s9307_s5 + $0x60] ss:$12 sps:$4 sm:$0xff]   ;;  %v7113_v10 = vld [vmem:[%s9307_s5 + $0x7c] ss:$12 sps:$4 sm:$0xff]  }
 0x319   :  { %v3733_v14 = vmax.f32 %v6357_v11, 0.0  ;;  %v7111_v11 = vld [vmem:[%s9307_s5 + $0x78] ss:$12 sps:$4 sm:$0xff]   ;;  %v7116_v12 = vld [vmem:[%s9307_s5 + $0x94] ss:$12 sps:$4 sm:$0xff]  }
 0x31a   :  { %v8835_v15 = vpack.c.bf16 %v3732_v58, %v3732_v58  ;;  %v7114_v58 = vld [vmem:[%s9307_s5 + $0x90] ss:$12 sps:$4 sm:$0xff]   ;;  %v7119_v13 = vld [vmem:[%s9307_s5 + $0xac] ss:$12 sps:$4 sm:$0xff]  }
 0x31b   :  { %v3736_v7 = vpack.c.bf16 %v3733_v14, %v3733_v14  ;;  %v7117_v14 = vld [vmem:[%s9307_s5 + $0xa8] ss:$12 sps:$4 sm:$0xff]  }
 0x31d   :  { %4267 = vmatprep.mubr.bf16.mxu1 %v3736_v7 }
 0x31e   :  { %4268 = vmatmul.mubr.bf16.vlgmr.msra.gmra.mrb[36].mxu1 %v8835_v15 }
 0x31f   :  { %4277 = vmatpush1.bf16.msra.mxu1 %v7048_v17  ;;  %4308 = vmatprep.mubr.bf16.mxu1 %v7242_v18  ;;  %v7120_v17 = vld [vmem:[%s9307_s5 + $0xc0] ss:$12 sps:$4 sm:$0xff]  }
 0x320   :  { %4278 = vmatprep.subr.bf16.mxu1 %v7053_v16  ;;  %v7123_v16 = vld [vmem:[%s9307_s5 + $0xd8] ss:$12 sps:$4 sm:$0xff]  }
 0x323   :  { %4279 = vmatpush1.bf16.msra.mxu1 %v7051_v20  ;;  %v7128_v20 = vld [vmem:[%s9307_s5 + $0xf4] ss:$12 sps:$4 sm:$0xff]  }
 0x324   :  { %4280 = vmatprep.subr.bf16.mxu1 %v7056_v19  ;;  %v7126_v19 = vld [vmem:[%s9307_s5 + $0xf0] ss:$12 sps:$4 sm:$0xff]  }
 0x327   :  { %4281 = vmatpush1.bf16.msra.mxu1 %v7054_v28  ;;  %v7131_v28 = vld [vmem:[%s9307_s5 + $0x10c] ss:$12 sps:$4 sm:$0xff]  }
 0x328   :  { %4282 = vmatprep.subr.bf16.mxu1 %v7059_v22  ;;  %v7129_v22 = vld [vmem:[%s9307_s5 + $0x108] ss:$12 sps:$4 sm:$0xff]  }
 0x32b   :  { %4283 = vmatpush1.bf16.msra.mxu1 %v7057_v23  ;;  %v7134_v23 = vld [vmem:[%s9307_s5 + $0x124] ss:$12 sps:$4 sm:$0xff]  }
 0x32c   :  { %4284 = vmatprep.subr.bf16.mxu1 %v7062_v24  ;;  %v7132_v24 = vld [vmem:[%s9307_s5 + $0x120] ss:$12 sps:$4 sm:$0xff]  }
 0x32f   :  { %4285 = vmatpush1.bf16.msra.mxu1 %v7060_v1  ;;  %v7137_v1 = vld [vmem:[%s9307_s5 + $0x13c] ss:$12 sps:$4 sm:$0xff]  }
 0x330   :  { %4286 = vmatprep.subr.bf16.mxu1 %v7065_v25  ;;  %v7135_v25 = vld [vmem:[%s9307_s5 + $0x138] ss:$12 sps:$4 sm:$0xff]  }
 0x333   :  { %4287 = vmatpush1.bf16.msra.mxu1 %v7063_v48  ;;  %v7140_v48 = vld [vmem:[%s9307_s5 + $0x154] ss:$12 sps:$4 sm:$0xff]  }
 0x334   :  { %4288 = vmatprep.subr.bf16.mxu1 %v7068_v52  ;;  %v7138_v52 = vld [vmem:[%s9307_s5 + $0x150] ss:$12 sps:$4 sm:$0xff]  }
 0x337   :  { %4289 = vmatpush1.bf16.msra.mxu1 %v7066_v5  ;;  %v7143_v5 = vld [vmem:[%s9307_s5 + $0x16c] ss:$12 sps:$4 sm:$0xff]  }
 0x338   :  { %4290 = vmatprep.subr.bf16.mxu1 %v7071_v26  ;;  %v7147_v26 = vld [vmem:[%s9307_s5 + $0x188] ss:$12 sps:$4 sm:$0xff]  }
 0x339   :  { %6317 = vmatpush3.bf16.msra.mxu0 %v7147_v26  ;;  %v7184_v26 = vld [vmem:[%s9307_s5 + $0x128] ss:$12 sps:$4 sm:$0xff]  }
 0x33a   :  { %6318 = vmatprep.subr.bf16.mxu0 %v7240_v0 }
 0x33b   :  { %4291 = vmatpush1.bf16.msra.mxu1 %v7069_v27  ;;  %v7151_v27 = vld [vmem:[%s9307_s5 + $0x1a0] ss:$12 sps:$4 sm:$0xff]  }
 0x33c   :  { %6203 = vmatprep.subr.bf16.mxu1 %v7072_v30  ;;  %v7146_v30 = vld [vmem:[%s9307_s5 + $0x184] ss:$12 sps:$4 sm:$0xff]  }
 0x33d   :  { %6319 = vmatpush3.bf16.msra.mxu0 %v7151_v27  ;;  %v7185_v27 = vld [vmem:[%s9307_s5 + $0x68] ss:$12 sps:$4 sm:$0xff]  }
 0x33e   :  { %4309 = vmatmul.mubr.bf16.vlgmr.msra.gmra.mrb[36].mxu1 %v3737_v32  ;;  %6320 = vmatprep.subr.bf16.mxu0 %v7240_v0 }
 0x33f   :  { %6204 = vmatpush3.bf16.msra.mxu1 %v7073_v31  ;;  %4349 = vmatprep.mubr.bf16.mxu1 %v3736_v7  ;;  %v7122_v7 = vld [vmem:[%s9307_s5 + $0xc4] ss:$12 sps:$4 sm:$0xff]  }
 0x340   :  { %6205 = vmatprep.subr.bf16.mxu1 %v7074_v33  ;;  %v7155_v31 = vld [vmem:[%s9307_s5 + $0x1b8] ss:$12 sps:$4 sm:$0xff]   ;;  %v7163_v33 = vld [vmem:[%s9307_s5 + $0x1e8] ss:$12 sps:$4 sm:$0xff]  }
 0x341   :  { %6321 = vmatpush3.bf16.msra.mxu0 %v7155_v31  ;;  %v7188_v31 = vld [vmem:[%s9307_s5 + $0x158] ss:$12 sps:$4 sm:$0xff]  }
 0x342   :  { %6322 = vmatprep.subr.bf16.mxu0 %v7240_v0 }
 0x343   :  { %6206 = vmatpush3.bf16.msra.mxu1 %v7075_v34  ;;  %v7167_v34 = vld [vmem:[%s9307_s5 + $0x200] ss:$12 sps:$4 sm:$0xff]  }
 0x344   :  { %6207 = vmatprep.subr.bf16.mxu1 %v7076_v35  ;;  %v7171_v35 = vld [vmem:[%s9307_s5 + $0x218] ss:$12 sps:$4 sm:$0xff]  }
 0x347   :  { %6208 = vmatpush3.bf16.msra.mxu1 %v7077_v36  ;;  %v7175_v36 = vld [vmem:[%s9307_s5 + $0x230] ss:$12 sps:$4 sm:$0xff]  }
 0x348   :  { %6209 = vmatprep.subr.bf16.mxu1 %v7078_v39  ;;  %v3834_v39 = vld [vmem:[%s9306_s4] sm:$0x7] }
 0x34b   :  { %6210 = vmatpush3.bf16.msra.mxu1 %v7079_v40  ;;  %v3839_v40 = vrot.slane %v3834_v39, %v8823_v2 }
 0x34c   :  { %6211 = vmatprep.subr.bf16.mxu1 %v7080_v42  ;;  %v3843_v42 = vrot.slane %v3834_v39, %v8826_v3 }
 0x34f   :  { %6212 = vmatpush3.bf16.msra.mxu1 %v7081_v43 }
 0x350   :  { %6213 = vmatprep.subr.bf16.mxu1 %v7082_v44 }
 0x353   :  { %6214 = vmatpush3.bf16.msra.mxu1 %v7083_v45 }
 0x354   :  { %6215 = vmatprep.subr.bf16.mxu1 %v7084_v46 }
 0x357   :  { %6216 = vmatpush3.bf16.msra.mxu1 %v7085_v47 }
 0x358   :  { %6217 = vmatprep.subr.bf16.mxu1 %v7086_v49 }
 0x35b   :  { %6218 = vmatpush3.bf16.msra.mxu1 %v7087_v50 }
 0x35c   :  { %6296 = vmatprep.subr.bf16.mxu1 %v7240_v0 }
 0x35e   :  { %4350 = vmatmul.mubr.bf16.vlgmr.msra.gmra.mrb[40].mxu1 %v8835_v15  ;;  %v7125_v15 = vld [vmem:[%s9307_s5 + $0xdc] ss:$12 sps:$4 sm:$0xff]  }
 0x35f   :  { %6297 = vmatpush3.bf16.msra.mxu1 %v7088_v51  ;;  %6312 = vmatprep.mubr.msk.bf16.mxu1 %vm7241_vm0, %v7240_v0 }
 0x360   :  { %6298 = vmatprep.subr.bf16.mxu1 %v7240_v0 }
 0x363   :  { %6299 = vmatpush3.bf16.msra.mxu1 %v7089_v53 }
 0x364   :  { %6300 = vmatprep.subr.bf16.mxu1 %v7240_v0 }
 0x367   :  { %6301 = vmatpush3.bf16.msra.mxu1 %v7090_v54  ;;  %v7144_v54 = vld [vmem:[%s9307_s5 + $0x180] ss:$12 sps:$4 sm:$0xff]  }
 0x368   :  { %6302 = vmatprep.subr.bf16.mxu1 %v7240_v0 }
 0x36b   :  { %6303 = vmatpush3.bf16.msra.mxu1 %v7091_v55 }
 0x36c   :  { %6304 = vmatprep.subr.bf16.mxu1 %v7240_v0 }
 0x36f   :  { %6305 = vmatpush3.bf16.msra.mxu1 %v7092_v56  ;;  %v7150_v56 = vld [vmem:[%s9307_s5 + $0x19c] ss:$12 sps:$4 sm:$0xff]  }
 0x370   :  { %6306 = vmatprep.subr.bf16.mxu1 %v7240_v0 }
 0x373   :  { %6307 = vmatpush3.bf16.msra.mxu1 %v7093_v57  ;;  %v7148_v57 = vld [vmem:[%s9307_s5 + $0x198] ss:$12 sps:$4 sm:$0xff]  }
 0x374   :  { %6308 = vmatprep.subr.bf16.mxu1 %v7240_v0 }
 0x377   :  { %6309 = vmatpush3.bf16.msra.mxu1 %v7094_v59  ;;  %v7154_v59 = vld [vmem:[%s9307_s5 + $0x1b4] ss:$12 sps:$4 sm:$0xff]  }
 0x378   :  { %6310 = vmatprep.subr.bf16.mxu1 %v7240_v0 }
 0x37b   :  { %6311 = vmatpush3.bf16.msra.mxu1 %v7095_v60  ;;  %v7152_v60 = vld [vmem:[%s9307_s5 + $0x1b0] ss:$12 sps:$4 sm:$0xff]  }
 0x37c   :  { %4900 = vmatprep.subr.bf16.mxu1 %v7098_v61  ;;  %v7158_v61 = vld [vmem:[%s9307_s5 + $0x1cc] ss:$12 sps:$4 sm:$0xff]  }
 0x37e   :  { %6313 = vmatmul.mubr.bf16.vlgmr.msra.gmra.mrb[44].mxu1 %v3737_v32  ;;  %v7159_v32 = vld [vmem:[%s9307_s5 + $0x1d0] ss:$12 sps:$4 sm:$0xff]  }
 0x37f   :  { %4901 = vmatpush1.bf16.msra.mxu1 %v7096_v38  ;;  %6323 = vmatpush3.bf16.msra.mxu0 %v7159_v32  ;;  %v7162_v38 = vld [vmem:[%s9307_s5 + $0x1e4] ss:$12 sps:$4 sm:$0xff]  }
 0x380   :  { %4902 = vmatprep.subr.bf16.mxu1 %v7101_v62  ;;  %6324 = vmatprep.subr.bf16.mxu0 %v7240_v0  ;;  %v7160_v62 = vld [vmem:[%s9307_s5 + $0x1e0] ss:$12 sps:$4 sm:$0xff]   ;;  %v7189_v32 = vld [vmem:[%s9307_s5 + $0x98] ss:$12 sps:$4 sm:$0xff]  }
 0x383   :  { %4903 = vmatpush1.bf16.msra.mxu1 %v7099_v41  ;;  %6325 = vmatpush3.bf16.msra.mxu0 %v7163_v33  ;;  %v7166_v41 = vld [vmem:[%s9307_s5 + $0x1fc] ss:$12 sps:$4 sm:$0xff]  }
 0x384   :  { %4904 = vmatprep.subr.bf16.mxu1 %v7104_v63  ;;  %6326 = vmatprep.subr.bf16.mxu0 %v7240_v0  ;;  %v7164_v63 = vld [vmem:[%s9307_s5 + $0x1f8] ss:$12 sps:$4 sm:$0xff]   ;;  %v7190_v33 = vld [vmem:[%s9307_s5 + $0x170] ss:$12 sps:$4 sm:$0xff]  }
 0x387   :  { %4905 = vmatpush1.bf16.msra.mxu1 %v7102_v21  ;;  %6327 = vmatpush3.bf16.msra.mxu0 %v7167_v34  ;;  %v7170_v21 = vld [vmem:[%s9307_s5 + $0x214] ss:$12 sps:$4 sm:$0xff]   ;;  %v7191_v34 = vld [vmem:[%s9307_s5 + $0xb0] ss:$12 sps:$4 sm:$0xff]  }
 0x388   :  { %4906 = vmatprep.subr.bf16.mxu1 %v7107_v4  ;;  %6328 = vmatprep.subr.bf16.mxu0 %v7240_v0  ;;  %v7168_v4 = vld [vmem:[%s9307_s5 + $0x210] ss:$12 sps:$4 sm:$0xff]  }
 0x38b   :  { %4907 = vmatpush1.bf16.msra.mxu1 %v7105_v6  ;;  %6329 = vmatpush3.bf16.msra.mxu0 %v7171_v35  ;;  %v7174_v6 = vld [vmem:[%s9307_s5 + $0x22c] ss:$12 sps:$4 sm:$0xff]   ;;  %v7192_v35 = vld [vmem:[%s9309_s7 + $0x40] sm:$0xff]  }
 0x38c   :  { %4908 = vmatprep.subr.bf16.mxu1 %v7110_v8  ;;  %6330 = vmatprep.subr.bf16.mxu0 %v7240_v0 }
 0x38f   :  { %4909 = vmatpush1.bf16.msra.mxu1 %v7108_v9  ;;  %6331 = vmatpush3.bf16.msra.mxu0 %v7175_v36  ;;  %v7193_v36 = vld [vmem:[%s9309_s7] sm:$0xff]  }
 0x390   :  { %4910 = vmatprep.subr.bf16.mxu1 %v7113_v10  ;;  %6336 = vmatprep.subr.bf16.mxu0 %v7240_v0 }
 0x393   :  { %4911 = vmatpush1.bf16.msra.mxu1 %v7111_v11 }
 0x394   :  { %4912 = vmatprep.subr.bf16.mxu1 %v7116_v12  ;;  %v7172_v12 = vld [vmem:[%s9307_s5 + $0x228] ss:$12 sps:$4 sm:$0xff]  }
 0x397   :  { %4913 = vmatpush1.bf16.msra.mxu1 %v7114_v58 }
 0x398   :  { %4914 = vmatprep.subr.bf16.mxu1 %v7119_v13  ;;  %v7176_v13 = vld [vmem:[%s9307_s5 + $0xc8] ss:$12 sps:$4 sm:$0xff]  }
 0x39b   :  { %4915 = vmatpush1.bf16.msra.mxu1 %v7117_v14  ;;  %v3847_v14 = vrot.slane %v3834_v39, %v8484_v37  ;;  %v7194_v39 = vld [vmem:[%s9309_s7 + $0x48] sm:$0xff]  }
 0x39c   :  { %4916 = vmatprep.subr.bf16.mxu1 %v7122_v7 }
 0x39f   :  { %4917 = vmatpush1.bf16.msra.mxu1 %v7120_v17 }
 0x3a0   :  { %4918 = vmatprep.subr.bf16.mxu1 %v7125_v15 }
 0x3a3   :  { %4919 = vmatpush1.bf16.msra.mxu1 %v7123_v16 }
 0x3a4   :  { %4920 = vmatprep.subr.bf16.mxu1 %v7128_v20 }
 0x3a7   :  { %4921 = vmatpush1.bf16.msra.mxu1 %v7126_v19 }
 0x3a8   :  { %4922 = vmatprep.subr.bf16.mxu1 %v7131_v28 }
 0x3ab   :  { %4923 = vmatpush1.bf16.msra.mxu1 %v7129_v22  ;;  %v7177_v22 = vld [vmem:[%s9307_s5 + $0x8] ss:$12 sps:$4 sm:$0xff]  }
 0x3ac   :  { %4924 = vmatprep.subr.bf16.mxu1 %v7134_v23 }
 0x3af   :  { %4925 = vmatpush1.bf16.msra.mxu1 %v7132_v24  ;;  %v7178_v24 = vld [vmem:[%s9307_s5 + $0xe0] ss:$12 sps:$4 sm:$0xff]  }
 0x3b0   :  { %4926 = vmatprep.subr.bf16.mxu1 %v7137_v1  ;;  %v7179_v1 = vld [vmem:[%s9307_s5 + $0x20] ss:$12 sps:$4 sm:$0xff]  }
 0x3b3   :  { %4927 = vmatpush1.bf16.msra.mxu1 %v7135_v25  ;;  %v7180_v25 = vld [vmem:[%s9307_s5 + $0xf8] ss:$12 sps:$4 sm:$0xff]  }
 0x3b4   :  { %4928 = vmatprep.subr.bf16.mxu1 %v7140_v48  ;;  %v7181_v48 = vld [vmem:[%s9307_s5 + $0x38] ss:$12 sps:$4 sm:$0xff]  }
 0x3b7   :  { %4929 = vmatpush1.bf16.msra.mxu1 %v7138_v52  ;;  %v7182_v52 = vld [vmem:[%s9307_s5 + $0x110] ss:$12 sps:$4 sm:$0xff]  }
 0x3b8   :  { %4930 = vmatprep.subr.bf16.mxu1 %v7143_v5  ;;  %v7183_v5 = vld [vmem:[%s9307_s5 + $0x50] ss:$12 sps:$4 sm:$0xff]  }
 0x3bb   :  { %4931 = vmatpush1.bf16.msra.mxu1 %v7141_v29  ;;  %v7186_v29 = vld [vmem:[%s9307_s5 + $0x140] ss:$12 sps:$4 sm:$0xff]  }
 0x3bc   :  { %4941 = vmatprep.subr.bf16.mxu1 %v7146_v30  ;;  %v7187_v30 = vld [vmem:[%s9307_s5 + $0x80] ss:$12 sps:$4 sm:$0xff]  }
 0x411   :  { %v4310_v43 = vpop.f32.mrb[36].mxu1 }
 0x412   :  { %v6358_v44 = vadd.f32 %v4310_v43, %v3839_v40  ;;  %v4312_v45 = vpop.f32.mrb[37].mxu1  ;;  %v7195_v40 = vld [vmem:[%s9309_s7 + $0x8] sm:$0xff]   ;;  %v7197_v43 = vld [vmem:[%s9309_s7 + $0x10] sm:$0xff]  }
 0x413   :  { %v6359_v46 = vadd.f32 %v4312_v45, %v3843_v42  ;;  %v4314_v47 = vpop.f32.mrb[38].mxu1  ;;  %v7196_v42 = vld [vmem:[%s9309_s7 + $0x50] sm:$0xff]   ;;  %v7199_v45 = vld [vmem:[%s9309_s7 + $0x18] sm:$0xff]  }
 0x414   :  { %v4397_v49 = vmax.f32 %v6358_v44, 0.0  ;;  %v4315_v50 = vpop.f32.mrb[39].mxu1  ;;  %v7198_v44 = vld [vmem:[%s9309_s7 + $0x58] sm:$0xff]   ;;  %v7201_v47 = vld [vmem:[%s9309_s7 + $0x20] sm:$0xff]  }
 0x415   :  { %v4398_v51 = vmax.f32 %v6359_v46, 0.0  ;;  %v7200_v46 = vld [vmem:[%s9309_s7 + $0x60] sm:$0xff]   ;;  %v7203_v50 = vld [vmem:[%s9309_s7 + $0x28] sm:$0xff]  }
 0x416   :  { %v9104_v55 = vpack.c.bf16 %v4397_v49, %v4397_v49  ;;  %v7202_v49 = vld [vmem:[%s9309_s7 + $0x68] sm:$0xff]  }
 0x417   :  { %v4401_v53 = vpack.c.bf16 %v4398_v51, %v4398_v51  ;;  %v7204_v51 = vld [vmem:[%s9309_s7 + $0x70] sm:$0xff]  }
 0x419   :  { %4932 = vmatprep.mubr.bf16.mxu1 %v4401_v53 }
 0x41a   :  { %4933 = vmatmul.mubr.bf16.vlgmr.msra.gmra.mrb[48].mxu1 %v9104_v55 }
 0x41b   :  { %4942 = vmatpush1.bf16.msra.mxu1 %v7144_v54  ;;  %4973 = vmatprep.mubr.bf16.mxu1 %v7242_v18  ;;  %v7156_v18 = vld [vmem:[%s9307_s5 + $0x1c8] ss:$12 sps:$4 sm:$0xff]   ;;  %v7206_v54 = vld [vmem:[%s9309_s7 + $0x78] sm:$0xff]  }
 0x41c   :  { %4943 = vmatprep.subr.bf16.mxu1 %v7150_v56  ;;  %v7208_v56 = vld [vmem:[%s9309_s7 + $0x80] sm:$0xff]  }
 0x41f   :  { %4944 = vmatpush1.bf16.msra.mxu1 %v7148_v57  ;;  %v7209_v57 = vld [vmem:[%s9309_s7 + $0x88] sm:$0xff]  }
 0x420   :  { %4945 = vmatprep.subr.bf16.mxu1 %v7154_v59  ;;  %v7210_v59 = vld [vmem:[%s9309_s7 + $0x90] sm:$0xff]  }
 0x423   :  { %4946 = vmatpush1.bf16.msra.mxu1 %v7152_v60  ;;  %v7211_v60 = vld [vmem:[%s9309_s7 + $0x98] sm:$0xff]  }
 0x424   :  { %4947 = vmatprep.subr.bf16.mxu1 %v7158_v61  ;;  %v7212_v61 = vld [vmem:[%s9309_s7 + $0xa0] sm:$0xff]  }
 0x427   :  { %4948 = vmatpush1.bf16.msra.mxu1 %v7156_v18  ;;  %v7213_v18 = vld [vmem:[%s9309_s7 + $0xa8] sm:$0xff]  }
 0x428   :  { %4949 = vmatprep.subr.bf16.mxu1 %v7162_v38  ;;  %v7214_v38 = vld [vmem:[%s9309_s7 + $0xb0] sm:$0xff]  }
 0x42b   :  { %4950 = vmatpush1.bf16.msra.mxu1 %v7160_v62  ;;  %v7215_v62 = vld [vmem:[%s9309_s7 + $0xb8] sm:$0xff]  }
 0x42c   :  { %4951 = vmatprep.subr.bf16.mxu1 %v7166_v41  ;;  %v4499_v41 = vld [vmem:[%s9308_s6] sm:$0x7] }
 0x42f   :  { %4952 = vmatpush1.bf16.msra.mxu1 %v7164_v63  ;;  %v4504_v63 = vrot.slane %v4499_v41, %v8823_v2 }
 0x430   :  { %4953 = vmatprep.subr.bf16.mxu1 %v7170_v21  ;;  %v4508_v21 = vrot.slane %v4499_v41, %v8826_v3 }
 0x431   :  { %v6219_v8 = vpop.f32.mrb[40].mxu1 }
 0x432   :  { %v6220_v9 = vpop.f32.mrb[41].mxu1 }
 0x433   :  { %v6221_v10 = vadd.f32 %v6220_v9, %v6219_v8  ;;  %v6222_v11 = vpop.f32.mrb[42].mxu1  ;;  %4954 = vmatpush1.bf16.msra.mxu1 %v7168_v4 }
 0x434   :  { %v6223_v58 = vpop.f32.mrb[43].mxu1  ;;  %4955 = vmatprep.subr.bf16.mxu1 %v7174_v6 }
 0x435   :  { %v4352_v7 = vadd.f32 %v6221_v10, %v3847_v14 }
 0x437   :  { %4956 = vmatpush1.bf16.msra.mxu1 %v7172_v12 }
 0x438   :  { %6234 = vmatprep.subr.bf16.mxu1 %v7176_v13 }
 0x451   :  { %v4391_v17 = vpop.f32.mrb[44].mxu1 }
 0x452   :  { %v4392_v15 = vadd.f32 %v4391_v17, %v4352_v7  ;;  %v6314_v16 = vpop.f32.mrb[45].mxu1 }
 0x453   :  { %v4394_v20 = vpop.f32.mrb[46].mxu1 }
 0x454   :  { %v4399_v19 = vmax.f32 %v4392_v15, 0.0  ;;  %v6315_v28 = vpop.f32.mrb[47].mxu1 }
 0x456   :  { %v4402_v23 = vpack.c.bf16 %v4399_v19, %v4399_v19 }
 0x458   :  { %4974 = vmatmul.mubr.bf16.vlgmr.msra.gmra.mrb[48].mxu1 %v4402_v23  ;;  %6333 = vmatmul.mubr.bf16.vlgmr.msra.gmra.mrb[4].mxu0 %v4402_v23 }
 0x459   :  { %6235 = vmatpush3.bf16.msra.mxu1 %v7177_v22  ;;  %5014 = vmatprep.mubr.bf16.mxu1 %v4401_v53  ;;  %v7205_v53 = vld [vmem:[%s9309_s7 + $0x30] sm:$0xff]  }
 0x45a   :  { %6236 = vmatprep.subr.bf16.mxu1 %v7178_v24  ;;  %6352 = vmatprep.mubr.msk.bf16.mxu0 %vm7241_vm0, %v7240_v0 }
 0x45b   :  { %6337 = vmatpush3.bf16.msra.mxu0 %v7208_v56 }
 0x45c   :  { %6338 = vmatprep.subr.bf16.mxu0 %v7240_v0 }
 0x45d   :  { %6237 = vmatpush3.bf16.msra.mxu1 %v7179_v1  ;;  %v4512_v1 = vrot.slane %v4499_v41, %v8484_v37  ;;  %v5980_v37 = vld [vmem:[%s9310_s8] ss:$0 sm:$0xff] }
 0x45e   :  { %6238 = vmatprep.subr.bf16.mxu1 %v7180_v25 }
 0x45f   :  { %6339 = vmatpush3.bf16.msra.mxu0 %v7209_v57 }
 0x460   :  { %6340 = vmatprep.subr.bf16.mxu0 %v7240_v0 }
 0x461   :  { %6239 = vmatpush3.bf16.msra.mxu1 %v7181_v48 }
 0x462   :  { %6240 = vmatprep.subr.bf16.mxu1 %v7182_v52 }
 0x463   :  { %6341 = vmatpush3.bf16.msra.mxu0 %v7210_v59 }
 0x464   :  { %6342 = vmatprep.subr.bf16.mxu0 %v7240_v0 }
 0x465   :  { %6241 = vmatpush3.bf16.msra.mxu1 %v7183_v5 }
 0x466   :  { %6242 = vmatprep.subr.bf16.mxu1 %v7184_v26 }
 0x467   :  { %6343 = vmatpush3.bf16.msra.mxu0 %v7211_v60 }
 0x468   :  { %6344 = vmatprep.subr.bf16.mxu0 %v7240_v0 }
 0x469   :  { %6243 = vmatpush3.bf16.msra.mxu1 %v7185_v27 }
 0x46a   :  { %6244 = vmatprep.subr.bf16.mxu1 %v7186_v29 }
 0x46b   :  { %6345 = vmatpush3.bf16.msra.mxu0 %v7212_v61 }
 0x46c   :  { %6346 = vmatprep.subr.bf16.mxu0 %v7240_v0 }
 0x46d   :  { %6245 = vmatpush3.bf16.msra.mxu1 %v7187_v30 }
 0x46e   :  { %6246 = vmatprep.subr.bf16.mxu1 %v7188_v31 }
 0x46f   :  { %6347 = vmatpush3.bf16.msra.mxu0 %v7213_v18 }
 0x470   :  { %6348 = vmatprep.subr.bf16.mxu0 %v7240_v0 }
 0x471   :  { %6247 = vmatpush3.bf16.msra.mxu1 %v7189_v32 }
 0x472   :  { %6248 = vmatprep.subr.bf16.mxu1 %v7190_v33 }
 0x473   :  { %6349 = vmatpush3.bf16.msra.mxu0 %v7214_v38 }
 0x474   :  { %6350 = vmatprep.subr.bf16.mxu0 %v7240_v0 }
 0x475   :  { %6249 = vmatpush3.bf16.msra.mxu1 %v7191_v34 }
 0x476   :  { %6265 = vmatprep.subr.bf16.mxu1 %v7192_v35 }
 0x477   :  { %6351 = vmatpush3.bf16.msra.mxu0 %v7215_v62 }
 0x478   :  { %5015 = vmatmul.mubr.bf16.vlgmr.msra.gmra.mrb[52].mxu1 %v9104_v55  ;;  %v7207_v55 = vld [vmem:[%s9309_s7 + $0x38] sm:$0xff]  }
 0x479   :  { %6266 = vmatpush3.bf16.msra.mxu1 %v7193_v36 }
 0x47a   :  { %6267 = vmatprep.subr.bf16.mxu1 %v7194_v39 }
 0x47d   :  { %6268 = vmatpush3.bf16.msra.mxu1 %v7195_v40 }
 0x47e   :  { %6269 = vmatprep.subr.bf16.mxu1 %v7196_v42 }
 0x481   :  { %6270 = vmatpush3.bf16.msra.mxu1 %v7197_v43 }
 0x482   :  { %6271 = vmatprep.subr.bf16.mxu1 %v7198_v44 }
 0x485   :  { %6272 = vmatpush3.bf16.msra.mxu1 %v7199_v45 }
 0x486   :  { %6273 = vmatprep.subr.bf16.mxu1 %v7200_v46 }
 0x489   :  { %6274 = vmatpush3.bf16.msra.mxu1 %v7201_v47 }
 0x48a   :  { %6275 = vmatprep.subr.bf16.mxu1 %v7202_v49 }
 0x48d   :  { %6276 = vmatpush3.bf16.msra.mxu1 %v7203_v50 }
 0x48e   :  { %6277 = vmatprep.subr.bf16.mxu1 %v7204_v51 }
 0x491   :  { %6278 = vmatpush3.bf16.msra.mxu1 %v7205_v53 }
 0x492   :  { %6279 = vmatprep.subr.bf16.mxu1 %v7206_v54 }
 0x495   :  { %6280 = vmatpush3.bf16.msra.mxu1 %v7207_v55 }
 0x52b   :  { %v4975_v4 = vpop.f32.mrb[48].mxu1  ;;  %v5056_v6 = vpop.f32.mrb[4].mxu0 }
 0x52c   :  { %v6360_v8 = vadd.f32 %v4975_v4, %v4504_v63  ;;  %v4977_v9 = vpop.f32.mrb[49].mxu1  ;;  %v6334_v10 = vpop.f32.mrb[5].mxu0 }
 0x52d   :  { %v6361_v11 = vadd.f32 %v4977_v9, %v4508_v21  ;;  %v4979_v0 = vpop.f32.mrb[50].mxu1  ;;  %v5059_v12 = vpop.f32.mrb[6].mxu0 }
 0x52e   :  { %v5062_v58 = vmax.f32 %v6360_v8, 0.0  ;;  %v4980_v13 = vpop.f32.mrb[51].mxu1  ;;  %v6335_v14 = vpop.f32.mrb[7].mxu0 }
 0x52f   :  { %v5063_v7 = vmax.f32 %v6361_v11, 0.0 }
 0x530   :  { %v5068_v17 = vrot.slane %v5062_v58, 2 }
 0x531   :  { %v5069_v15 = vrot.slane %v5063_v7, 2 }
 0x532   :  { %v5074_v16 = vmax.f32 %v5062_v58, %v5068_v17 }
 0x533   :  { %v5075_v20 = vmax.f32 %v5063_v7, %v5069_v15 }
 0x534   :  { %v5080_v19 = vrot.slane %v5074_v16, 4 }
 0x535   :  { %v5081_v2 = vrot.slane %v5075_v20, 4 }
 0x536   :  { %v5086_v28 = vmax.f32 %v5074_v16, %v5080_v19 }
 0x537   :  { %v5087_v3 = vmax.f32 %v5075_v20, %v5081_v2 }
 0x538   :  { %v5089_v23 = vpack.c.bf16 %v5086_v28, %v5086_v28 }
 0x539   :  { %v5090_v22 = vpack.c.bf16 %v5087_v3, %v5087_v3 }
 0x53b   :  { %5323 = vmatprep.mubr.bf16.mxu1 %v5090_v22 }
 0x53c   :  { %5324 = vmatmul.mubr.bf16.vlgmr.msra.gmra.mrb[56].mxu1 %v5089_v23 }
 0x54b   :  { %v6250_v24 = vpop.f32.mrb[52].mxu1 }
 0x54c   :  { %v6251_v25 = vpop.f32.mrb[53].mxu1 }
 0x54d   :  { %v6252_v48 = vadd.f32 %v6251_v25, %v6250_v24  ;;  %v6253_v52 = vpop.f32.mrb[54].mxu1 }
 0x54e   :  { %v6254_v5 = vpop.f32.mrb[55].mxu1 }
 0x54f   :  { %v5017_v26 = vadd.f32 %v6252_v48, %v4512_v1 }
 0x551   :  { %v5057_v27 = vadd.f32 %v5056_v6, %v5017_v26 }
 0x553   :  { %v5064_v29 = vmax.f32 %v5057_v27, 0.0 }
 0x555   :  { %v5070_v30 = vrot.slane %v5064_v29, 2 }
 0x557   :  { %v5076_v31 = vmax.f32 %v5064_v29, %v5070_v30 }
 0x559   :  { %v5082_v32 = vrot.slane %v5076_v31, 4 }
 0x55b   :  { %v5088_v33 = vmax.f32 %v5076_v31, %v5082_v32 }
 0x55d   :  { %v5091_v34 = vpack.c.bf16 %v5088_v33, %v5088_v33 }
 0x55f   :  { %6353 = vmatmul.mubr.bf16.vlgmr.msra.gmra.mrb[8].mxu0 %v5091_v34 }
 0x60f   :  { %v6281_v35 = vpop.f32.mrb[56].mxu1 }
 0x610   :  { %v6282_v36 = vpop.f32.mrb[57].mxu1 }
 0x611   :  { %v6283_v39 = vadd.f32 %v6282_v36, %v6281_v35  ;;  %v6284_v40 = vpop.f32.mrb[58].mxu1 }
 0x612   :  { %v6285_v42 = vpop.f32.mrb[59].mxu1 }
 0x613   :  { %v5326_v43 = vadd.f32 %v6283_v39, %v5980_v37 }
 0x632   :  { %v5365_v44 = vpop.f32.mrb[8].mxu0 }
 0x633   :  { %v5366_v45 = vadd.f32 %v5365_v44, %v5326_v43  ;;  %v6354_v46 = vpop.f32.mrb[9].mxu0 }
 0x634   :  { %v5368_v47 = vpop.f32.mrb[10].mxu0 }
 0x635   :  { %5371 = vst [vmem:[#allocation2] sm:$0x3] %v5366_v45  ;;  %v6355_v49 = vpop.f32.mrb[11].mxu0 }
 0x636   :  { %7227 = shalt.err (!%p7224_p4)
}
 0x637   :  { %s7228_s8 = scalar_lea.hbm %s9311_s9, 32 }
 0x638   :  { %p7229_p5 = scmp.ne.s32.totalorder %s9311_s9, %s7228_s8  ;;  %p7232_p6 = scmp.lt.u32.totalorder %s7228_s8, %s9311_s9 }
 0x63a   :  { %p7234_p7 = pnand %p7232_p6, %p7229_p5 }
 0x63c   :  { %7237 = shalt.err (!%p7234_p7)
}
 0x63d   :  { %5381 = dma.vmem_to_hbm [thread:$0]  %s5379_s25, 32, %s9311_s9, [#allocation3]  }
 0x63e   :  { %7238 = dma.done.wait [#allocation3], 32  }
 0x63f   :  { %7239 = vsyncadd [#allocation3], 4294967264 }
 0x640   :  { %5385 = vsyncpa [#allocation3], 1 }

</bundles_post_ra>
